<compile_context>
chip_gen: v7x
topology: tpu7x:2x2x1
jax: 0.10.0
libtpu: 0.0.40
codegen_flags: <defaults>
</compile_context>

<pallas_src>
import jax
import jax.numpy as jnp
from jax.experimental import pallas as pl
from jax.experimental.pallas import tpu as pltpu


def _vmem_budget_bytes(frac=0.75):
    """Per-generation VMEM budget: ~75% of physical capacity (64 MiB fallback)."""
    cap = 64 << 20
    try:
        cap = int(pltpu.get_tpu_info().vmem_capacity_bytes)
    except Exception:
        pass
    return int(cap * frac)


def _vmem_estimate(TH, W, Cin, Cp, pool, x_itemsize, w_itemsize):
    """Rough VMEM bytes for one grid step (double-buffering everything, plus temps)."""
    rows = TH * W
    rows_out = (TH // 2) * (W // 2) if pool else rows
    x_blk = (TH + 2) * (W + 2) * Cin * x_itemsize
    o_blk = rows_out * Cp * 4
    w_blk = 9 * Cin * Cp * w_itemsize
    b_blk = Cp * 4
    patches = rows * 9 * Cin * max(x_itemsize, 4)   # im2col temporaries (conservative)
    acc = rows * Cp * 4
    return 2 * x_blk + 2 * o_blk + 2 * (w_blk + b_blk) + patches + acc


def _pick_row_tile(H, W, Cin, Cp, pool, x_itemsize, w_itemsize, budget):
    """Largest legal row tile whose block set fits ~60% of the VMEM budget."""
    cands = [t for t in (64, 32, 16, 8, 4, 2) if t <= H and H % t == 0]
    if H not in cands:
        cands.append(H)                       # full-image fallback (always layout-legal)
    legal = []
    for t in cands:
        if pool and t % 2:
            continue
        rows_out = (t // 2) * (W // 2) if pool else t * W
        if t != H and rows_out % 8 != 0:      # (8,128) alignment of the output block
            continue
        legal.append(t)
    if not legal:
        return H
    for t in sorted(legal, reverse=True):
        if _vmem_estimate(t, W, Cin, Cp, pool, x_itemsize, w_itemsize) <= 0.6 * budget:
            return t
    return min(legal)


def _make_kernel(TH, W, Cin, Cp, pool):
    """One grid step = one (batch, row-tile) pair.

    Refs:
      x_ref : (1, 1, TH+2, W+2, Cin)  halo'd NHWC row window (matmul dtype)
      w_ref : (9*Cin, Cp)             3x3 kernel flattened over (ky,kx,Cin), Cout padded
      b_ref : (1, Cp)                 lane-padded bias (f32)
      o_ref : (1, rows_out, Cp)       lane-dense f32 output tile
    """

    def kernel(x_ref, w_ref, b_ref, o_ref):
        xt = x_ref[0, 0]                                     # (TH+2, W+2, Cin)

        # im2col along the channel (lane) axis -> one MXU contraction of depth 9*Cin.
        cols = [xt[dy:dy + TH, dx:dx + W, :]
                for dy in range(3) for dx in range(3)]
        patches = jnp.concatenate(cols, axis=-1).reshape(TH * W, 9 * Cin)

        acc = jnp.dot(patches, w_ref[...], preferred_element_type=jnp.float32)
        y = jnp.maximum(acc + b_ref[...], 0.0)               # bias + ReLU in f32

        if pool:
            # 2x2 stride-2 max-pool in the lane-dense (rows, Cp) layout (rows = i*W + j).
            y = jnp.maximum(y[0::2], y[1::2])                # pool over W
            y = y.reshape(TH, W // 2, Cp)
            y = jnp.maximum(y[0::2], y[1::2])                # pool over H
            y = y.reshape((TH // 2) * (W // 2), Cp)

        o_ref[0] = y.astype(o_ref.dtype)

    return kernel


def conv_block(x_nchw, w_oihw, bias, pool=False, matmul_dtype=None, row_tile=None):
    """Forward pass of ConvBlock. x_nchw: (N, Cin, H, W) float32; returns NCHW float32."""
    N, Cin, H, W = x_nchw.shape
    Cout = w_oihw.shape[0]
    assert w_oihw.shape == (Cout, Cin, 3, 3)
    if pool:
        # PyTorch MaxPool2d(2) floors odd dims; this kernel assumes even spatial dims.
        assert H % 2 == 0 and W % 2 == 0, "pool=True path requires even H, W"

    # Lane-pad Cout: >=128; multiples of 256 above 128 to fill the v6e/v7x MXU width.
    Cp = 128 if Cout <= 128 else ((Cout + 255) // 256) * 256

    op_dtype = matmul_dtype if matmul_dtype is not None else x_nchw.dtype
    x_isz = jnp.dtype(op_dtype).itemsize
    w_isz = x_isz

    budget = _vmem_budget_bytes()
    if row_tile is not None:
        TH = int(row_tile)
    else:
        TH = _pick_row_tile(H, W, Cin, Cp, pool, x_isz, w_isz, budget)
    assert H % TH == 0 and (not pool or TH % 2 == 0)
    R = H // TH
    rows_out = (TH // 2) * (W // 2) if pool else TH * W
    assert TH == H or rows_out % 8 == 0
    Ho, Wo = (H // 2, W // 2) if pool else (H, W)

    # NCHW -> NHWC (cast to matmul dtype) + 1px zero halo + halo'd row windows.
    # (See TODO(synk) at the top about folding this into the kernel.)
    x = jnp.transpose(x_nchw, (0, 2, 3, 1)).astype(op_dtype)
    x = jnp.pad(x, ((0, 0), (1, 1), (1, 1), (0, 0)))
    row_idx = jnp.arange(R)[:, None] * TH + jnp.arange(TH + 2)[None, :]
    x_tiles = x[:, row_idx]                                   # (N, R, TH+2, W+2, Cin)

    # OIHW -> single contiguous (9*Cin, Cout_pad) block; row index = (ky*3+kx)*Cin + c.
    wmat = jnp.transpose(w_oihw, (2, 3, 1, 0)).reshape(9 * Cin, Cout)
    wmat = jnp.pad(wmat, ((0, 0), (0, Cp - Cout))).astype(op_dtype)
    bvec = jnp.pad(bias, (0, Cp - Cout)).reshape(1, Cp).astype(jnp.float32)

    vmem_limit = int(budget)

    def run(single_buffer_consts):
        const_kw = {}
        if single_buffer_consts:
            # Constant index_map -> second pipeline buffer is pure VMEM waste.
            const_kw = dict(pipeline_mode=pl.Buffered(1))
        in_specs = [
            pl.BlockSpec((1, 1, TH + 2, W + 2, Cin), lambda n, r: (n, r, 0, 0, 0)),
            pl.BlockSpec((9 * Cin, Cp), lambda n, r: (0, 0), **const_kw),
            pl.BlockSpec((1, Cp), lambda n, r: (0, 0), **const_kw),
        ]
        out_specs = pl.BlockSpec((1, rows_out, Cp), lambda n, r: (n, r, 0))
        return pl.pallas_call(
            _make_kernel(TH, W, Cin, Cp, pool),
            out_shape=jax.ShapeDtypeStruct((N, R * rows_out, Cp), jnp.float32),
            grid=(N, R),
            in_specs=in_specs,
            out_specs=out_specs,
            compiler_params=pltpu.CompilerParams(
                dimension_semantics=("parallel", "parallel"),
                vmem_limit_bytes=vmem_limit),
        )(x_tiles, wmat, bvec)

    try:
        out = run(True)
    except Exception:
        # This JAX/Mosaic build rejects pipeline_mode=pl.Buffered(1); use default buffering.
        out = run(False)

    # (N, Ho*Wo, Cout_pad) -> (N, Cout, Ho, Wo)
    out = out.reshape(N, Ho, Wo, Cp)[..., :Cout]
    return jnp.transpose(out, (0, 3, 1, 2))


def ref_conv_block(x_nchw, w_oihw, bias, pool=False):
    """Pure-JAX reference (matches PyTorch semantics)."""
    y = jax.lax.conv_general_dilated(
        x_nchw, w_oihw, window_strides=(1, 1), padding="SAME",
        dimension_numbers=("NCHW", "OIHW", "NCHW"))
    y = y + bias[None, :, None, None]
    y = jnp.maximum(y, 0.0)
    if pool:
        y = jax.lax.reduce_window(
            y, -jnp.inf, jax.lax.max,
            window_dimensions=(1, 1, 2, 2),
            window_strides=(1, 1, 2, 2),
            padding="VALID")
    return y


if __name__ == "__main__":
    # Small, deterministic setup: batch=2, in_channels=4, out_channels=8, 16x16 spatial.
    N, Cin, Cout, H, W = 2, 4, 8, 16, 16

    key = jax.random.PRNGKey(0)
    kx, kw, kb = jax.random.split(key, 3)
    x = jax.random.normal(kx, (N, Cin, H, W), dtype=jnp.float32)
    # PyTorch Conv2d init scale: uniform(-1/sqrt(fan_in), 1/sqrt(fan_in)), fan_in = Cin*3*3.
    bound = 1.0 / jnp.sqrt(jnp.array(Cin * 3 * 3, jnp.float32))
    w = jax.random.uniform(kw, (Cout, Cin, 3, 3), jnp.float32, -bound, bound)
    b = jax.random.uniform(kb, (Cout,), jnp.float32, -bound, bound)

    ref0 = ref_conv_block(x, w, b, pool=False)
    ref1 = ref_conv_block(x, w, b, pool=True)

    # pool=False, f32 operands, auto-picked row tile.
    out0 = jax.block_until_ready(conv_block(x, w, b, pool=False))
    assert out0.shape == (N, Cout, H, W), out0.shape
    assert jnp.allclose(out0, ref0, atol=1e-5, rtol=1e-5), "pool=False mismatch"

    # pool=True, f32 operands.
    out1 = jax.block_until_ready(conv_block(x, w, b, pool=True))
    assert out1.shape == (N, Cout, H // 2, W // 2), out1.shape
    assert jnp.allclose(out1, ref1, atol=1e-5, rtol=1e-5), "pool=True mismatch"

    # Multi-row-tile path (R=2, halo windows), f32.
    out2 = jax.block_until_ready(conv_block(x, w, b, pool=True, row_tile=8))
    assert jnp.allclose(out2, ref1, atol=1e-5, rtol=1e-5), "row-tiled pool mismatch"

    # bf16 MXU operands (wrapper-side cast), f32 accumulation — looser tolerance.
    out3 = jax.block_until_ready(
        conv_block(x, w, b, pool=False, matmul_dtype=jnp.bfloat16, row_tile=8))
    assert out3.shape == (N, Cout, H, W), out3.shape
    assert jnp.allclose(out3, ref0, atol=5e-2, rtol=5e-2), "bf16 mismatch"

    print("KERNEL_OK")
</pallas_src>

<mosaic_0001>
module attributes {stable_mosaic.version = 11 : i64} {
  func.func @kernel(%arg0: i32, %arg1: i32, %arg2: memref<1x1x18x18x4xf32, #tpu.memory_space<vmem>>, %arg3: memref<36x128xf32, #tpu.memory_space<vmem>>, %arg4: memref<1x128xf32, #tpu.memory_space<vmem>>, %arg5: memref<1x256x128xf32, #tpu.memory_space<vmem>>) attributes {dimension_semantics = [#tpu.dimension_semantics<parallel>, #tpu.dimension_semantics<parallel>], iteration_bounds = array<i64: 2, 1>, scalar_prefetch = 0 : i64, scratch_operands = 0 : i64, tpu.core_type = #tpu.core_type<tc>, window_params = [{transform_indices = @transform_0, window_bounds = array<i64: 1, 1, 18, 18, 4>}, {pipeline_mode = #tpu.pipeline_mode<synchronous>, transform_indices = @transform_1, window_bounds = array<i64: 36, 128>}, {pipeline_mode = #tpu.pipeline_mode<synchronous>, transform_indices = @transform_2, window_bounds = array<i64: 1, 128>}, {transform_indices = @transform_3, window_bounds = array<i64: 1, 256, 128>}]} {
    %c0 = arith.constant 0 : index
    %c0_0 = arith.constant 0 : index
    %c0_1 = arith.constant 0 : index
    %c0_2 = arith.constant 0 : index
    %c0_3 = arith.constant 0 : index
    %0 = vector.load %arg2[%c0, %c0_0, %c0_1, %c0_2, %c0_3] : memref<1x1x18x18x4xf32, #tpu.memory_space<vmem>>, vector<1x1x18x18x4xf32>
    %1 = vector.shape_cast %0 : vector<1x1x18x18x4xf32> to vector<18x18x4xf32>
    %2 = vector.extract_strided_slice %1 {offsets = [0, 0, 0], sizes = [16, 16, 4], strides = [1, 1, 1]} : vector<18x18x4xf32> to vector<16x16x4xf32>
    %3 = vector.extract_strided_slice %1 {offsets = [0, 1, 0], sizes = [16, 16, 4], strides = [1, 1, 1]} : vector<18x18x4xf32> to vector<16x16x4xf32>
    %4 = vector.extract_strided_slice %1 {offsets = [0, 2, 0], sizes = [16, 16, 4], strides = [1, 1, 1]} : vector<18x18x4xf32> to vector<16x16x4xf32>
    %5 = vector.extract_strided_slice %1 {offsets = [1, 0, 0], sizes = [16, 16, 4], strides = [1, 1, 1]} : vector<18x18x4xf32> to vector<16x16x4xf32>
    %6 = vector.extract_strided_slice %1 {offsets = [1, 1, 0], sizes = [16, 16, 4], strides = [1, 1, 1]} : vector<18x18x4xf32> to vector<16x16x4xf32>
    %7 = vector.extract_strided_slice %1 {offsets = [1, 2, 0], sizes = [16, 16, 4], strides = [1, 1, 1]} : vector<18x18x4xf32> to vector<16x16x4xf32>
    %8 = vector.extract_strided_slice %1 {offsets = [2, 0, 0], sizes = [16, 16, 4], strides = [1, 1, 1]} : vector<18x18x4xf32> to vector<16x16x4xf32>
    %9 = vector.extract_strided_slice %1 {offsets = [2, 1, 0], sizes = [16, 16, 4], strides = [1, 1, 1]} : vector<18x18x4xf32> to vector<16x16x4xf32>
    %10 = vector.extract_strided_slice %1 {offsets = [2, 2, 0], sizes = [16, 16, 4], strides = [1, 1, 1]} : vector<18x18x4xf32> to vector<16x16x4xf32>
    %11 = tpu.concatenate %2, %3, %4, %5, %6, %7, %8, %9, %10 in 2 : vector<16x16x4xf32>, vector<16x16x4xf32>, vector<16x16x4xf32>, vector<16x16x4xf32>, vector<16x16x4xf32>, vector<16x16x4xf32>, vector<16x16x4xf32>, vector<16x16x4xf32>, vector<16x16x4xf32> -> vector<16x16x36xf32>
    %12 = vector.shape_cast %11 : vector<16x16x36xf32> to vector<256x36xf32>
    %c0_4 = arith.constant 0 : index
    %c0_5 = arith.constant 0 : index
    %13 = vector.load %arg3[%c0_4, %c0_5] : memref<36x128xf32, #tpu.memory_space<vmem>>, vector<36x128xf32>
    %cst = arith.constant dense<0.000000e+00> : vector<256x128xf32>
    %14 = tpu.matmul %12, %13, %cst {dimension_numbers = #tpu.dot_dimension_numbers<[1], [0], [0], [1], [0, 0, 1, 1], [], []>} : vector<256x36xf32>, vector<36x128xf32>, vector<256x128xf32> -> vector<256x128xf32>
    %c0_6 = arith.constant 0 : index
    %c0_7 = arith.constant 0 : index
    %15 = vector.load %arg4[%c0_6, %c0_7] : memref<1x128xf32, #tpu.memory_space<vmem>>, vector<1x128xf32>
    %16 = vector.broadcast %15 : vector<1x128xf32> to vector<256x128xf32>
    %17 = arith.addf %14, %16 : vector<256x128xf32>
    %cst_8 = arith.constant 0.000000e+00 : f32
    %18 = vector.broadcast %cst_8 : f32 to vector<256x128xf32>
    %19 = arith.maximumf %17, %18 : vector<256x128xf32>
    %c0_9 = arith.constant 0 : index
    %c0_10 = arith.constant 0 : index
    %c0_11 = arith.constant 0 : index
    %20 = vector.load %arg5[%c0_9, %c0_10, %c0_11] : memref<1x256x128xf32, #tpu.memory_space<vmem>>, vector<1x256x128xf32>
    %21 = vector.shape_cast %20 : vector<1x256x128xf32> to vector<256x128xf32>
    %22 = vector.shape_cast %19 : vector<256x128xf32> to vector<1x256x128xf32>
    tpu.vector_store %arg5[%c0_9, %c0_10, %c0_11], %22 {strides = array<i32>} : memref<1x256x128xf32, #tpu.memory_space<vmem>>, vector<1x256x128xf32>,
    return
  }
  func.func @transform_0(%arg0: i32, %arg1: i32) -> (i32, i32, i32, i32, i32) {
    %c0_i32 = arith.constant 0 : i32
    %c0_i32_0 = arith.constant 0 : i32
    %c0_i32_1 = arith.constant 0 : i32
    %c0_i32_2 = arith.constant 0 : i32
    return %arg0, %arg1, %c0_i32, %c0_i32_0, %c0_i32_1 : i32, i32, i32, i32, i32
  }
  func.func @transform_1(%arg0: i32, %arg1: i32) -> (i32, i32) {
    %c0_i32 = arith.constant 0 : i32
    %c0_i32_0 = arith.constant 0 : i32
    %c0_i32_1 = arith.constant 0 : i32
    return %c0_i32, %c0_i32_0 : i32, i32
  }
  func.func @transform_2(%arg0: i32, %arg1: i32) -> (i32, i32) {
    %c0_i32 = arith.constant 0 : i32
    %c0_i32_0 = arith.constant 0 : i32
    %c0_i32_1 = arith.constant 0 : i32
    return %c0_i32, %c0_i32_0 : i32, i32
  }
  func.func @transform_3(%arg0: i32, %arg1: i32) -> (i32, i32, i32) {
    %c0_i32 = arith.constant 0 : i32
    %c0_i32_0 = arith.constant 0 : i32
    return %arg0, %arg1, %c0_i32 : i32, i32, i32
  }
}

module attributes {stable_mosaic.version = 11 : i64} {
  func.func @kernel(%arg0: i32, %arg1: i32, %arg2: memref<1x1x18x18x4xf32, #tpu.memory_space<vmem>>, %arg3: memref<36x128xf32, #tpu.memory_space<vmem>>, %arg4: memref<1x128xf32, #tpu.memory_space<vmem>>, %arg5: memref<1x256x128xf32, #tpu.memory_space<vmem>>) attributes {dimension_semantics = [#tpu.dimension_semantics<parallel>, #tpu.dimension_semantics<parallel>], iteration_bounds = array<i64: 2, 1>, scalar_prefetch = 0 : i64, scratch_operands = 0 : i64, tpu.core_type = #tpu.core_type<tc>, window_params = [{transform_indices = @transform_0, window_bounds = array<i64: 1, 1, 18, 18, 4>}, {pipeline_mode = #tpu.pipeline_mode<synchronous>, transform_indices = @transform_1, window_bounds = array<i64: 36, 128>}, {pipeline_mode = #tpu.pipeline_mode<synchronous>, transform_indices = @transform_2, window_bounds = array<i64: 1, 128>}, {transform_indices = @transform_3, window_bounds = array<i64: 1, 256, 128>}]} {
    %c0 = arith.constant 0 : index
    %c0_0 = arith.constant 0 : index
    %c0_1 = arith.constant 0 : index
    %c0_2 = arith.constant 0 : index
    %c0_3 = arith.constant 0 : index
    %0 = vector.load %arg2[%c0, %c0_0, %c0_1, %c0_2, %c0_3] : memref<1x1x18x18x4xf32, #tpu.memory_space<vmem>>, vector<1x1x18x18x4xf32>
    %1 = vector.shape_cast %0 : vector<1x1x18x18x4xf32> to vector<18x18x4xf32>
    %2 = vector.extract_strided_slice %1 {offsets = [0, 0, 0], sizes = [16, 16, 4], strides = [1, 1, 1]} : vector<18x18x4xf32> to vector<16x16x4xf32>
    %3 = vector.extract_strided_slice %1 {offsets = [0, 1, 0], sizes = [16, 16, 4], strides = [1, 1, 1]} : vector<18x18x4xf32> to vector<16x16x4xf32>
    %4 = vector.extract_strided_slice %1 {offsets = [0, 2, 0], sizes = [16, 16, 4], strides = [1, 1, 1]} : vector<18x18x4xf32> to vector<16x16x4xf32>
    %5 = vector.extract_strided_slice %1 {offsets = [1, 0, 0], sizes = [16, 16, 4], strides = [1, 1, 1]} : vector<18x18x4xf32> to vector<16x16x4xf32>
    %6 = vector.extract_strided_slice %1 {offsets = [1, 1, 0], sizes = [16, 16, 4], strides = [1, 1, 1]} : vector<18x18x4xf32> to vector<16x16x4xf32>
    %7 = vector.extract_strided_slice %1 {offsets = [1, 2, 0], sizes = [16, 16, 4], strides = [1, 1, 1]} : vector<18x18x4xf32> to vector<16x16x4xf32>
    %8 = vector.extract_strided_slice %1 {offsets = [2, 0, 0], sizes = [16, 16, 4], strides = [1, 1, 1]} : vector<18x18x4xf32> to vector<16x16x4xf32>
    %9 = vector.extract_strided_slice %1 {offsets = [2, 1, 0], sizes = [16, 16, 4], strides = [1, 1, 1]} : vector<18x18x4xf32> to vector<16x16x4xf32>
    %10 = vector.extract_strided_slice %1 {offsets = [2, 2, 0], sizes = [16, 16, 4], strides = [1, 1, 1]} : vector<18x18x4xf32> to vector<16x16x4xf32>
    %11 = tpu.concatenate %2, %3, %4, %5, %6, %7, %8, %9, %10 in 2 : vector<16x16x4xf32>, vector<16x16x4xf32>, vector<16x16x4xf32>, vector<16x16x4xf32>, vector<16x16x4xf32>, vector<16x16x4xf32>, vector<16x16x4xf32>, vector<16x16x4xf32>, vector<16x16x4xf32> -> vector<16x16x36xf32>
    %12 = vector.shape_cast %11 : vector<16x16x36xf32> to vector<256x36xf32>
    %c0_4 = arith.constant 0 : index
    %c0_5 = arith.constant 0 : index
    %13 = vector.load %arg3[%c0_4, %c0_5] : memref<36x128xf32, #tpu.memory_space<vmem>>, vector<36x128xf32>
    %cst = arith.constant dense<0.000000e+00> : vector<256x128xf32>
    %14 = tpu.matmul %12, %13, %cst {dimension_numbers = #tpu.dot_dimension_numbers<[1], [0], [0], [1], [0, 0, 1, 1], [], []>} : vector<256x36xf32>, vector<36x128xf32>, vector<256x128xf32> -> vector<256x128xf32>
    %c0_6 = arith.constant 0 : index
    %c0_7 = arith.constant 0 : index
    %15 = vector.load %arg4[%c0_6, %c0_7] : memref<1x128xf32, #tpu.memory_space<vmem>>, vector<1x128xf32>
    %16 = vector.broadcast %15 : vector<1x128xf32> to vector<256x128xf32>
    %17 = arith.addf %14, %16 : vector<256x128xf32>
    %cst_8 = arith.constant 0.000000e+00 : f32
    %18 = vector.broadcast %cst_8 : f32 to vector<256x128xf32>
    %19 = arith.maximumf %17, %18 : vector<256x128xf32>
    %c0_9 = arith.constant 0 : index
    %c0_10 = arith.constant 0 : index
    %c0_11 = arith.constant 0 : index
    %20 = vector.load %arg5[%c0_9, %c0_10, %c0_11] : memref<1x256x128xf32, #tpu.memory_space<vmem>>, vector<1x256x128xf32>
    %21 = vector.shape_cast %20 : vector<1x256x128xf32> to vector<256x128xf32>
    %22 = vector.shape_cast %19 : vector<256x128xf32> to vector<1x256x128xf32>
    tpu.vector_store %arg5[%c0_9, %c0_10, %c0_11], %22 {strides = array<i32>} : memref<1x256x128xf32, #tpu.memory_space<vmem>>, vector<1x256x128xf32>,
    return
  }
  func.func @transform_0(%arg0: i32, %arg1: i32) -> (i32, i32, i32, i32, i32) {
    %c0_i32 = arith.constant 0 : i32
    %c0_i32_0 = arith.constant 0 : i32
    %c0_i32_1 = arith.constant 0 : i32
    %c0_i32_2 = arith.constant 0 : i32
    return %arg0, %arg1, %c0_i32, %c0_i32_0, %c0_i32_1 : i32, i32, i32, i32, i32
  }
  func.func @transform_1(%arg0: i32, %arg1: i32) -> (i32, i32) {
    %c0_i32 = arith.constant 0 : i32
    %c0_i32_0 = arith.constant 0 : i32
    %c0_i32_1 = arith.constant 0 : i32
    return %c0_i32, %c0_i32_0 : i32, i32
  }
  func.func @transform_2(%arg0: i32, %arg1: i32) -> (i32, i32) {
    %c0_i32 = arith.constant 0 : i32
    %c0_i32_0 = arith.constant 0 : i32
    %c0_i32_1 = arith.constant 0 : i32
    return %c0_i32, %c0_i32_0 : i32, i32
  }
  func.func @transform_3(%arg0: i32, %arg1: i32) -> (i32, i32, i32) {
    %c0_i32 = arith.constant 0 : i32
    %c0_i32_0 = arith.constant 0 : i32
    return %arg0, %arg1, %c0_i32 : i32, i32, i32
  }
}

</mosaic_0001>

<bundles_post_ra>
// kernel: tpu_custom_call.1
= control target key start
LH: loop header
LB: loop body
LE: loop exit
PB: predicated region body
PF: predicated region fallthrough
CT: control target
= control target key end

     0   :  { %8 = vsyncpa [#allocation3], 0  ;;  %s4234_s0 = inlined_call_operand.vmem [shape: f32[2,1,18,18,4], index: 0, kind: input, shape index: {}]   ;;  %s4235_s1 = inlined_call_operand.vmem [shape: f32[36,128], index: 1, kind: input, shape index: {}]   ;;  %s4236_s2 = inlined_call_operand.vmem [shape: f32[1,128], index: 2, kind: input, shape index: {}]   ;;  %s4237_s3 = inlined_call_operand.hbm [shape: f32[2,256,128], index: 3, kind: output, shape index: {}]  }
   0x1   :  { %10 = vsyncpa [#allocation3 + $0x1], 0  ;;  %s2369_s12 = smov 0   ;;  %s2371_s13 = smov 0  }
   0x2   :  { %s2373_s14 = smov 0   ;;  %s2375_s15 = smov 0  }
   0x3   :  { %s2377_s16 = smov 0   ;;  %s2379_s17 = smov 0  }
   0x4 LB: > { %s2020_s18 = sadd.s32 4294967295, %s2337_s17   ;;  %s2021_s19 = sadd.s32 4294967294, %s2337_s17   ;;  %s2337_s17 = sphi %s2379_s17, %s16_s17   ;;  %s2333_s16 = sphi %s2377_s16, %s4490_s16   ;;  %s2329_s15 = sphi %s2375_s15, %s4489_s15   ;;  %s2325_s14 = sphi %s2373_s14, %s4488_s14   ;;  %s2321_s13 = sphi %s2371_s13, %s4487_s13   ;;  %s2317_s12 = sphi %s2369_s12, %s4486_s12  }
   0x5   : > { %s28_s20 = sadd.s32 1, %s2333_s16  ;;  %s107_s21 = sadd.s32 1, %s2325_s14 }
   0x6   : > { %p30_p0 = scmp.ge.s32.totalorder %s28_s20, 2  ;;  %p117_p1 = scmp.ne.s32.totalorder %s2325_s14, %s2321_s13 }
   0x7   : > { %p118_p2 = scmp.eq.s32.totalorder %s2020_s18, 1  ;;  %p123_p3 = scmp.ne.s32.totalorder %s2321_s13, %s2317_s12 }
   0x8   : > { %s4492_s20 = smov (%p30_p0, %s28_s20), 0  ;;  %p124_p5 = scmp.eq.s32.totalorder %s2021_s19, 1 }
   0x9   : > { %p2409_p4 = por %p118_p2, %p117_p1  ;;  %s102_s23 = ssub.s32 %s2333_s16, %s4492_s20 }
   0xa   : > { %p2024_p6 = scmp.ge.s32.totalorder %s2337_s17, 1  ;;  %p105_p7 = scmp.eq.s32.totalorder %s102_s23, 0 }
   0xb   : > { %p2416_p8 = por %p124_p5, %p123_p3  ;;  %p160_p9 = scmp.lt.s32.totalorder %s2337_s17, 3 }
   0xc   : > { %s2422_s25 = scalar_select %p105_p7, %s2325_s14, %s107_s21  }
   0xd   : > { %p161_p10 = pnand %p2024_p6, %p160_p9 }
   0xf   : > { %164 = sbr.rel (%p161_p10) target bundleno = 890 (0x37a), region = 32 }
  0x16   : > { %p188_p11 = scmp.lt.s32.totalorder %s2329_s15, 1  ;;  %vm300_vm0 = vcmask 1046528   ;;  %s2339_s4 = smov 4   ;;  %vm477_vm1 = vcmask 1045504   ;;  %vm1256_vm2 = vcmask 31744   ;;  %vm1289_vm3 = vcmask 64512  }
  0x17   : > { %s2340_s5 = smov 8   ;;  %s2341_s6 = smov 12   ;;  %vm1629_vm4 = vcmask 1043456   ;;  %vm1322_vm5 = vcmask 97280   ;;  %vm1355_vm6 = vcmask 130048   ;;  %vm1388_vm7 = vcmask 162816  }
  0x18   : > { %s189_s26 = scalar_select %p188_p11, %s2329_s15, 1  ;;  %vm1421_vm8 = vcmask 195584   ;;  %vm1454_vm9 = vcmask 228352   ;;  %vm1487_vm10 = vcmask 261120   ;;  %vm1532_vm11 = vcmask 293888  }
  0x19   : > { %s2342_s7 = smov 16   ;;  %s2343_s8 = smov 20  }
  0x1a   : > { %s2176_s27 = smul.u32 432, %s189_s26  ;;  %s2344_s9 = smov 24  }
  0x1b   : > { %s2345_s21 = smov 28   ;;  %s2066_s11 = sshll.u32 %s2329_s15, 12 }
  0x1c   : > { %s2429_s30 = scalar_lea.vmem %s4234_s0, %s2176_s27  ;;  %s4177_s23 = scalar_lea.hbm %s4237_s3, %s2066_s11 }
  0x1d   : > { %v2432_v0 = vld [vmem:[%s2429_s30 + $0x18] sm:$0xff]  ;;  %v2435_v1 = vld [vmem:[%s2429_s30 + $0x20] sm:$0xff]  ;;  %v2443_v5 = vld [vmem:[%s2429_s30 + $0x8] sm:$0xff]  ;;  %s2347_s27 = smov [#allocation2]  }
  0x1e   : > { %v2438_v2 = vld [vmem:[%s2429_s30] sm:$0xff]  ;;  %v306_v3 = vrot.slane %v2432_v0, 1  ;;  %v307_v4 = vrot.slane %v2435_v1, 1  ;;  %v2447_v7 = vld [vmem:[%s2429_s30 + $0x28] sm:$0x3]  ;;  %v302_v8 = vrot.slane %v2443_v5, 1 }
  0x1f   : > { %v301_v6 = vrot.slane %v2438_v2, 1  ;;  %v309_v9 = vrot.slane %v2447_v7, 1  ;;  %v2452_v10 = vld [vmem:[%s2429_s30 + $0x10] sm:$0x3]  ;;  %v2455_v11 = vld [vmem:[%s2429_s30 + $0x38] sm:$0xff]  ;;  %v2485_v24 = vld [vmem:[%s2429_s30 + $0x48] sm:$0xff] }
  0x20   : > { %v2458_v12 = vsel %vm300_vm0, %v306_v3, %v307_v4  ;;  %v304_v13 = vrot.slane %v2452_v10, 1  ;;  %v2462_v14 = vld [vmem:[%s2429_s30 + $0x40] sm:$0x3]  ;;  %v2465_v15 = vld [vmem:[%s2429_s30 + $0x30] sm:$0xff]  ;;  %v312_v18 = vrot.slane %v2455_v11, 1  ;;  %v316_v29 = vrot.slane %v2485_v24, 1 }
  0x21   : > { %385 = vrot.lane.b32.xlu1 %v2458_v12, %s2339_s4  ;;  %v303_v16 = vsel %vm300_vm0, %v301_v6, %v302_v8  ;;  %v2472_v17 = vsel %vm300_vm0, %v307_v4, %v309_v9  ;;  %v314_v19 = vrot.slane %v2462_v14, 1  ;;  %v311_v21 = vrot.slane %v2465_v15, 1  ;;  %v2479_v22 = vld [vmem:[%s2429_s30 + $0x50] sm:$0xff]  ;;  %v2482_v23 = vld [vmem:[%s2429_s30 + $0x58] sm:$0x3]  ;;  %v2500_v30 = vld [vmem:[%s2429_s30 + $0x68] sm:$0xff] }
  0x22   : > { %381 = vrot.lane.b32.xlu0 %v303_v16, %s2339_s4  ;;  %v305_v20 = vsel %vm300_vm0, %v302_v8, %v304_v13  ;;  %v317_v26 = vrot.slane %v2479_v22, 1  ;;  %v319_v27 = vrot.slane %v2482_v23, 1  ;;  %v2503_v31 = vld [vmem:[%s2429_s30 + $0x70] sm:$0x3]  ;;  %v2506_v32 = vld [vmem:[%s2429_s30 + $0x60] sm:$0xff]  ;;  %v322_v34 = vrot.slane %v2500_v30, 1 }
  0x23   : > { %v2491_v25 = vsel %vm300_vm0, %v312_v18, %v314_v19  ;;  %v2496_v28 = vsel %vm300_vm0, %v311_v21, %v312_v18  ;;  %v324_v35 = vrot.slane %v2503_v31, 1  ;;  %v321_v37 = vrot.slane %v2506_v32, 1  ;;  %v2522_v38 = vld [vmem:[%s2429_s30 + $0x80] sm:$0xff]  ;;  %v2525_v39 = vld [vmem:[%s2429_s30 + $0x88] sm:$0x3]  ;;  %v2528_v40 = vld [vmem:[%s2429_s30 + $0x78] sm:$0xff] }
  0x24   : > { %v2513_v33 = vsel %vm300_vm0, %v317_v26, %v319_v27  ;;  %v2518_v36 = vsel %vm300_vm0, %v316_v29, %v317_v26  ;;  %v327_v42 = vrot.slane %v2522_v38, 1  ;;  %v329_v43 = vrot.slane %v2525_v39, 1  ;;  %v2544_v46 = vld [vmem:[%s2429_s30 + $0x98] sm:$0xff]  ;;  %v2547_v47 = vld [vmem:[%s2429_s30 + $0xa0] sm:$0x3]  ;;  %v2550_v48 = vld [vmem:[%s2429_s30 + $0x90] sm:$0xff] }
  0x25   : > { %387 = vrot.lane.b32.xlu1 %v2472_v17, %s2339_s4  ;;  %4340 = vst [vmem:[#allocation5_spill] sm:$0xff] %v2513_v33  ;;  %4341 = vst [vmem:[#allocation6_spill] sm:$0xff] %v2518_v36  ;;  %v2535_v41 = vsel %vm300_vm0, %v322_v34, %v324_v35  ;;  %v2540_v44 = vsel %vm300_vm0, %v321_v37, %v322_v34  ;;  %v326_v45 = vrot.slane %v2528_v40, 1  ;;  %v332_v50 = vrot.slane %v2544_v46, 1  ;;  %v2566_v54 = vld [vmem:[%s2429_s30 + $0xb0] sm:$0xff]  ;;  %v2572_v56 = vld [vmem:[%s2429_s30 + $0xa8] sm:$0xff] }
  0x26   : > { %383 = vrot.lane.b32.xlu0 %v305_v20, %s2339_s4  ;;  %4342 = vst [vmem:[#allocation7_spill] sm:$0xff] %v2535_v41  ;;  %4343 = vst [vmem:[#allocation8_spill] sm:$0xff] %v2540_v44  ;;  %v2557_v49 = vsel %vm300_vm0, %v327_v42, %v329_v43  ;;  %v334_v51 = vrot.slane %v2547_v47, 1  ;;  %v331_v53 = vrot.slane %v2550_v48, 1  ;;  %v2569_v55 = vld [vmem:[%s2429_s30 + $0xb8] sm:$0x3] }
  0x27   : > { %4344 = vst [vmem:[#allocation9_spill] sm:$0xff] %v2557_v49  ;;  %v2562_v52 = vsel %vm300_vm0, %v326_v45, %v327_v42  ;;  %v337_v58 = vrot.slane %v2566_v54, 1  ;;  %v339_v59 = vrot.slane %v2569_v55, 1  ;;  %v336_v61 = vrot.slane %v2572_v56, 1  ;;  %v2588_v62 = vld [vmem:[%s2429_s30 + $0xc8] sm:$0xff]  ;;  %v2594_v3 = vld [vmem:[%s2429_s30 + $0xc0] sm:$0xff] }
  0x28   : > { %4345 = vst [vmem:[#allocation10_spill] sm:$0xff] %v2562_v52  ;;  %v2579_v57 = vsel %vm300_vm0, %v332_v50, %v334_v51  ;;  %v2584_v60 = vsel %vm300_vm0, %v331_v53, %v332_v50  ;;  %v2591_v63 = vld [vmem:[%s2429_s30 + $0xd0] sm:$0x3]  ;;  %v342_v6 = vrot.slane %v2588_v62, 1  ;;  %v341_v13 = vrot.slane %v2594_v3, 1  ;;  %v2610_v16 = vld [vmem:[%s2429_s30 + $0xe0] sm:$0xff] }
  0x29   : > { %391 = vrot.lane.b32.xlu1 %v2491_v25, %s2339_s4  ;;  %4346 = vst [vmem:[#allocation11_spill] sm:$0xff] %v2579_v57  ;;  %4347 = vst [vmem:[#allocation12_spill] sm:$0xff] %v2584_v60  ;;  %v2601_v4 = vsel %vm300_vm0, %v337_v58, %v339_v59  ;;  %v344_v8 = vrot.slane %v2591_v63, 1  ;;  %v2606_v9 = vsel %vm300_vm0, %v336_v61, %v337_v58  ;;  %v2613_v18 = vld [vmem:[%s2429_s30 + $0xe8] sm:$0x3]  ;;  %v2616_v19 = vld [vmem:[%s2429_s30 + $0xd8] sm:$0xff] }
  0x2a   : > { %389 = vrot.lane.b32.xlu0 %v2496_v28, %s2339_s4  ;;  %4348 = vst [vmem:[#allocation13_spill] sm:$0xff] %v2601_v4  ;;  %4349 = vst [vmem:[#allocation14_spill] sm:$0xff] %v2606_v9  ;;  %v347_v21 = vrot.slane %v2610_v16, 1  ;;  %v349_v26 = vrot.slane %v2613_v18, 1  ;;  %v2628_v27 = vsel %vm300_vm0, %v341_v13, %v342_v6  ;;  %v346_v29 = vrot.slane %v2616_v19, 1  ;;  %v2632_v34 = vld [vmem:[%s2429_s30 + $0xf8] sm:$0xff] }
  0x2b   : > { %v2623_v20 = vsel %vm300_vm0, %v342_v6, %v344_v8  ;;  %4351 = vst [vmem:[#allocation16_spill] sm:$0xff] %v2628_v27  ;;  %v2635_v35 = vld [vmem:[%s2429_s30 + $0x100] sm:$0x3]  ;;  %v2638_v37 = vld [vmem:[%s2429_s30 + $0xf0] sm:$0xff]  ;;  %v352_v43 = vrot.slane %v2632_v34, 1  ;;  %v2660_v59 = vld [vmem:[%s2429_s30 + $0x108] sm:$0xff] }
  0x2c   : > { %4350 = vst [vmem:[#allocation15_spill] sm:$0xff] %v2623_v20  ;;  %v2645_v42 = vsel %vm300_vm0, %v347_v21, %v349_v26  ;;  %v354_v45 = vrot.slane %v2635_v35, 1  ;;  %v2650_v50 = vsel %vm300_vm0, %v346_v29, %v347_v21  ;;  %v351_v51 = vrot.slane %v2638_v37, 1  ;;  %v2654_v53 = vld [vmem:[%s2429_s30 + $0x110] sm:$0xff]  ;;  %v2657_v58 = vld [vmem:[%s2429_s30 + $0x118] sm:$0x3] }
  0x2d   : > { %395 = vrot.lane.b32.xlu1 %v2513_v33, %s2339_s4  ;;  %4352 = vst [vmem:[#allocation17_spill] sm:$0xff] %v2645_v42  ;;  %v357_v6 = vrot.slane %v2654_v53, 1  ;;  %v359_v8 = vrot.slane %v2657_v58, 1  ;;  %v356_v21 = vrot.slane %v2660_v59, 1  ;;  %v2676_v26 = vld [vmem:[%s2429_s30 + $0x128] sm:$0xff]  ;;  %v2726_v33 = vld [vmem:[%s2429_s30 + $0x150] sm:$0xff] }
  0x2e   : > { %393 = vrot.lane.b32.xlu0 %v2518_v36, %s2339_s4  ;;  %v2667_v61 = vsel %vm300_vm0, %v352_v43, %v354_v45  ;;  %v2672_v13 = vsel %vm300_vm0, %v351_v51, %v352_v43  ;;  %v2679_v29 = vld [vmem:[%s2429_s30 + $0x130] sm:$0x3]  ;;  %v362_v43 = vrot.slane %v2676_v26, 1  ;;  %s2263_s28 = sshll.u32 %s2347_s27, 4  ;;  %s2264_s28 = int_to_ptr.vmem [resolvable:$false] %s2263_s28 }
  0x2f   : > { %4353 = vst [vmem:[#allocation18_spill] sm:$0xff] %v2667_v61  ;;  %4354 = vst [vmem:[#allocation19_spill] sm:$0xff] %v2672_v13  ;;  %v2689_v45 = vsel %vm300_vm0, %v357_v6, %v359_v8  ;;  %v364_v51 = vrot.slane %v2679_v29, 1  ;;  %s2265_s29 = scalar_lea.vmem %s2264_s28, 8192 }
  0x30   : > { %4355 = vst [vmem:[#allocation20_spill] sm:$0xff] %v2689_v45 }
  0x31   : > { %399 = vrot.lane.b32.xlu1 %v2535_v41, %s2339_s4  ;;  %v2711_v8 = vsel %vm300_vm0, %v362_v43, %v364_v51  ;;  %v2720_v41 = vld [vmem:[%s2429_s30 + $0x158] sm:$0xff] }
  0x32   : > { %397 = vrot.lane.b32.xlu0 %v2540_v44, %s2339_s4  ;;  %4357 = vst [vmem:[#allocation22_spill] sm:$0xff] %v2711_v8  ;;  %v2723_v44 = vld [vmem:[%s2429_s30 + $0x160] sm:$0x3] }
  0x35   : > { %403 = vrot.lane.b32.xlu1 %v2557_v49, %s2339_s4 }
  0x36   : > { %401 = vrot.lane.b32.xlu0 %v2562_v52, %s2339_s4 }
  0x39   : > { %407 = vrot.lane.b32.xlu1 %v2579_v57, %s2339_s4  ;;  %v2701_v57 = vld [vmem:[%s2429_s30 + $0x148] sm:$0x3] }
  0x3a   : > { %405 = vrot.lane.b32.xlu0 %v2584_v60, %s2339_s4  ;;  %v2704_v60 = vld [vmem:[%s2429_s30 + $0x138] sm:$0xff] }
  0x3b   : > { %v366_v52 = vrot.slane %v2704_v60, 1 }
  0x3d   : > { %411 = vrot.lane.b32.xlu1 %v2601_v4, %s2339_s4 }
  0x3e   : > { %409 = vrot.lane.b32.xlu0 %v2606_v9, %s2339_s4  ;;  %v2698_v9 = vld [vmem:[%s2429_s30 + $0x140] sm:$0xff] }
  0x41   : > { %415 = vrot.lane.b32.xlu1 %v2623_v20, %s2339_s4  ;;  %v2682_v20 = vld [vmem:[%s2429_s30 + $0x120] sm:$0xff] }
  0x42   : > { %413 = vrot.lane.b32.xlu0 %v2628_v27, %s2339_s4  ;;  %v2694_v27 = vsel %vm300_vm0, %v356_v21, %v357_v6  ;;  %v361_v4 = vrot.slane %v2682_v20, 1  ;;  %v367_v6 = vrot.slane %v2698_v9, 1  ;;  %v369_v21 = vrot.slane %v2701_v57, 1 }
  0x43   : > { %4356 = vst [vmem:[#allocation21_spill] sm:$0xff] %v2694_v27 }
  0x44   : > { %v2716_v49 = vsel %vm300_vm0, %v361_v4, %v362_v43  ;;  %v2733_v51 = vsel %vm300_vm0, %v367_v6, %v369_v21  ;;  %v372_v4 = vrot.slane %v2720_v41, 1  ;;  %v374_v43 = vrot.slane %v2723_v44, 1 }
  0x45   : > { %419 = vrot.lane.b32.xlu1 %v2645_v42, %s2339_s4  ;;  %4358 = vst [vmem:[#allocation23_spill] sm:$0xff] %v2716_v49  ;;  %4359 = vst [vmem:[#allocation24_spill] sm:$0xff] %v2733_v51 }
  0x46   : > { %417 = vrot.lane.b32.xlu0 %v2650_v50, %s2339_s4  ;;  %v2755_v21 = vsel %vm300_vm0, %v372_v4, %v374_v43  ;;  %v479_v43 = vrot.slane %v2443_v5, 2  ;;  %v486_v5 = vrot.slane %v2447_v7, 2  ;;  %v488_v7 = vrot.slane %v2465_v15, 2 }
  0x47   : > { %4363 = vst [vmem:[#allocation28_spill] sm:$0xff] %v2755_v21 }
  0x49   : > { %423 = vrot.lane.b32.xlu1 %v2667_v61, %s2339_s4  ;;  %v2742_v61 = vld [vmem:[%s2429_s30 + $0x170] sm:$0xff] }
  0x4a   : > { %421 = vrot.lane.b32.xlu0 %v2672_v13, %s2339_s4  ;;  %4361 = vst [vmem:[#allocation26_spill] sm:$0xff] %v2742_v61  ;;  %v2745_v13 = vld [vmem:[%s2429_s30 + $0x178] sm:$0x3] }
  0x4d   : > { %427 = vrot.lane.b32.xlu1 %v2689_v45, %s2339_s4  ;;  %v2738_v45 = vsel %vm300_vm0, %v366_v52, %v367_v6  ;;  %v377_v52 = vrot.slane %v2742_v61, 1  ;;  %v379_v6 = vrot.slane %v2745_v13, 1 }
  0x4e   : > { %425 = vrot.lane.b32.xlu0 %v2694_v27, %s2339_s4  ;;  %4360 = vst [vmem:[#allocation25_spill] sm:$0xff] %v2738_v45  ;;  %v371_v27 = vrot.slane %v2726_v33, 1 }
  0x51   : > { %431 = vrot.lane.b32.xlu1 %v2711_v8, %s2339_s4  ;;  %v2748_v8 = vld [vmem:[%s2429_s30 + $0x168] sm:$0xff] }
  0x52   : > { %429 = vrot.lane.b32.xlu0 %v2716_v49, %s2339_s4  ;;  %4362 = vst [vmem:[#allocation27_spill] sm:$0xff] %v2748_v8  ;;  %v2760_v49 = vsel %vm300_vm0, %v371_v27, %v372_v4  ;;  %v376_v42 = vrot.slane %v2748_v8, 1  ;;  %v478_v27 = vrot.slane %v2438_v2, 2 }
  0x53   : > { %4364 = vst [vmem:[#allocation29_spill] sm:$0xff] %v2760_v49 }
  0x54   : > { %v2773_v36 = vsel %vm300_vm0, %v376_v42, %v377_v52  ;;  %v483_v42 = vrot.slane %v2432_v0, 2 }
  0x55   : > { %435 = vrot.lane.b32.xlu1 %v2733_v51, %s2339_s4  ;;  %v2768_v51 = vsel %vm300_vm0, %v377_v52, %v379_v6  ;;  %4366 = vst [vmem:[#allocation31_spill] sm:$0xff] %v2773_v36  ;;  %v484_v6 = vrot.slane %v2435_v1, 2  ;;  %v489_v52 = vrot.slane %v2455_v11, 2 }
  0x56   : > { %433 = vrot.lane.b32.xlu0 %v2738_v45, %s2339_s4  ;;  %4365 = vst [vmem:[#allocation30_spill] sm:$0xff] %v2768_v51  ;;  %v481_v45 = vrot.slane %v2452_v10, 2  ;;  %v480_v10 = vsel %vm477_vm1, %v478_v27, %v479_v43  ;;  %v494_v27 = vrot.slane %v2479_v22, 2 }
  0x57   : > { %v2788_v2 = vsel %vm477_vm1, %v484_v6, %v486_v5 }
  0x58   : > { %v482_v4 = vsel %vm477_vm1, %v479_v43, %v481_v45  ;;  %v491_v45 = vrot.slane %v2462_v14, 2  ;;  %v2806_v14 = vsel %vm477_vm1, %v488_v7, %v489_v52  ;;  %v504_v7 = vrot.slane %v2522_v38, 2 }
  0x59   : > { %439 = vrot.lane.b32.xlu1 %v2755_v21, %s2339_s4  ;;  %v516_v21 = vrot.slane %v2569_v55, 2 }
  0x5a   : > { %437 = vrot.lane.b32.xlu0 %v2760_v49, %s2339_s4  ;;  %v2801_v43 = vsel %vm477_vm1, %v489_v52, %v491_v45  ;;  %v498_v52 = vrot.slane %v2506_v32, 2  ;;  %v521_v49 = vrot.slane %v2591_v63, 2 }
  0x5b   : > { %4367 = vst [vmem:[#allocation32_spill] sm:$0xff] %v2801_v43 }
  0x5d   : > { %443 = vrot.lane.b32.xlu1 %v2768_v51, %s2339_s4  ;;  %v2793_v51 = vsel %vm477_vm1, %v483_v42, %v484_v6  ;;  %v493_v6 = vrot.slane %v2485_v24, 2  ;;  %v501_v42 = vrot.slane %v2503_v31, 2 }
  0x5e   : > { %441 = vrot.lane.b32.xlu0 %v2773_v36, %s2339_s4  ;;  %v511_v36 = vrot.slane %v2547_v47, 2 }
  0x61   : > { %560 = vrot.lane.b32.xlu1 %v482_v4, %s2340_s5  ;;  %v496_v4 = vrot.slane %v2482_v23, 2  ;;  %v2819_v23 = vsel %vm477_vm1, %v493_v6, %v494_v27 }
  0x62   : > { %558 = vrot.lane.b32.xlu0 %v480_v10, %s2340_s5  ;;  %v499_v10 = vrot.slane %v2500_v30, 2  ;;  %4369 = vst [vmem:[#allocation34_spill] sm:$0xff] %v2819_v23 }
  0x63   : > { %v2814_v5 = vsel %vm477_vm1, %v494_v27, %v496_v4  ;;  %v506_v4 = vrot.slane %v2525_v39, 2  ;;  %v503_v27 = vrot.slane %v2528_v40, 2 }
  0x64   : > { %4368 = vst [vmem:[#allocation33_spill] sm:$0xff] %v2814_v5  ;;  %v2827_v45 = vsel %vm477_vm1, %v499_v10, %v501_v42  ;;  %v2832_v31 = vsel %vm477_vm1, %v498_v52, %v499_v10  ;;  %v509_v42 = vrot.slane %v2544_v46, 2  ;;  %v508_v10 = vrot.slane %v2550_v48, 2 }
  0x65   : > { %564 = vrot.lane.b32.xlu1 %v2788_v2, %s2340_s5  ;;  %4370 = vst [vmem:[#allocation35_spill] sm:$0xff] %v2827_v45  ;;  %4371 = vst [vmem:[#allocation36_spill] sm:$0xff] %v2832_v31  ;;  %v2840_v6 = vsel %vm477_vm1, %v504_v7, %v506_v4  ;;  %v2845_v39 = vsel %vm477_vm1, %v503_v27, %v504_v7  ;;  %v514_v4 = vrot.slane %v2566_v54, 2  ;;  %v513_v7 = vrot.slane %v2572_v56, 2 }
  0x66   : > { %562 = vrot.lane.b32.xlu0 %v2793_v51, %s2340_s5  ;;  %4372 = vst [vmem:[#allocation37_spill] sm:$0xff] %v2840_v6  ;;  %4373 = vst [vmem:[#allocation38_spill] sm:$0xff] %v2845_v39  ;;  %v2853_v52 = vsel %vm477_vm1, %v509_v42, %v511_v36  ;;  %v2858_v47 = vsel %vm477_vm1, %v508_v10, %v509_v42  ;;  %v519_v36 = vrot.slane %v2588_v62, 2  ;;  %v518_v42 = vrot.slane %v2594_v3, 2 }
  0x67   : > { %4374 = vst [vmem:[#allocation39_spill] sm:$0xff] %v2853_v52  ;;  %4375 = vst [vmem:[#allocation40_spill] sm:$0xff] %v2858_v47  ;;  %v2866_v27 = vsel %vm477_vm1, %v514_v4, %v516_v21  ;;  %v2871_v55 = vsel %vm477_vm1, %v513_v7, %v514_v4  ;;  %v524_v21 = vrot.slane %v2610_v16, 2  ;;  %v523_v4 = vrot.slane %v2616_v19, 2 }
  0x68   : > { %4376 = vst [vmem:[#allocation41_spill] sm:$0xff] %v2866_v27  ;;  %4377 = vst [vmem:[#allocation42_spill] sm:$0xff] %v2871_v55  ;;  %v2879_v10 = vsel %vm477_vm1, %v519_v36, %v521_v49  ;;  %v2884_v63 = vsel %vm477_vm1, %v518_v42, %v519_v36  ;;  %v529_v49 = vrot.slane %v2632_v34, 2  ;;  %v528_v36 = vrot.slane %v2638_v37, 2 }
  0x69   : > { %568 = vrot.lane.b32.xlu1 %v2801_v43, %s2340_s5  ;;  %4378 = vst [vmem:[#allocation43_spill] sm:$0xff] %v2879_v10  ;;  %4379 = vst [vmem:[#allocation44_spill] sm:$0xff] %v2884_v63 }
  0x6a   : > { %566 = vrot.lane.b32.xlu0 %v2806_v14, %s2340_s5 }
  0x6d   : > { %572 = vrot.lane.b32.xlu1 %v2814_v5, %s2340_s5 }
  0x6e   : > { %570 = vrot.lane.b32.xlu0 %v2819_v23, %s2340_s5 }
  0x71   : > { %576 = vrot.lane.b32.xlu1 %v2827_v45, %s2340_s5 }
  0x72   : > { %574 = vrot.lane.b32.xlu0 %v2832_v31, %s2340_s5 }
  0x75   : > { %580 = vrot.lane.b32.xlu1 %v2840_v6, %s2340_s5 }
  0x76   : > { %578 = vrot.lane.b32.xlu0 %v2845_v39, %s2340_s5 }
  0x79   : > { %584 = vrot.lane.b32.xlu1 %v2853_v52, %s2340_s5  ;;  %v526_v52 = vrot.slane %v2613_v18, 2  ;;  %v2897_v18 = vsel %vm477_vm1, %v523_v4, %v524_v21 }
  0x7a   : > { %582 = vrot.lane.b32.xlu0 %v2858_v47, %s2340_s5  ;;  %v551_v47 = vrot.slane %v2723_v44, 2  ;;  %v554_v44 = vrot.slane %v2742_v61, 2 }
  0x7b   : > { %v2892_v7 = vsel %vm477_vm1, %v524_v21, %v526_v52  ;;  %v534_v52 = vrot.slane %v2654_v53, 2  ;;  %v533_v21 = vrot.slane %v2660_v59, 2 }
  0x7d   : > { %588 = vrot.lane.b32.xlu1 %v2866_v27, %s2340_s5  ;;  %v531_v27 = vrot.slane %v2635_v35, 2  ;;  %v2910_v35 = vsel %vm477_vm1, %v528_v36, %v529_v49 }
  0x7e   : > { %586 = vrot.lane.b32.xlu0 %v2871_v55, %s2340_s5  ;;  %v546_v55 = vrot.slane %v2701_v57, 2 }
  0x7f   : > { %v2905_v42 = vsel %vm477_vm1, %v529_v49, %v531_v27  ;;  %v539_v27 = vrot.slane %v2676_v26, 2  ;;  %v538_v49 = vrot.slane %v2682_v20, 2 }
  0x80   : > { %4380 = vst [vmem:[#allocation45_spill] sm:$0xff] %v2905_v42 }
  0x81   : > { %592 = vrot.lane.b32.xlu1 %v2879_v10, %s2340_s5  ;;  %v536_v10 = vrot.slane %v2657_v58, 2  ;;  %v2923_v58 = vsel %vm477_vm1, %v533_v21, %v534_v52 }
  0x82   : > { %590 = vrot.lane.b32.xlu0 %v2884_v63, %s2340_s5  ;;  %v541_v63 = vrot.slane %v2679_v29, 2  ;;  %4382 = vst [vmem:[#allocation47_spill] sm:$0xff] %v2923_v58  ;;  %v2936_v29 = vsel %vm477_vm1, %v538_v49, %v539_v27 }
  0x83   : > { %v2918_v4 = vsel %vm477_vm1, %v534_v52, %v536_v10  ;;  %v544_v10 = vrot.slane %v2698_v9, 2  ;;  %4384 = vst [vmem:[#allocation49_spill] sm:$0xff] %v2936_v29  ;;  %v543_v52 = vrot.slane %v2704_v60, 2 }
  0x84   : > { %4381 = vst [vmem:[#allocation46_spill] sm:$0xff] %v2918_v4  ;;  %v2931_v36 = vsel %vm477_vm1, %v539_v27, %v541_v63  ;;  %v549_v63 = vrot.slane %v2720_v41, 2  ;;  %v548_v27 = vrot.slane %v2726_v33, 2 }
  0x85   : > { %596 = vrot.lane.b32.xlu1 %v2892_v7, %s2340_s5  ;;  %4383 = vst [vmem:[#allocation48_spill] sm:$0xff] %v2931_v36  ;;  %v2944_v21 = vsel %vm477_vm1, %v544_v10, %v546_v55  ;;  %v2951_v57 = vsel %vm477_vm1, %v543_v52, %v544_v10  ;;  %v553_v52 = vrot.slane %v2748_v8, 2 }
  0x86   : > { %594 = vrot.lane.b32.xlu0 %v2897_v18, %s2340_s5  ;;  %4385 = vst [vmem:[#allocation50_spill] sm:$0xff] %v2944_v21  ;;  %4387 = vst [vmem:[#allocation52_spill] sm:$0xff] %v2951_v57  ;;  %v2961_v55 = vsel %vm477_vm1, %v549_v63, %v551_v47  ;;  %v2968_v10 = vsel %vm477_vm1, %v548_v27, %v549_v63 }
  0x87   : > { %4389 = vst [vmem:[#allocation54_spill] sm:$0xff] %v2961_v55  ;;  %4391 = vst [vmem:[#allocation56_spill] sm:$0xff] %v2968_v10 }
  0x89   : > { %600 = vrot.lane.b32.xlu1 %v2905_v42, %s2340_s5 }
  0x8a   : > { %598 = vrot.lane.b32.xlu0 %v2910_v35, %s2340_s5 }
  0x8d   : > { %604 = vrot.lane.b32.xlu1 %v2918_v4, %s2340_s5 }
  0x8e   : > { %602 = vrot.lane.b32.xlu0 %v2923_v58, %s2340_s5 }
  0x91   : > { %608 = vrot.lane.b32.xlu1 %v2931_v36, %s2340_s5 }
  0x92   : > { %606 = vrot.lane.b32.xlu0 %v2936_v29, %s2340_s5 }
  0x93   : > { %v2948_v6 = vpop.permute.xlu1 %385 }
  0x94   : > { %4386 = vst [vmem:[#allocation51_spill] sm:$0xff] %v2948_v6  ;;  %v2954_v49 = vpop.permute.xlu0 %381  ;;  %v556_v6 = vrot.slane %v2745_v13, 2  ;;  %v2983_v13 = vsel %vm477_vm1, %v553_v52, %v554_v44 }
  0x95   : > { %4388 = vst [vmem:[#allocation53_spill] sm:$0xff] %v2954_v49  ;;  %612 = vrot.lane.b32.xlu1 %v2944_v21, %s2340_s5  ;;  %4394 = vst [vmem:[#allocation59_spill] sm:$0xff] %v2983_v13 }
  0x96   : > { %610 = vrot.lane.b32.xlu0 %v2951_v57, %s2340_s5  ;;  %v2978_v47 = vsel %vm477_vm1, %v554_v44, %v556_v6 }
  0x97   : > { %v2965_v39 = vpop.permute.xlu1 %387  ;;  %4393 = vst [vmem:[#allocation58_spill] sm:$0xff] %v2978_v47 }
  0x98   : > { %4390 = vst [vmem:[#allocation55_spill] sm:$0xff] %v2965_v39  ;;  %v2971_v49 = vpop.permute.xlu0 %383 }
  0x99   : > { %4392 = vst [vmem:[#allocation57_spill] sm:$0xff] %v2971_v49  ;;  %616 = vrot.lane.b32.xlu1 %v2961_v55, %s2340_s5 }
  0x9a   : > { %614 = vrot.lane.b32.xlu0 %v2968_v10, %s2340_s5 }
  0x9b   : > { %v2980_v21 = vpop.permute.xlu1 %391 }
  0x9c   : > { %v2985_v63 = vpop.permute.xlu0 %389 }
  0x9d   : > { %620 = vrot.lane.b32.xlu1 %v2978_v47, %s2340_s5 }
  0x9e   : > { %618 = vrot.lane.b32.xlu0 %v2983_v13, %s2340_s5 }
  0x9f   : > { %v2991_v27 = vpop.permute.xlu1 %395 }
  0xa0   : > { %v2993_v55 = vpop.permute.xlu0 %393 }
  0xa1   : > { %658 = vrot.lane.b32.xlu1 %v2435_v1, %s2341_s6 }
  0xa2   : > { %656 = vrot.lane.b32.xlu0 %v2432_v0, %s2341_s6 }
  0xa3   : > { %v2999_v6 = vpop.permute.xlu1 %399 }
  0xa4   : > { %v3001_v44 = vpop.permute.xlu0 %397 }
  0xa5   : > { %662 = vrot.lane.b32.xlu1 %v2455_v11, %s2341_s6 }
  0xa6   : > { %660 = vrot.lane.b32.xlu0 %v2465_v15, %s2341_s6 }
  0xa7   : > { %v3007_v52 = vpop.permute.xlu1 %403 }
  0xa8   : > { %v3009_v47 = vpop.permute.xlu0 %401 }
  0xa9   : > { %666 = vrot.lane.b32.xlu1 %v2479_v22, %s2341_s6 }
  0xaa   : > { %664 = vrot.lane.b32.xlu0 %v2485_v24, %s2341_s6 }
  0xab   : > { %v3015_v0 = vpop.permute.xlu1 %407 }
  0xac   : > { %v3017_v1 = vpop.permute.xlu0 %405 }
  0xad   : > { %670 = vrot.lane.b32.xlu1 %v2500_v30, %s2341_s6 }
  0xae   : > { %668 = vrot.lane.b32.xlu0 %v2506_v32, %s2341_s6 }
  0xaf   : > { %v3023_v13 = vpop.permute.xlu1 %411 }
  0xb0   : > { %v3025_v39 = vpop.permute.xlu0 %409 }
  0xb1   : > { %674 = vrot.lane.b32.xlu1 %v2522_v38, %s2341_s6 }
  0xb2   : > { %672 = vrot.lane.b32.xlu0 %v2528_v40, %s2341_s6 }
  0xb3   : > { %v3031_v10 = vpop.permute.xlu1 %415 }
  0xb4   : > { %4395 = vst [vmem:[#allocation60_spill] sm:$0xff] %v3031_v10  ;;  %v3033_v57 = vpop.permute.xlu0 %413 }
  0xb5   : > { %4396 = vst [vmem:[#allocation61_spill] sm:$0xff] %v3033_v57  ;;  %678 = vrot.lane.b32.xlu1 %v2544_v46, %s2341_s6 }
  0xb6   : > { %676 = vrot.lane.b32.xlu0 %v2550_v48, %s2341_s6 }
  0xb7   : > { %v3039_v49 = vpop.permute.xlu1 %419 }
  0xb8   : > { %4397 = vst [vmem:[#allocation62_spill] sm:$0xff] %v3039_v49  ;;  %v3041_v45 = vpop.permute.xlu0 %417 }
  0xb9   : > { %4398 = vst [vmem:[#allocation63_spill] sm:$0xff] %v3041_v45  ;;  %682 = vrot.lane.b32.xlu1 %v2566_v54, %s2341_s6 }
  0xba   : > { %680 = vrot.lane.b32.xlu0 %v2572_v56, %s2341_s6 }
  0xbb   : > { %v3047_v36 = vpop.permute.xlu1 %423 }
  0xbc   : > { %v3049_v10 = vpop.permute.xlu0 %421 }
  0xbd   : > { %686 = vrot.lane.b32.xlu1 %v2588_v62, %s2341_s6 }
  0xbe   : > { %684 = vrot.lane.b32.xlu0 %v2594_v3, %s2341_s6 }
  0xbf   : > { %v3055_v57 = vpop.permute.xlu1 %427 }
  0xc0   : > { %v3057_v49 = vpop.permute.xlu0 %425 }
  0xc1   : > { %690 = vrot.lane.b32.xlu1 %v2610_v16, %s2341_s6 }
  0xc2   : > { %688 = vrot.lane.b32.xlu0 %v2616_v19, %s2341_s6 }
  0xc3   : > { %v3063_v45 = vpop.permute.xlu1 %431 }
  0xc4   : > { %v3065_v31 = vpop.permute.xlu0 %429 }
  0xc5   : > { %694 = vrot.lane.b32.xlu1 %v2632_v34, %s2341_s6 }
  0xc6   : > { %692 = vrot.lane.b32.xlu0 %v2638_v37, %s2341_s6 }
  0xc7   : > { %v3071_v62 = vpop.permute.xlu1 %435 }
  0xc8   : > { %v3073_v3 = vpop.permute.xlu0 %433 }
  0xc9   : > { %698 = vrot.lane.b32.xlu1 %v2654_v53, %s2341_s6 }
  0xca   : > { %696 = vrot.lane.b32.xlu0 %v2660_v59, %s2341_s6 }
  0xcb   : > { %v3079_v16 = vpop.permute.xlu1 %439 }
  0xcc   : > { %v3081_v19 = vpop.permute.xlu0 %437 }
  0xcd   : > { %702 = vrot.lane.b32.xlu1 %v2676_v26, %s2341_s6 }
  0xce   : > { %700 = vrot.lane.b32.xlu0 %v2682_v20, %s2341_s6 }
  0xcf   : > { %v3087_v29 = vpop.permute.xlu1 %443 }
  0xd0   : > { %4399 = vst [vmem:[#allocation64_spill] sm:$0xff] %v3087_v29  ;;  %v3089_v5 = vpop.permute.xlu0 %441 }
  0xd1   : > { %4400 = vst [vmem:[#allocation65_spill] sm:$0xff] %v3089_v5  ;;  %706 = vrot.lane.b32.xlu1 %v2698_v9, %s2341_s6  ;;  %v3118_v5 = vld [vmem:[%s2429_s30 + $0x180] sm:$0xff] }
  0xd2   : > { %704 = vrot.lane.b32.xlu0 %v2704_v60, %s2341_s6 }
  0xd3   : > { %v3095_v4 = vpop.permute.xlu1 %560 }
  0xd4   : > { %4401 = vst [vmem:[#allocation66_spill] sm:$0xff] %v3095_v4  ;;  %v3097_v23 = vpop.permute.xlu0 %558  ;;  %v3112_v4 = vld [vmem:[%s2429_s30 + $0x188] sm:$0xff] }
  0xd5   : > { %4402 = vst [vmem:[#allocation67_spill] sm:$0xff] %v3097_v23  ;;  %710 = vrot.lane.b32.xlu1 %v2720_v41, %s2341_s6  ;;  %v1262_v23 = vsel %vm1256_vm2, %v2455_v11, %v2980_v21  ;;  %v1264_v21 = vsel %vm1256_vm2, %v2479_v22, %v2991_v27 }
  0xd6   : > { %708 = vrot.lane.b32.xlu0 %v2726_v33, %s2341_s6 }
  0xd7   : > { %v3103_v58 = vpop.permute.xlu1 %564 }
  0xd8   : > { %4403 = vst [vmem:[#allocation68_spill] sm:$0xff] %v3103_v58  ;;  %v3105_v42 = vpop.permute.xlu0 %562  ;;  %v1261_v58 = vsel %vm1256_vm2, %v2465_v15, %v2985_v63  ;;  %v1266_v63 = vsel %vm1256_vm2, %v2500_v30, %v2999_v6  ;;  %v1267_v6 = vsel %vm1256_vm2, %v2528_v40, %v3009_v47  ;;  %v1269_v40 = vsel %vm1256_vm2, %v2550_v48, %v3017_v1 }
  0xd9   : > { %4404 = vst [vmem:[#allocation69_spill] sm:$0xff] %v3105_v42  ;;  %714 = vrot.lane.b32.xlu1 %v2742_v61, %s2341_s6  ;;  %v1271_v48 = vsel %vm1256_vm2, %v2572_v56, %v3025_v39 }
  0xda   : > { %712 = vrot.lane.b32.xlu0 %v2748_v8, %s2341_s6 }
  0xdb   : > { %v569_v43 = vpop.permute.xlu1 %568 }
  0xdc   : > { %v3124_v42 = vsel %vm1289_vm3, %v1262_v23, %v569_v43  ;;  %v567_v61 = vpop.permute.xlu0 %566  ;;  %v1263_v43 = vsel %vm1256_vm2, %v2485_v24, %v2993_v55 }
  0xdd   : > { %v3127_v8 = vsel %vm1289_vm3, %v1261_v58, %v567_v61  ;;  %718 = vrot.lane.b32.xlu1 %v3112_v4, %s2341_s6 }
  0xde   : > { %716 = vrot.lane.b32.xlu0 %v3118_v5, %s2341_s6  ;;  %s2346_s6 = smov 32  }
  0xdf   : > { %v573_v29 = vpop.permute.xlu1 %572 }
  0xe0   : > { %v3140_v23 = vsel %vm1289_vm3, %v1264_v21, %v573_v29  ;;  %v571_v61 = vpop.permute.xlu0 %570  ;;  %v1265_v29 = vsel %vm1256_vm2, %v2506_v32, %v3001_v44 }
  0xe1   : > { %v3143_v58 = vsel %vm1289_vm3, %v1263_v43, %v571_v61  ;;  %760 = vrot.lane.b32.xlu1 %v2472_v17, %s2342_s7 }
  0xe2   : > { %758 = vrot.lane.b32.xlu0 %v2458_v12, %s2342_s7  ;;  %v1268_v12 = vsel %vm1256_vm2, %v2522_v38, %v3007_v52  ;;  %v1270_v38 = vsel %vm1256_vm2, %v2544_v46, %v3015_v0  ;;  %v1272_v46 = vsel %vm1256_vm2, %v2566_v54, %v3023_v13  ;;  %v1521_v13 = vld [vmem:[%s4235_s1 + $0x8] sm:$0xff] }
  0xe3   : > { %v577_v27 = vpop.permute.xlu1 %576 }
  0xe4   : > { %v3156_v55 = vsel %vm1289_vm3, %v1266_v63, %v577_v27  ;;  %v575_v21 = vpop.permute.xlu0 %574  ;;  %v4405_v27 = vld [vmem:[#allocation6_spill] sm:$0xff] }
  0xe5   : > { %v3159_v43 = vsel %vm1289_vm3, %v1265_v29, %v575_v21  ;;  %764 = vrot.lane.b32.xlu1 %v2491_v25, %s2342_s7 }
  0xe6   : > { %762 = vrot.lane.b32.xlu0 %v2496_v28, %s2342_s7 }
  0xe7   : > { %v581_v17 = vpop.permute.xlu1 %580 }
  0xe8   : > { %v3172_v44 = vsel %vm1289_vm3, %v1268_v12, %v581_v17  ;;  %v579_v61 = vpop.permute.xlu0 %578  ;;  %v4406_v12 = vld [vmem:[#allocation17_spill] sm:$0xff] }
  0xe9   : > { %v3175_v63 = vsel %vm1289_vm3, %v1267_v6, %v579_v61  ;;  %790 = vrot.lane.b32.xlu1 %v2650_v50, %s2342_s7  ;;  %v1278_v61 = vsel %vm1256_vm2, %v2632_v34, %v3047_v36  ;;  %v1522_v36 = vld [vmem:[%s4235_s1 + $0x10] sm:$0xff] }
  0xea   : > { %766 = vrot.lane.b32.xlu0 %v4405_v27, %s2342_s7 }
  0xeb   : > { %v585_v52 = vpop.permute.xlu1 %584 }
  0xec   : > { %v3188_v47 = vsel %vm1289_vm3, %v1270_v38, %v585_v52  ;;  %v583_v29 = vpop.permute.xlu0 %582 }
  0xed   : > { %v3191_v21 = vsel %vm1289_vm3, %v1269_v40, %v583_v29  ;;  %859 = vrot.lane.b32.xlu1 %v2793_v51, %s2343_s8 }
  0xee   : > { %792 = vrot.lane.b32.xlu0 %v4406_v12, %s2342_s7 }
  0xef   : > { %v589_v0 = vpop.permute.xlu1 %588 }
  0xf0   : > { %v3204_v1 = vsel %vm1289_vm3, %v1272_v46, %v589_v0  ;;  %v587_v17 = vpop.permute.xlu0 %586  ;;  %v1280_v46 = vsel %vm1256_vm2, %v2654_v53, %v3055_v57  ;;  %v1524_v57 = vld [vmem:[%s4235_s1 + $0x20] sm:$0xf] }
  0xf1   : > { %v3207_v6 = vsel %vm1289_vm3, %v1271_v48, %v587_v17  ;;  %861 = vrot.lane.b32.xlu1 %v2788_v2, %s2343_s8  ;;  %v1520_v2 = vld [vmem:[%s4235_s1] sm:$0xff] }
  0xf2   : > { %891 = vrot.lane.b32.xlu0 %v2897_v18, %s2343_s8 }
  0xf3   : > { %v3213_v51 = vpop.permute.xlu1 %592 }
  0xf4   : > { %v3215_v54 = vpop.permute.xlu0 %590 }
  0xf5   : > { %957 = vrot.lane.b32.xlu1 %v2465_v15, %s2344_s9  ;;  %v2162_v15 = vpack.c.bf16 %v1521_v13, %v1520_v2 }
  0xf6   : > { %893 = vrot.lane.b32.xlu0 %v2892_v7, %s2343_s8 }
  0xf7   : > { %v3221_v56 = vpop.permute.xlu1 %596  ;;  %2163 = vmatprep.subr.bf16.mxu0 %v2162_v15  ;;  %2170 = vmatprep.subr.bf16.mxu1 %v2162_v15 }
  0xf8   : > { %v3223_v39 = vpop.permute.xlu0 %594  ;;  %2165 = vmatpush3.bf16.msra.mxu0 %v2162_v15  ;;  %2173 = vmatpush3.bf16.msra.mxu1 %v2162_v15  ;;  %v1281_v15 = vsel %vm1256_vm2, %v2682_v20, %v3065_v31 }
  0xf9   : > { %959 = vrot.lane.b32.xlu1 %v2455_v11, %s2344_s9  ;;  %v1277_v11 = vsel %vm1256_vm2, %v2638_v37, %v3049_v10 }
  0xfa   : > { %989 = vrot.lane.b32.xlu0 %v2638_v37, %s2344_s9  ;;  %v1523_v37 = vld [vmem:[%s4235_s1 + $0x18] sm:$0xff] }
  0xfb   : > { %v601_v38 = vpop.permute.xlu1 %600  ;;  %v2166_v10 = vpack.c.bf16 %v1523_v37, %v1522_v36  ;;  %v1283_v36 = vsel %vm1256_vm2, %v2704_v60, %v3073_v3  ;;  %v1285_v3 = vsel %vm1256_vm2, %v2726_v33, %v3081_v19  ;;  %v4412_v33 = vld [vmem:[#allocation27_spill] sm:$0xff] }
  0xfc   : > { %v3242_v52 = vsel %vm1289_vm3, %v1278_v61, %v601_v38  ;;  %v599_v40 = vpop.permute.xlu0 %598 }
  0xfd   : > { %v3245_v29 = vsel %vm1289_vm3, %v1277_v11, %v599_v40  ;;  %1059 = vrot.lane.b32.xlu1 %v2496_v28, %s2345_s21  ;;  %v1279_v28 = vsel %vm1256_vm2, %v2660_v59, %v3057_v49  ;;  %2167 = vmatprep.subr.bf16.mxu0 %v2166_v10  ;;  %v1282_v49 = vsel %vm1256_vm2, %v2676_v26, %v3063_v45  ;;  %v4408_v40 = vld [vmem:[#allocation18_spill] sm:$0xff] }
  0xfe   : > { %991 = vrot.lane.b32.xlu0 %v2632_v34, %s2344_s9  ;;  %2171 = vmatprep.subr.bf16.mxu1 %v2166_v10  ;;  %v4407_v34 = vld [vmem:[#allocation19_spill] sm:$0xff]  ;;  %v1284_v45 = vsel %vm1256_vm2, %v2698_v9, %v3071_v62 }
  0xff   : > { %v605_v0 = vpop.permute.xlu1 %604  ;;  %2169 = vmatpush3.bf16.msra.mxu0 %v2166_v10  ;;  %2174 = vmatpush3.bf16.msra.mxu1 %v2166_v10 }
 0x100   : > { %v3264_v48 = vsel %vm1289_vm3, %v1280_v46, %v605_v0  ;;  %v603_v17 = vpop.permute.xlu0 %602  ;;  %2112 = vmatprep.subr.msk.mxu0 %vm1629_vm4, %v1524_v57  ;;  %2172 = vmatprep.subr.msk.mxu1 %vm1629_vm4, %v1524_v57 }
 0x101   : > { %v3267_v2 = vsel %vm1289_vm3, %v1279_v28, %v603_v17  ;;  %794 = vrot.lane.b32.xlu1 %v4407_v34, %s2342_s7 }
 0x102   : > { %1091 = vrot.lane.b32.xlu0 %v4407_v34, %s2345_s21  ;;  %v4409_v34 = vld [vmem:[#allocation64_spill] sm:$0xff] }
 0x103   : > { %v609_v13 = vpop.permute.xlu1 %608  ;;  %2113 = vmatpush3.msk.msra.mxu0 %vm1629_vm4, %v1524_v57  ;;  %2175 = vmatpush3.msk.msra.mxu1 %vm1629_vm4, %v1524_v57 }
 0x104   : > { %v3283_v61 = vsel %vm1289_vm3, %v1282_v49, %v609_v13  ;;  %v607_v38 = vpop.permute.xlu0 %606  ;;  %v4411_v49 = vld [vmem:[#allocation65_spill] sm:$0xff] }
 0x105   : > { %v3286_v11 = vsel %vm1289_vm3, %v1281_v15, %v607_v38  ;;  %1093 = vrot.lane.b32.xlu1 %v4408_v40, %s2345_s21  ;;  %v1287_v19 = vsel %vm1256_vm2, %v4412_v33, %v4411_v49 }
 0x106   : > { %1061 = vrot.lane.b32.xlu0 %v2491_v25, %s2345_s21  ;;  %v1286_v25 = vsel %vm1256_vm2, %v2720_v41, %v3079_v16  ;;  %v4410_v41 = vld [vmem:[#allocation26_spill] sm:$0xff] }
 0x107   : > { %v613_v31 = vpop.permute.xlu1 %612  ;;  %v1288_v16 = vsel %vm1256_vm2, %v4410_v41, %v4409_v34  ;;  %v4415_v41 = vld [vmem:[#allocation21_spill] sm:$0xff] }
 0x108   : > { %v3299_v37 = vsel %vm1289_vm3, %v1284_v45, %v613_v31  ;;  %v611_v10 = vpop.permute.xlu0 %610  ;;  %v4414_v31 = vld [vmem:[#allocation45_spill] sm:$0xff] }
 0x109   : > { %v3302_v46 = vsel %vm1289_vm3, %v1283_v36, %v611_v10  ;;  %1192 = vrot.lane.b32.xlu1 %v2910_v35, %s2346_s6 }
 0x10a   : > { %1160 = vrot.lane.b32.xlu0 %v2806_v14, %s2346_s6 }
 0x10b   : > { %v617_v62 = vpop.permute.xlu1 %616 }
 0x10c   : > { %v3315_v0 = vsel %vm1289_vm3, %v1286_v25, %v617_v62  ;;  %v615_v28 = vpop.permute.xlu0 %614 }
 0x10d   : > { %v3318_v17 = vsel %vm1289_vm3, %v1285_v3, %v615_v28  ;;  %863 = vrot.lane.b32.xlu1 %v2806_v14, %s2343_s8  ;;  %v4413_v14 = vld [vmem:[#allocation32_spill] sm:$0xff] }
 0x10e   : > { %796 = vrot.lane.b32.xlu0 %v4408_v40, %s2342_s7 }
 0x10f   : > { %v621_v57 = vpop.permute.xlu1 %620 }
 0x110   : > { %v3331_v13 = vsel %vm1289_vm3, %v1288_v16, %v621_v57  ;;  %v619_v15 = vpop.permute.xlu0 %618  ;;  %v4416_v16 = vld [vmem:[#allocation20_spill] sm:$0xff] }
 0x111   : > { %v3334_v38 = vsel %vm1289_vm3, %v1287_v19, %v619_v15  ;;  %1162 = vrot.lane.b32.xlu1 %v4413_v14, %s2346_s6  ;;  %v4420_v19 = vld [vmem:[#allocation47_spill] sm:$0xff] }
 0x112   : > { %895 = vrot.lane.b32.xlu0 %v2910_v35, %s2343_s8 }
 0x113   : > { %v3340_v40 = vpop.permute.xlu1 %658 }
 0x114   : > { %v3342_v45 = vpop.permute.xlu0 %656 }
 0x115   : > { %865 = vrot.lane.b32.xlu1 %v4413_v14, %s2343_s8 }
 0x116   : > { %1194 = vrot.lane.b32.xlu0 %v4414_v31, %s2346_s6 }
 0x117   : > { %v3348_v36 = vpop.permute.xlu1 %662 }
 0x118   : > { %v3350_v10 = vpop.permute.xlu0 %660 }
 0x119   : > { %961 = vrot.lane.b32.xlu1 %v2485_v24, %s2344_s9 }
 0x11a   : > { %897 = vrot.lane.b32.xlu0 %v4414_v31, %s2343_s8 }
 0x11b   : > { %v667_v35 = vpop.permute.xlu1 %666 }
 0x11c   : > { %v3358_v25 = vsel %vm1322_vm5, %v3124_v42, %v667_v35  ;;  %v665_v62 = vpop.permute.xlu0 %664 }
 0x11d   : > { %v3362_v3 = vsel %vm1322_vm5, %v3127_v8, %v665_v62  ;;  %963 = vrot.lane.b32.xlu1 %v2479_v22, %s2344_s9  ;;  %v4424_v62 = vld [vmem:[#allocation46_spill] sm:$0xff] }
 0x11e   : > { %993 = vrot.lane.b32.xlu0 %v2660_v59, %s2344_s9 }
 0x11f   : > { %v671_v24 = vpop.permute.xlu1 %670 }
 0x120   : > { %v3370_v28 = vsel %vm1322_vm5, %v3140_v23, %v671_v24  ;;  %v669_v34 = vpop.permute.xlu0 %668  ;;  %v4425_v24 = vld [vmem:[#allocation33_spill] sm:$0xff] }
 0x121   : > { %v3374_v42 = vsel %vm1322_vm5, %v3143_v58, %v669_v34  ;;  %1063 = vrot.lane.b32.xlu1 %v4405_v27, %s2345_s21 }
 0x122   : > { %995 = vrot.lane.b32.xlu0 %v2654_v53, %s2344_s9 }
 0x123   : > { %v675_v22 = vpop.permute.xlu1 %674 }
 0x124   : > { %v3382_v59 = vsel %vm1322_vm5, %v3156_v55, %v675_v22  ;;  %v673_v8 = vpop.permute.xlu0 %672 }
 0x125   : > { %v3386_v23 = vsel %vm1322_vm5, %v3159_v43, %v673_v8  ;;  %798 = vrot.lane.b32.xlu1 %v4415_v41, %s2342_s7  ;;  %v4417_v43 = vld [vmem:[#allocation5_spill] sm:$0xff] }
 0x126   : > { %1095 = vrot.lane.b32.xlu0 %v4415_v41, %s2345_s21 }
 0x127   : > { %v679_v58 = vpop.permute.xlu1 %678 }
 0x128   : > { %v3394_v53 = vsel %vm1322_vm5, %v3172_v44, %v679_v58  ;;  %v677_v27 = vpop.permute.xlu0 %676 }
 0x129   : > { %v3398_v55 = vsel %vm1322_vm5, %v3175_v63, %v677_v27  ;;  %1097 = vrot.lane.b32.xlu1 %v4416_v16, %s2345_s21  ;;  %v4421_v63 = vld [vmem:[#allocation34_spill] sm:$0xff] }
 0x12a   : > { %1065 = vrot.lane.b32.xlu0 %v4417_v43, %s2345_s21 }
 0x12b   : > { %v683_v57 = vpop.permute.xlu1 %682 }
 0x12c   : > { %v3406_v49 = vsel %vm1322_vm5, %v3188_v47, %v683_v57  ;;  %v681_v33 = vpop.permute.xlu0 %680 }
 0x12d   : > { %4418 = vst [vmem:[#allocation6_spill] sm:$0xff] %v3406_v49  ;;  %v3410_v44 = vsel %vm1322_vm5, %v3191_v21, %v681_v33  ;;  %1196 = vrot.lane.b32.xlu1 %v4420_v19, %s2346_s6  ;;  %v4426_v33 = vld [vmem:[#allocation23_spill] sm:$0xff] }
 0x12e   : > { %4419 = vst [vmem:[#allocation17_spill] sm:$0xff] %v3410_v44  ;;  %1164 = vrot.lane.b32.xlu0 %v4421_v63, %s2346_s6 }
 0x12f   : > { %v687_v15 = vpop.permute.xlu1 %686 }
 0x130   : > { %v3418_v14 = vsel %vm1322_vm5, %v3204_v1, %v687_v15  ;;  %v685_v31 = vpop.permute.xlu0 %684 }
 0x131   : > { %4422 = vst [vmem:[#allocation19_spill] sm:$0xff] %v3418_v14  ;;  %v3422_v47 = vsel %vm1322_vm5, %v3207_v6, %v685_v31  ;;  %800 = vrot.lane.b32.xlu1 %v4416_v16, %s2342_s7  ;;  %v4432_v31 = vld [vmem:[#allocation22_spill] sm:$0xff]  ;;  %v3567_v14 = vld [vmem:[%s2429_s30 + $0xc0] sm:$0xff] }
 0x132   : > { %4423 = vst [vmem:[#allocation18_spill] sm:$0xff] %v3422_v47  ;;  %768 = vrot.lane.b32.xlu0 %v4417_v43, %s2342_s7  ;;  %v4441_v47 = vld [vmem:[#allocation53_spill] sm:$0xff] }
 0x133   : > { %v3428_v21 = vpop.permute.xlu1 %690 }
 0x134   : > { %v3430_v35 = vpop.permute.xlu0 %688 }
 0x135   : > { %899 = vrot.lane.b32.xlu1 %v4420_v19, %s2343_s8 }
 0x136   : > { %867 = vrot.lane.b32.xlu0 %v4421_v63, %s2343_s8 }
 0x137   : > { %v3436_v1 = vpop.permute.xlu1 %694 }
 0x138   : > { %v3438_v6 = vpop.permute.xlu0 %692 }
 0x139   : > { %1198 = vrot.lane.b32.xlu1 %v4424_v62, %s2346_s6 }
 0x13a   : > { %1166 = vrot.lane.b32.xlu0 %v4425_v24, %s2346_s6 }
 0x13b   : > { %v699_v34 = vpop.permute.xlu1 %698 }
 0x13c   : > { %v3446_v22 = vsel %vm1322_vm5, %v3242_v52, %v699_v34  ;;  %v697_v8 = vpop.permute.xlu0 %696  ;;  %v4434_v34 = vld [vmem:[#allocation49_spill] sm:$0xff] }
 0x13d   : > { %v3450_v41 = vsel %vm1322_vm5, %v3245_v29, %v697_v8  ;;  %901 = vrot.lane.b32.xlu1 %v4424_v62, %s2343_s8 }
 0x13e   : > { %869 = vrot.lane.b32.xlu0 %v4425_v24, %s2343_s8 }
 0x13f   : > { %v703_v58 = vpop.permute.xlu1 %702 }
 0x140   : > { %v3458_v27 = vsel %vm1322_vm5, %v3264_v48, %v703_v58  ;;  %v701_v16 = vpop.permute.xlu0 %700 }
 0x141   : > { %v3462_v52 = vsel %vm1322_vm5, %v3267_v2, %v701_v16  ;;  %997 = vrot.lane.b32.xlu1 %v2682_v20, %s2344_s9 }
 0x142   : > { %965 = vrot.lane.b32.xlu0 %v2506_v32, %s2344_s9 }
 0x143   : > { %v707_v29 = vpop.permute.xlu1 %706 }
 0x144   : > { %v3470_v43 = vsel %vm1322_vm5, %v3283_v61, %v707_v29  ;;  %v705_v57 = vpop.permute.xlu0 %704 }
 0x145   : > { %v3474_v48 = vsel %vm1322_vm5, %v3286_v11, %v705_v57  ;;  %999 = vrot.lane.b32.xlu1 %v2676_v26, %s2344_s9  ;;  %v4427_v11 = vld [vmem:[#allocation8_spill] sm:$0xff] }
 0x146   : > { %967 = vrot.lane.b32.xlu0 %v2500_v30, %s2344_s9 }
 0x147   : > { %v711_v20 = vpop.permute.xlu1 %710 }
 0x148   : > { %v3482_v32 = vsel %vm1322_vm5, %v3299_v37, %v711_v20  ;;  %v709_v2 = vpop.permute.xlu0 %708  ;;  %v4436_v20 = vld [vmem:[#allocation48_spill] sm:$0xff] }
 0x149   : > { %v3486_v61 = vsel %vm1322_vm5, %v3302_v46, %v709_v2  ;;  %1099 = vrot.lane.b32.xlu1 %v4426_v33, %s2345_s21  ;;  %v4437_v2 = vld [vmem:[#allocation35_spill] sm:$0xff] }
 0x14a   : > { %1067 = vrot.lane.b32.xlu0 %v4427_v11, %s2345_s21 }
 0x14b   : > { %v715_v26 = vpop.permute.xlu1 %714 }
 0x14c   : > { %v3494_v30 = vsel %vm1322_vm5, %v3315_v0, %v715_v26  ;;  %v713_v19 = vpop.permute.xlu0 %712 }
 0x14d   : > { %4428 = vst [vmem:[#allocation64_spill] sm:$0xff] %v3494_v30  ;;  %v3498_v37 = vsel %vm1322_vm5, %v3318_v17, %v713_v19  ;;  %802 = vrot.lane.b32.xlu1 %v4426_v33, %s2342_s7  ;;  %v4433_v17 = vld [vmem:[#allocation7_spill] sm:$0xff] }
 0x14e   : > { %4429 = vst [vmem:[#allocation26_spill] sm:$0xff] %v3498_v37  ;;  %770 = vrot.lane.b32.xlu0 %v4427_v11, %s2342_s7  ;;  %v4442_v30 = vld [vmem:[#allocation67_spill] sm:$0xff] }
 0x14f   : > { %v719_v46 = vpop.permute.xlu1 %718 }
 0x150   : > { %v3506_v63 = vsel %vm1322_vm5, %v3331_v13, %v719_v46  ;;  %v717_v15 = vpop.permute.xlu0 %716  ;;  %v4435_v13 = vld [vmem:[#allocation36_spill] sm:$0xff] }
 0x151   : > { %4430 = vst [vmem:[#allocation65_spill] sm:$0xff] %v3506_v63  ;;  %v3510_v0 = vsel %vm1322_vm5, %v3334_v38, %v717_v15  ;;  %1101 = vrot.lane.b32.xlu1 %v4432_v31, %s2345_s21  ;;  %v2241_v46 = vld [vmem:[%s2429_s30 + $0x78] sm:$0xff]  ;;  %v4440_v63 = vld [vmem:[#allocation61_spill] sm:$0xff] }
 0x152   : > { %4431 = vst [vmem:[#allocation27_spill] sm:$0xff] %v3510_v0  ;;  %1069 = vrot.lane.b32.xlu0 %v4433_v17, %s2345_s21 }
 0x153   : > { %v3516_v62 = vpop.permute.xlu1 %760 }
 0x154   : > { %v759_v24 = vpop.permute.xlu0 %758 }
 0x155   : > { %1200 = vrot.lane.b32.xlu1 %v4434_v34, %s2346_s6 }
 0x156   : > { %1168 = vrot.lane.b32.xlu0 %v4435_v13, %s2346_s6 }
 0x157   : > { %v3522_v8 = vpop.permute.xlu1 %764 }
 0x158   : > { %v3524_v58 = vpop.permute.xlu0 %762 }
 0x159   : > { %804 = vrot.lane.b32.xlu1 %v4432_v31, %s2342_s7 }
 0x15a   : > { %772 = vrot.lane.b32.xlu0 %v4433_v17, %s2342_s7  ;;  %v2242_v17 = vld [vmem:[%s2429_s30 + $0x80] sm:$0xff] }
 0x15b   : > { %v791_v38 = vpop.permute.xlu1 %790 }
 0x15c   : > { %v3530_v16 = vpop.permute.xlu0 %766 }
 0x15d   : > { %903 = vrot.lane.b32.xlu1 %v4434_v34, %s2343_s8 }
 0x15e   : > { %871 = vrot.lane.b32.xlu0 %v4435_v13, %s2343_s8 }
 0x15f   : > { %v860_v29 = vpop.permute.xlu1 %859 }
 0x160   : > { %v3536_v57 = vpop.permute.xlu0 %792 }
 0x161   : > { %1202 = vrot.lane.b32.xlu1 %v4436_v20, %s2346_s6 }
 0x162   : > { %1170 = vrot.lane.b32.xlu0 %v4437_v2, %s2346_s6 }
 0x163   : > { %v3542_v33 = vpop.permute.xlu1 %861 }
 0x164   : > { %v892_v11 = vpop.permute.xlu0 %891 }
 0x165   : > { %905 = vrot.lane.b32.xlu1 %v4436_v20, %s2343_s8  ;;  %v4438_v20 = vld [vmem:[#allocation25_spill] sm:$0xff] }
 0x166   : > { %873 = vrot.lane.b32.xlu0 %v4437_v2, %s2343_s8 }
 0x167   : > { %v958_v26 = vpop.permute.xlu1 %957 }
 0x168   : > { %v3548_v19 = vpop.permute.xlu0 %893 }
 0x169   : > { %1001 = vrot.lane.b32.xlu1 %v2704_v60, %s2344_s9  ;;  %v4439_v60 = vld [vmem:[#allocation10_spill] sm:$0xff] }
 0x16a   : > { %969 = vrot.lane.b32.xlu0 %v2241_v46, %s2344_s9 }
 0x16b   : > { %v960_v15 = vpop.permute.xlu1 %959 }
 0x16c   : > { %v990_v31 = vpop.permute.xlu0 %989 }
 0x16d   : > { %1003 = vrot.lane.b32.xlu1 %v2698_v9, %s2344_s9  ;;  %v1273_v9 = vsel %vm1256_vm2, %v3567_v14, %v4440_v63 }
 0x16e   : > { %971 = vrot.lane.b32.xlu0 %v2242_v17, %s2344_s9  ;;  %v2244_v17 = vld [vmem:[%s2429_s30] sm:$0xff]  ;;  %v1306_v49 = vsel %vm1289_vm3, %v1273_v9, %v3215_v54 }
 0x16f   : > { %v1060_v34 = vpop.permute.xlu1 %1059  ;;  %v1257_v0 = vsel %vm1256_vm2, %v2244_v17, %v4441_v47  ;;  %v1339_v63 = vsel %vm1322_vm5, %v1306_v49, %v3430_v35 }
 0x170   : > { %v3558_v13 = vpop.permute.xlu0 %991  ;;  %v1290_v44 = vsel %vm1289_vm3, %v1257_v0, %v4442_v30  ;;  %v1372_v47 = vsel %vm1355_vm6, %v1339_v63, %v791_v38  ;;  %v4443_v30 = vld [vmem:[#allocation24_spill] sm:$0xff]  ;;  %v2245_v63 = vld [vmem:[%s2429_s30 + $0x8] sm:$0xff] }
 0x171   : > { %1103 = vrot.lane.b32.xlu1 %v4438_v20, %s2345_s21 }
 0x172   : > { %1071 = vrot.lane.b32.xlu0 %v4439_v60, %s2345_s21 }
 0x173   : > { %v3564_v2 = vpop.permute.xlu1 %794 }
 0x174   : > { %v1092_v46 = vpop.permute.xlu0 %1091 }
 0x175   : > { %806 = vrot.lane.b32.xlu1 %v4438_v20, %s2342_s7  ;;  %v1323_v20 = vsel %vm1322_vm5, %v1290_v44, %v3342_v45  ;;  %v4444_v45 = vld [vmem:[#allocation9_spill] sm:$0xff] }
 0x176   : > { %774 = vrot.lane.b32.xlu0 %v4439_v60, %s2342_s7  ;;  %v1356_v54 = vsel %vm1355_vm6, %v1323_v20, %v759_v24  ;;  %v1405_v60 = vsel %vm1388_vm7, %v1372_v47, %v892_v11  ;;  %v4445_v20 = vld [vmem:[#allocation57_spill] sm:$0xff] }
 0x177   : > { %v1094_v37 = vpop.permute.xlu1 %1093  ;;  %v1389_v49 = vsel %vm1388_vm7, %v1356_v54, %v860_v29  ;;  %v1438_v35 = vsel %vm1421_vm8, %v1405_v60, %v990_v31  ;;  %v1258_v29 = vsel %vm1256_vm2, %v2245_v63, %v4445_v20  ;;  %v4446_v31 = vld [vmem:[#allocation52_spill] sm:$0xff] }
 0x178   : > { %v1062_v17 = vpop.permute.xlu0 %1061  ;;  %v1422_v44 = vsel %vm1421_vm8, %v1389_v49, %v958_v26  ;;  %v1471_v0 = vsel %vm1454_vm9, %v1438_v35, %v1092_v46  ;;  %v4447_v26 = vld [vmem:[#allocation66_spill] sm:$0xff] }
 0x179   : > { %1105 = vrot.lane.b32.xlu1 %v4443_v30, %s2345_s21  ;;  %v1455_v38 = vsel %vm1454_vm9, %v1422_v44, %v1060_v34  ;;  %v1291_v46 = vsel %vm1289_vm3, %v1258_v29, %v4447_v26  ;;  %v4448_v34 = vld [vmem:[#allocation38_spill] sm:$0xff]  ;;  %v2247_v26 = vld [vmem:[%s2429_s30 + $0x150] sm:$0xff] }
 0x17a   : > { %1073 = vrot.lane.b32.xlu0 %v4444_v45, %s2345_s21  ;;  %v1324_v54 = vsel %vm1322_vm5, %v1291_v46, %v3340_v40  ;;  %v4450_v29 = vld [vmem:[#allocation50_spill] sm:$0xff]  ;;  %v2248_v46 = vld [vmem:[%s2429_s30 + $0x90] sm:$0xff] }
 0x17b   : > { %v1193_v24 = vpop.permute.xlu1 %1192  ;;  %v1357_v49 = vsel %vm1355_vm6, %v1324_v54, %v3516_v62 }
 0x17c   : > { %v1161_v11 = vpop.permute.xlu0 %1160  ;;  %v1504_v9 = vsel %vm1487_vm10, %v1471_v0, %v1193_v24  ;;  %v1390_v44 = vsel %vm1388_vm7, %v1357_v49, %v3542_v33  ;;  %v3625_v0 = vld [vmem:[%s2429_s30 + $0xc8] sm:$0xff]  ;;  %v4449_v24 = vld [vmem:[#allocation60_spill] sm:$0xff] }
 0x17d   : > { %1204 = vrot.lane.b32.xlu1 %v4446_v31, %s2346_s6  ;;  %v1488_v47 = vsel %vm1487_vm10, %v1455_v38, %v1161_v11  ;;  %2138 = vmatprep.mubr.msk.f32.mxu1 %vm1532_vm11, %v1504_v9  ;;  %v1274_v38 = vsel %vm1256_vm2, %v3625_v0, %v4449_v24  ;;  %v1423_v40 = vsel %vm1421_vm8, %v1390_v44, %v960_v15  ;;  %v2249_v49 = vld [vmem:[%s2429_s30 + $0x158] sm:$0xff] }
 0x17e   : > { %1172 = vrot.lane.b32.xlu0 %v4448_v34, %s2346_s6  ;;  %2114 = vmatprep.mubr.msk.f32.mxu0 %vm1532_vm11, %v1488_v47  ;;  %v1307_v62 = vsel %vm1289_vm3, %v1274_v38, %v3213_v51  ;;  %v1456_v11 = vsel %vm1454_vm9, %v1423_v40, %v1062_v17  ;;  %v2250_v44 = vld [vmem:[%s2429_s30 + $0x98] sm:$0xff] }
 0x17f   : > { %v3614_v60 = vpop.permute.xlu1 %863  ;;  %v3678_v40 = vld [vmem:[%s2429_s30 + $0xd8] sm:$0xff] }
 0x180   : > { %v3618_v35 = vpop.permute.xlu0 %796 }
 0x181   : > { %808 = vrot.lane.b32.xlu1 %v4443_v30, %s2342_s7  ;;  %v1340_v30 = vsel %vm1322_vm5, %v1307_v62, %v3428_v21  ;;  %v4452_v62 = vld [vmem:[#allocation63_spill] sm:$0xff] }
 0x182   : > { %776 = vrot.lane.b32.xlu0 %v4444_v45, %s2342_s7  ;;  %v1373_v20 = vsel %vm1355_vm6, %v1340_v30, %v3536_v57  ;;  %v2252_v30 = vld [vmem:[%s2429_s30 + $0x18] sm:$0xff] }
 0x183   : > { %v1163_v33 = vpop.permute.xlu1 %1162  ;;  %v1406_v51 = vsel %vm1388_vm7, %v1373_v20, %v3548_v19  ;;  %v4451_v19 = vld [vmem:[#allocation37_spill] sm:$0xff] }
 0x184   : > { %v1489_v9 = vsel %vm1487_vm10, %v1456_v11, %v1163_v33  ;;  %v896_v63 = vpop.permute.xlu0 %895  ;;  %v1439_v21 = vsel %vm1421_vm8, %v1406_v51, %v3558_v13  ;;  %v1275_v11 = vsel %vm1256_vm2, %v3678_v40, %v4452_v62  ;;  %v4453_v33 = vld [vmem:[#allocation29_spill] sm:$0xff] }
 0x185   : > { %907 = vrot.lane.b32.xlu1 %v4446_v31, %s2343_s8  ;;  %2115 = vmatmul.mubr.msk.f32.vlgmr.msra.gmra.mrb[0].mxu0 %vm1532_vm11, %v1489_v9  ;;  %v1472_v57 = vsel %vm1454_vm9, %v1439_v21, %v1094_v37  ;;  %v4454_v9 = vld [vmem:[#allocation51_spill] sm:$0xff]  ;;  %v1308_v51 = vsel %vm1289_vm3, %v1275_v11, %v3223_v39  ;;  %v4455_v21 = vld [vmem:[#allocation12_spill] sm:$0xff] }
 0x186   : > { %875 = vrot.lane.b32.xlu0 %v4448_v34, %s2343_s8  ;;  %v1259_v20 = vsel %vm1256_vm2, %v2252_v30, %v4454_v9  ;;  %v4459_v30 = vld [vmem:[#allocation62_spill] sm:$0xff] }
 0x187   : > { %v3650_v15 = vpop.permute.xlu1 %865 }
 0x188   : > { %v1195_v17 = vpop.permute.xlu0 %1194 }
 0x189   : > { %v1505_v45 = vsel %vm1487_vm10, %v1472_v57, %v1195_v17  ;;  %1206 = vrot.lane.b32.xlu1 %v4450_v29, %s2346_s6  ;;  %v4456_v57 = vld [vmem:[#allocation69_spill] sm:$0xff] }
 0x18a   : > { %1174 = vrot.lane.b32.xlu0 %v4451_v19, %s2346_s6  ;;  %2139 = vmatmul.mubr.msk.f32.vlgmr.msra.gmra.mrb[0].mxu1 %vm1532_vm11, %v1505_v45  ;;  %v1292_v17 = vsel %vm1289_vm3, %v1259_v20, %v4456_v57  ;;  %v1341_v45 = vsel %vm1322_vm5, %v1308_v51, %v3438_v6  ;;  %v4460_v20 = vld [vmem:[#allocation56_spill] sm:$0xff]  ;;  %v2254_v51 = vld [vmem:[%s2429_s30 + $0x20] sm:$0xff] }
 0x18b   : > { %v962_v31 = vpop.permute.xlu1 %961 }
 0x18c   : > { %v3659_v13 = vpop.permute.xlu0 %897 }
 0x18d   : > { %909 = vrot.lane.b32.xlu1 %v4450_v29, %s2343_s8 }
 0x18e   : > { %877 = vrot.lane.b32.xlu0 %v4451_v19, %s2343_s8  ;;  %v1325_v19 = vsel %vm1322_vm5, %v1292_v17, %v3350_v10 }
 0x18f   : > { %v3665_v37 = vpop.permute.xlu1 %963  ;;  %v1358_v39 = vsel %vm1355_vm6, %v1325_v19, %v3524_v58  ;;  %v4463_v19 = vld [vmem:[#allocation68_spill] sm:$0xff] }
 0x190   : > { %v994_v47 = vpop.permute.xlu0 %993 }
 0x191   : > { %1005 = vrot.lane.b32.xlu1 %v2247_v26, %s2344_s9  ;;  %v1374_v26 = vsel %vm1355_vm6, %v1341_v45, %v3564_v2  ;;  %v4462_v45 = vld [vmem:[#allocation40_spill] sm:$0xff] }
 0x192   : > { %973 = vrot.lane.b32.xlu0 %v2248_v46, %s2344_s9 }
 0x193   : > { %v1064_v34 = vpop.permute.xlu1 %1063 }
 0x194   : > { %v996_v54 = vpop.permute.xlu0 %995 }
 0x195   : > { %1007 = vrot.lane.b32.xlu1 %v2249_v49, %s2344_s9  ;;  %v1407_v49 = vsel %vm1388_vm7, %v1374_v26, %v896_v63 }
 0x196   : > { %975 = vrot.lane.b32.xlu0 %v2250_v44, %s2344_s9  ;;  %v1391_v44 = vsel %vm1388_vm7, %v1358_v39, %v3614_v60  ;;  %v1440_v6 = vsel %vm1421_vm8, %v1407_v49, %v994_v47  ;;  %v4457_v60 = vld [vmem:[#allocation28_spill] sm:$0xff]  ;;  %v4458_v47 = vld [vmem:[#allocation11_spill] sm:$0xff] }
 0x197   : > { %v3675_v24 = vpop.permute.xlu1 %798  ;;  %v1424_v10 = vsel %vm1421_vm8, %v1391_v44, %v962_v31 }
 0x198   : > { %v1096_v38 = vpop.permute.xlu0 %1095  ;;  %v1457_v63 = vsel %vm1454_vm9, %v1424_v10, %v1064_v34  ;;  %v3726_v34 = vld [vmem:[%s2429_s30 + $0xe0] sm:$0xff] }
 0x199   : > { %1107 = vrot.lane.b32.xlu1 %v4453_v33, %s2345_s21  ;;  %v1473_v2 = vsel %vm1454_vm9, %v1440_v6, %v1096_v38  ;;  %v1276_v9 = vsel %vm1256_vm2, %v3726_v34, %v4459_v30  ;;  %v2255_v30 = vld [vmem:[%s2429_s30 + $0x168] sm:$0xff] }
 0x19a   : > { %1075 = vrot.lane.b32.xlu0 %v4455_v21, %s2345_s21  ;;  %v1309_v17 = vsel %vm1289_vm3, %v1276_v9, %v3221_v56  ;;  %v2256_v9 = vld [vmem:[%s2429_s30 + $0xa8] sm:$0xff] }
 0x19b   : > { %v1098_v29 = vpop.permute.xlu1 %1097  ;;  %v1342_v39 = vsel %vm1322_vm5, %v1309_v17, %v3436_v1 }
 0x19c   : > { %v1066_v46 = vpop.permute.xlu0 %1065  ;;  %v1375_v6 = vsel %vm1355_vm6, %v1342_v39, %v3618_v35 }
 0x19d   : > { %810 = vrot.lane.b32.xlu1 %v4453_v33, %s2342_s7 }
 0x19e   : > { %778 = vrot.lane.b32.xlu0 %v4455_v21, %s2342_s7  ;;  %v4461_v21 = vld [vmem:[#allocation55_spill] sm:$0xff] }
 0x19f   : > { %v1197_v58 = vpop.permute.xlu1 %1196  ;;  %v1260_v57 = vsel %vm1256_vm2, %v2254_v51, %v4461_v21  ;;  %v2257_v21 = vld [vmem:[%s2429_s30 + $0x170] sm:$0xff] }
 0x1a0   : > { %v1506_v62 = vsel %vm1487_vm10, %v1473_v2, %v1197_v58  ;;  %v1165_v11 = vpop.permute.xlu0 %1164  ;;  %v1293_v26 = vsel %vm1289_vm3, %v1260_v57, %v4463_v19  ;;  %v1408_v2 = vsel %vm1388_vm7, %v1375_v6, %v3659_v13  ;;  %v2258_v57 = vld [vmem:[%s2429_s30 + $0xb0] sm:$0xff] }
 0x1a1   : > { %v1490_v33 = vsel %vm1487_vm10, %v1457_v63, %v1165_v11  ;;  %1109 = vrot.lane.b32.xlu1 %v4457_v60, %s2345_s21  ;;  %2141 = vmatprep.mubr.msk.f32.mxu1 %vm1532_vm11, %v1506_v62  ;;  %v1326_v44 = vsel %vm1322_vm5, %v1293_v26, %v3348_v36  ;;  %v1441_v58 = vsel %vm1421_vm8, %v1408_v2, %v996_v54  ;;  %v4464_v54 = vld [vmem:[#allocation54_spill] sm:$0xff]  ;;  %v4466_v19 = vld [vmem:[#allocation31_spill] sm:$0xff] }
 0x1a2   : > { %1077 = vrot.lane.b32.xlu0 %v4458_v47, %s2345_s21  ;;  %2117 = vmatprep.mubr.msk.f32.mxu0 %vm1532_vm11, %v1490_v33  ;;  %v1359_v56 = vsel %vm1355_vm6, %v1326_v44, %v3522_v8  ;;  %v1474_v35 = vsel %vm1454_vm9, %v1441_v58, %v1098_v29  ;;  %v4465_v29 = vld [vmem:[#allocation39_spill] sm:$0xff]  ;;  %v4467_v26 = vld [vmem:[#allocation14_spill] sm:$0xff]  ;;  %v1376_v44 = vsel %vm1355_vm6, %v3450_v41, %v3675_v24 }
 0x1a3   : > { %v3721_v31 = vpop.permute.xlu1 %800  ;;  %v1392_v1 = vsel %vm1388_vm7, %v1359_v56, %v3650_v15  ;;  %v1360_v56 = vsel %vm1355_vm6, %v3362_v3, %v3530_v16 }
 0x1a4   : > { %v3723_v38 = vpop.permute.xlu0 %768  ;;  %v1425_v36 = vsel %vm1421_vm8, %v1392_v1, %v3665_v37 }
 0x1a5   : > { %1208 = vrot.lane.b32.xlu1 %v4460_v20, %s2346_s6  ;;  %v1458_v63 = vsel %vm1454_vm9, %v1425_v36, %v1066_v46 }
 0x1a6   : > { %1176 = vrot.lane.b32.xlu0 %v4462_v45, %s2346_s6 }
 0x1a7   : > { %v900_v49 = vpop.permute.xlu1 %899 }
 0x1a8   : > { %v868_v10 = vpop.permute.xlu0 %867  ;;  %v1409_v2 = vsel %vm1388_vm7, %v1376_v44, %v900_v49 }
 0x1a9   : > { %812 = vrot.lane.b32.xlu1 %v4457_v60, %s2342_s7  ;;  %v1393_v1 = vsel %vm1388_vm7, %v1360_v56, %v868_v10  ;;  %v4469_v10 = vld [vmem:[#allocation13_spill] sm:$0xff]  ;;  %v753_v56 = vrot.slane %v3118_v5, 1 }
 0x1aa   : > { %780 = vrot.lane.b32.xlu0 %v4458_v47, %s2342_s7 }
 0x1ab   : > { %v1199_v8 = vpop.permute.xlu1 %1198 }
 0x1ac   : > { %v1507_v13 = vsel %vm1487_vm10, %v1474_v35, %v1199_v8  ;;  %v1167_v62 = vpop.permute.xlu0 %1166  ;;  %v4468_v8 = vld [vmem:[#allocation30_spill] sm:$0xff] }
 0x1ad   : > { %v1491_v11 = vsel %vm1487_vm10, %v1458_v63, %v1167_v62  ;;  %911 = vrot.lane.b32.xlu1 %v4460_v20, %s2343_s8  ;;  %2142 = vmatmul.mubr.msk.f32.gmra.mrb[2].mxu1 %vm1532_vm11, %v1507_v13  ;;  %v4470_v62 = vld [vmem:[#allocation59_spill] sm:$0xff] }
 0x1ae   : > { %879 = vrot.lane.b32.xlu0 %v4462_v45, %s2343_s8  ;;  %2118 = vmatmul.mubr.msk.f32.gmra.mrb[2].mxu0 %vm1532_vm11, %v1491_v11  ;;  %v4471_v11 = vld [vmem:[#allocation42_spill] sm:$0xff] }
 0x1af   : > { %v902_v15 = vpop.permute.xlu1 %901 }
 0x1b0   : > { %v870_v37 = vpop.permute.xlu0 %869 }
 0x1b1   : > { %1210 = vrot.lane.b32.xlu1 %v4464_v54, %s2346_s6 }
 0x1b2   : > { %1178 = vrot.lane.b32.xlu0 %v4465_v29, %s2346_s6 }
 0x1b3   : > { %v998_v46 = vpop.permute.xlu1 %997 }
 0x1b4   : > { %v966_v33 = vpop.permute.xlu0 %965  ;;  %v1442_v58 = vsel %vm1421_vm8, %v1409_v2, %v998_v46 }
 0x1b5   : > { %913 = vrot.lane.b32.xlu1 %v4464_v54, %s2343_s8  ;;  %v1426_v36 = vsel %vm1421_vm8, %v1393_v1, %v966_v33  ;;  %v1361_v33 = vsel %vm1355_vm6, %v3358_v25, %v3723_v38 }
 0x1b6   : > { %881 = vrot.lane.b32.xlu0 %v4465_v29, %s2343_s8  ;;  %v1377_v29 = vsel %vm1355_vm6, %v3446_v22, %v3721_v31 }
 0x1b7   : > { %v1000_v60 = vpop.permute.xlu1 %999 }
 0x1b8   : > { %v968_v47 = vpop.permute.xlu0 %967 }
 0x1b9   : > { %1009 = vrot.lane.b32.xlu1 %v2255_v30, %s2344_s9  ;;  %v1410_v30 = vsel %vm1388_vm7, %v1377_v29, %v902_v15 }
 0x1ba   : > { %977 = vrot.lane.b32.xlu0 %v2256_v9, %s2344_s9  ;;  %v1394_v9 = vsel %vm1388_vm7, %v1361_v33, %v870_v37 }
 0x1bb   : > { %v1100_v20 = vpop.permute.xlu1 %1099 }
 0x1bc   : > { %v1068_v51 = vpop.permute.xlu0 %1067  ;;  %v1475_v41 = vsel %vm1454_vm9, %v1442_v58, %v1100_v20  ;;  %v1443_v20 = vsel %vm1421_vm8, %v1410_v30, %v1000_v60 }
 0x1bd   : > { %1011 = vrot.lane.b32.xlu1 %v2257_v21, %s2344_s9  ;;  %v1459_v35 = vsel %vm1454_vm9, %v1426_v36, %v1068_v51  ;;  %v1427_v51 = vsel %vm1421_vm8, %v1394_v9, %v968_v47  ;;  %v4472_v47 = vld [vmem:[#allocation58_spill] sm:$0xff] }
 0x1be   : > { %979 = vrot.lane.b32.xlu0 %v2258_v57, %s2344_s9  ;;  %v4473_v57 = vld [vmem:[#allocation41_spill] sm:$0xff] }
 0x1bf   : > { %v3787_v17 = vpop.permute.xlu1 %802 }
 0x1c0   : > { %v3789_v45 = vpop.permute.xlu0 %770 }
 0x1c1   : > { %1111 = vrot.lane.b32.xlu1 %v4466_v19, %s2345_s21 }
 0x1c2   : > { %1079 = vrot.lane.b32.xlu0 %v4467_v26, %s2345_s21 }
 0x1c3   : > { %v1102_v39 = vpop.permute.xlu1 %1101 }
 0x1c4   : > { %v1070_v6 = vpop.permute.xlu0 %1069  ;;  %v1476_v22 = vsel %vm1454_vm9, %v1443_v20, %v1102_v39 }
 0x1c5   : > { %814 = vrot.lane.b32.xlu1 %v4466_v19, %s2342_s7  ;;  %v1460_v21 = vsel %vm1454_vm9, %v1427_v51, %v1070_v6  ;;  %v754_v6 = vrot.slane %v3112_v4, 1  ;;  %v4476_v51 = vld [vmem:[#allocation44_spill] sm:$0xff] }
 0x1c6   : > { %782 = vrot.lane.b32.xlu0 %v4467_v26, %s2342_s7 }
 0x1c7   : > { %v1201_v24 = vpop.permute.xlu1 %1200  ;;  %v755_v58 = vsel %vm300_vm0, %v753_v56, %v754_v6 }
 0x1c8   : > { %v1508_v3 = vsel %vm1487_vm10, %v1475_v41, %v1201_v24  ;;  %v1169_v16 = vpop.permute.xlu0 %1168  ;;  %v248_v41 = vld [vmem:[%s2429_s30 + $0x190] sm:$0x3] }
 0x1c9   : > { %v1492_v49 = vsel %vm1487_vm10, %v1459_v35, %v1169_v16  ;;  %1113 = vrot.lane.b32.xlu1 %v4468_v8, %s2345_s21  ;;  %2144 = vmatprep.mubr.msk.f32.mxu1 %vm1532_vm11, %v1508_v3  ;;  %v4474_v35 = vld [vmem:[#allocation16_spill] sm:$0xff]  ;;  %v1378_v16 = vsel %vm1355_vm6, %v3462_v52, %v3787_v17 }
 0x1ca   : > { %1081 = vrot.lane.b32.xlu0 %v4469_v10, %s2345_s21  ;;  %2120 = vmatprep.mubr.msk.f32.mxu0 %vm1532_vm11, %v1492_v49 }
 0x1cb   : > { %v3819_v63 = vpop.permute.xlu1 %804 }
 0x1cc   : > { %v3821_v13 = vpop.permute.xlu0 %772 }
 0x1cd   : > { %1212 = vrot.lane.b32.xlu1 %v4470_v62, %s2346_s6 }
 0x1ce   : > { %1180 = vrot.lane.b32.xlu0 %v4471_v11, %s2346_s6 }
 0x1cf   : > { %v904_v54 = vpop.permute.xlu1 %903 }
 0x1d0   : > { %v872_v46 = vpop.permute.xlu0 %871 }
 0x1d1   : > { %816 = vrot.lane.b32.xlu1 %v4468_v8, %s2342_s7  ;;  %v1362_v8 = vsel %vm1355_vm6, %v3374_v42, %v3789_v45 }
 0x1d2   : > { %784 = vrot.lane.b32.xlu0 %v4469_v10, %s2342_s7  ;;  %v1411_v10 = vsel %vm1388_vm7, %v1378_v16, %v904_v54 }
 0x1d3   : > { %v1203_v31 = vpop.permute.xlu1 %1202 }
 0x1d4   : > { %v1509_v25 = vsel %vm1487_vm10, %v1476_v22, %v1203_v31  ;;  %v1171_v38 = vpop.permute.xlu0 %1170  ;;  %v1379_v31 = vsel %vm1355_vm6, %v3458_v27, %v3819_v63 }
 0x1d5   : > { %v1493_v15 = vsel %vm1487_vm10, %v1460_v21, %v1171_v38  ;;  %915 = vrot.lane.b32.xlu1 %v4470_v62, %s2343_s8  ;;  %2145 = vmatmul.mubr.msk.f32.gmra.mrb[4].mxu1 %vm1532_vm11, %v1509_v25  ;;  %v854_v62 = vrot.slane %v3118_v5, 2  ;;  %v1363_v25 = vsel %vm1355_vm6, %v3370_v28, %v3821_v13 }
 0x1d6   : > { %883 = vrot.lane.b32.xlu0 %v4471_v11, %s2343_s8  ;;  %2121 = vmatmul.mubr.msk.f32.gmra.mrb[4].mxu0 %vm1532_vm11, %v1493_v15  ;;  %v1395_v11 = vsel %vm1388_vm7, %v1362_v8, %v872_v46  ;;  %v4475_v46 = vld [vmem:[#allocation15_spill] sm:$0xff] }
 0x1d7   : > { %v906_v37 = vpop.permute.xlu1 %905 }
 0x1d8   : > { %v874_v60 = vpop.permute.xlu0 %873  ;;  %v1412_v38 = vsel %vm1388_vm7, %v1379_v31, %v906_v37 }
 0x1d9   : > { %1214 = vrot.lane.b32.xlu1 %v4472_v47, %s2346_s6  ;;  %v1396_v15 = vsel %vm1388_vm7, %v1363_v25, %v874_v60 }
 0x1da   : > { %1182 = vrot.lane.b32.xlu0 %v4473_v57, %s2346_s6 }
 0x1db   : > { %v1002_v19 = vpop.permute.xlu1 %1001 }
 0x1dc   : > { %v970_v26 = vpop.permute.xlu0 %969  ;;  %v1444_v29 = vsel %vm1421_vm8, %v1411_v10, %v1002_v19 }
 0x1dd   : > { %917 = vrot.lane.b32.xlu1 %v4472_v47, %s2343_s8 }
 0x1de   : > { %885 = vrot.lane.b32.xlu0 %v4473_v57, %s2343_s8  ;;  %v857_v57 = vrot.slane %v248_v41, 2 }
 0x1df   : > { %v1004_v39 = vpop.permute.xlu1 %1003 }
 0x1e0   : > { %v972_v44 = vpop.permute.xlu0 %971  ;;  %v1445_v47 = vsel %vm1421_vm8, %v1412_v38, %v1004_v39 }
 0x1e1   : > { %1013 = vrot.lane.b32.xlu1 %v3118_v5, %s2344_s9  ;;  %v1429_v19 = vsel %vm1421_vm8, %v1396_v15, %v972_v44 }
 0x1e2   : > { %981 = vrot.lane.b32.xlu0 %v3567_v14, %s2344_s9  ;;  %v756_v14 = vrot.slane %v248_v41, 1  ;;  %v250_v41 = vld [vmem:[%s2429_s30 + $0x1a0] sm:$0xff] }
 0x1e3   : > { %v1104_v2 = vpop.permute.xlu1 %1103 }
 0x1e4   : > { %v1072_v1 = vpop.permute.xlu0 %1071  ;;  %v757_v52 = vsel %vm300_vm0, %v754_v6, %v756_v14  ;;  %v1477_v17 = vsel %vm1454_vm9, %v1444_v29, %v1104_v2  ;;  %v4477_v6 = vld [vmem:[#allocation43_spill] sm:$0xff] }
 0x1e5   : > { %1015 = vrot.lane.b32.xlu1 %v3112_v4, %s2344_s9 }
 0x1e6   : > { %983 = vrot.lane.b32.xlu0 %v3625_v0, %s2344_s9  ;;  %v855_v0 = vrot.slane %v3112_v4, 2  ;;  %v1428_v4 = vsel %vm1421_vm8, %v1395_v11, %v970_v26 }
 0x1e7   : > { %v3870_v36 = vpop.permute.xlu1 %806  ;;  %v1461_v45 = vsel %vm1454_vm9, %v1428_v4, %v1072_v1  ;;  %v249_v1 = vld [vmem:[%s2429_s30 + $0x198] sm:$0xff] }
 0x1e8   : > { %v3873_v24 = vpop.permute.xlu0 %774  ;;  %v856_v30 = vsel %vm477_vm1, %v854_v62, %v855_v0  ;;  %v858_v60 = vsel %vm477_vm1, %v855_v0, %v857_v57  ;;  %v1054_v14 = vrot.slane %v249_v1, 1  ;;  %v1155_v29 = vrot.slane %v249_v1, 2 }
 0x1e9   : > { %1115 = vrot.lane.b32.xlu1 %v755_v58, %s2345_s21 }
 0x1ea   : > { %1083 = vrot.lane.b32.xlu0 %v4474_v35, %s2345_s21 }
 0x1eb   : > { %v1106_v3 = vpop.permute.xlu1 %1105 }
 0x1ec   : > { %v1074_v49 = vpop.permute.xlu0 %1073  ;;  %v1478_v27 = vsel %vm1454_vm9, %v1445_v47, %v1106_v3  ;;  %v1055_v3 = vrot.slane %v250_v41, 1 }
 0x1ed   : > { %818 = vrot.lane.b32.xlu1 %v755_v58, %s2342_s7  ;;  %v1462_v26 = vsel %vm1454_vm9, %v1429_v19, %v1074_v49  ;;  %v251_v49 = vld [vmem:[%s2429_s30 + $0x1a8] sm:$0x3]  ;;  %s185_s30 = sand.u32 1, %s2321_s13  }
 0x1ee   : > { %786 = vrot.lane.b32.xlu0 %v4474_v35, %s2342_s7  ;;  %v1056_v8 = vsel %vm300_vm0, %v1054_v14, %v1055_v3  ;;  %v1057_v10 = vrot.slane %v251_v49, 1  ;;  %s4187_s15 = scalar_lea.sflag [#allocation3], %s185_s30 }
 0x1ef   : > { %v1205_v42 = vpop.permute.xlu1 %1204 }
 0x1f0   : > { %v1510_v54 = vsel %vm1487_vm10, %v1477_v17, %v1205_v42  ;;  %v1173_v33 = vpop.permute.xlu0 %1172  ;;  %v1364_v42 = vsel %vm1355_vm6, %v3386_v23, %v3873_v24 }
 0x1f1   : > { %v1494_v5 = vsel %vm1487_vm10, %v1461_v45, %v1173_v33  ;;  %1117 = vrot.lane.b32.xlu1 %v757_v52, %s2345_s21  ;;  %2147 = vmatprep.mubr.msk.f32.mxu1 %vm1532_vm11, %v1510_v54 }
 0x1f2   : > { %1085 = vrot.lane.b32.xlu0 %v4475_v46, %s2345_s21  ;;  %2123 = vmatprep.mubr.msk.f32.mxu0 %vm1532_vm11, %v1494_v5  ;;  %v1158_v5 = vrot.slane %v251_v49, 2 }
 0x1f3   : > { %v3904_v9 = vpop.permute.xlu1 %808 }
 0x1f4   : > { %v3906_v20 = vpop.permute.xlu0 %776  ;;  %v1381_v25 = vsel %vm1355_vm6, %v3470_v43, %v3904_v9 }
 0x1f5   : > { %1216 = vrot.lane.b32.xlu1 %v856_v30, %s2346_s6 }
 0x1f6   : > { %1184 = vrot.lane.b32.xlu0 %v4476_v51, %s2346_s6 }
 0x1f7   : > { %v908_v22 = vpop.permute.xlu1 %907 }
 0x1f8   : > { %v876_v21 = vpop.permute.xlu0 %875 }
 0x1f9   : > { %820 = vrot.lane.b32.xlu1 %v757_v52, %s2342_s7  ;;  %v1156_v52 = vrot.slane %v250_v41, 2  ;;  %v1397_v54 = vsel %vm1388_vm7, %v1364_v42, %v876_v21 }
 0x1fa   : > { %788 = vrot.lane.b32.xlu0 %v4475_v46, %s2342_s7 }
 0x1fb   : > { %v1207_v63 = vpop.permute.xlu1 %1206  ;;  %v1157_v33 = vsel %vm477_vm1, %v1155_v29, %v1156_v52 }
 0x1fc   : > { %v1511_v28 = vsel %vm1487_vm10, %v1478_v27, %v1207_v63  ;;  %v1175_v13 = vpop.permute.xlu0 %1174 }
 0x1fd   : > { %v1495_v37 = vsel %vm1487_vm10, %v1462_v26, %v1175_v13  ;;  %919 = vrot.lane.b32.xlu1 %v856_v30, %s2343_s8  ;;  %2148 = vmatmul.mubr.msk.f32.gmra.mrb[6].mxu1 %vm1532_vm11, %v1511_v28 }
 0x1fe   : > { %887 = vrot.lane.b32.xlu0 %v4476_v51, %s2343_s8  ;;  %2124 = vmatmul.mubr.msk.f32.gmra.mrb[6].mxu0 %vm1532_vm11, %v1495_v37 }
 0x1ff   : > { %v910_v39 = vpop.permute.xlu1 %909 }
 0x200   : > { %v878_v44 = vpop.permute.xlu0 %877  ;;  %v1414_v15 = vsel %vm1388_vm7, %v1381_v25, %v910_v39 }
 0x201   : > { %1218 = vrot.lane.b32.xlu1 %v858_v60, %s2346_s6 }
 0x202   : > { %1186 = vrot.lane.b32.xlu0 %v4477_v6, %s2346_s6 }
 0x203   : > { %v1006_v56 = vpop.permute.xlu1 %1005 }
 0x204   : > { %v974_v2 = vpop.permute.xlu0 %973 }
 0x205   : > { %921 = vrot.lane.b32.xlu1 %v858_v60, %s2343_s8 }
 0x206   : > { %889 = vrot.lane.b32.xlu0 %v4477_v6, %s2343_s8 }
 0x207   : > { %v1008_v58 = vpop.permute.xlu1 %1007 }
 0x208   : > { %v976_v35 = vpop.permute.xlu0 %975  ;;  %v1447_v57 = vsel %vm1421_vm8, %v1414_v15, %v1008_v58 }
 0x209   : > { %1017 = vrot.lane.b32.xlu1 %v249_v1, %s2344_s9 }
 0x20a   : > { %985 = vrot.lane.b32.xlu0 %v3678_v40, %s2344_s9  ;;  %v1058_v40 = vsel %vm300_vm0, %v1055_v3, %v1057_v10 }
 0x20b   : > { %v1108_v16 = vpop.permute.xlu1 %1107 }
 0x20c   : > { %v1076_v0 = vpop.permute.xlu0 %1075 }
 0x20d   : > { %1019 = vrot.lane.b32.xlu1 %v250_v41, %s2344_s9 }
 0x20e   : > { %987 = vrot.lane.b32.xlu0 %v3726_v34, %s2344_s9  ;;  %v1380_v34 = vsel %vm1355_vm6, %v3474_v48, %v3870_v36  ;;  %v1430_v48 = vsel %vm1421_vm8, %v1397_v54, %v974_v2  ;;  %s2025_s9 = sshll.u32 %s185_s30, 8 }
 0x20f   : > { %v811_v62 = vpop.permute.xlu1 %810  ;;  %v1413_v45 = vsel %vm1388_vm7, %v1380_v34, %v908_v22  ;;  %v1463_v23 = vsel %vm1454_vm9, %v1430_v48, %v1076_v0  ;;  %s4046_s10 = scalar_lea.vmem [#allocation2], %s2025_s9 }
 0x210   : > { %v3950_v11 = vpop.permute.xlu0 %778  ;;  %v1382_v1 = vsel %vm1355_vm6, %v3486_v61, %v811_v62  ;;  %s1938_s18 = sshll.u32 %s4046_s10, 4  ;;  %s4180_s18 = int_to_ptr.vmem [resolvable:$true] %s1938_s18 }
 0x211   : > { %1119 = vrot.lane.b32.xlu1 %v1056_v8, %s2345_s21  ;;  %v1366_v41 = vsel %vm1355_vm6, %v3398_v55, %v3950_v11  ;;  %s2259_s26 = scalar_lea.vmem %s4180_s18, 4096  ;;  %p2266_p1 = scmp.lt.s32.totalorder %s4180_s18, %s2264_s28 }
 0x212   : > { %1087 = vrot.lane.b32.xlu0 %v2650_v50, %s2345_s21  ;;  %v1446_v50 = vsel %vm1421_vm8, %v1413_v45, %v1006_v56  ;;  %p2260_p12 = scmp.ne.s32.totalorder %s4180_s18, %s2259_s26  ;;  %p2267_p2 = scmp.lt.s32.totalorder %s2265_s29, %s2259_s26 }
 0x213   : > { %v1110_v4 = vpop.permute.xlu1 %1109  ;;  %v1479_v36 = vsel %vm1454_vm9, %v1446_v50, %v1108_v16 }
 0x214   : > { %v1078_v17 = vpop.permute.xlu0 %1077  ;;  %p2261_p13 = pnand %p2260_p12, %p2409_p4  ;;  %p2268_p3 = por %p2267_p2, %p2266_p1 }
 0x215   : > { %1121 = vrot.lane.b32.xlu1 %v1058_v40, %s2345_s21 }
 0x216   : > { %1089 = vrot.lane.b32.xlu0 %v4406_v12, %s2345_s21  ;;  %v1159_v12 = vsel %vm477_vm1, %v1156_v52, %v1158_v5  ;;  %p2262_p0 = pneg %p2261_p13 }
 0x217   : > { %v1209_v46 = vpop.permute.xlu1 %1208 }
 0x218   : > { %v1512_v24 = vsel %vm1487_vm10, %v1479_v36, %v1209_v46  ;;  %v1177_v30 = vpop.permute.xlu0 %1176  ;;  %p2269_p5 = pnand %p2268_p3, %p2262_p0 }
 0x219   : > { %v1496_v51 = vsel %vm1487_vm10, %v1463_v23, %v1177_v30  ;;  %1220 = vrot.lane.b32.xlu1 %v1157_v33, %s2346_s6  ;;  %2150 = vmatprep.mubr.msk.f32.mxu1 %vm1532_vm11, %v1512_v24  ;;  %v4040_v24 = vld [vmem:[%s4236_s2] ss:$0 sm:$0xff] }
 0x21a   : > { %1188 = vrot.lane.b32.xlu0 %v2897_v18, %s2346_s6  ;;  %2126 = vmatprep.mubr.msk.f32.mxu0 %vm1532_vm11, %v1496_v51  ;;  %v1365_v18 = vsel %vm1355_vm6, %v3382_v59, %v3906_v20 }
 0x21b   : > { %v813_v22 = vpop.permute.xlu1 %812  ;;  %v1398_v47 = vsel %vm1388_vm7, %v1365_v18, %v878_v44 }
 0x21c   : > { %v781_v31 = vpop.permute.xlu0 %780  ;;  %v1431_v19 = vsel %vm1421_vm8, %v1398_v47, %v976_v35  ;;  %v1383_v52 = vsel %vm1355_vm6, %v3482_v32, %v813_v22 }
 0x21d   : > { %1222 = vrot.lane.b32.xlu1 %v1159_v12, %s2346_s6  ;;  %v1464_v63 = vsel %vm1454_vm9, %v1431_v19, %v1078_v17 }
 0x21e   : > { %1190 = vrot.lane.b32.xlu0 %v2892_v7, %s2346_s6  ;;  %v1480_v7 = vsel %vm1454_vm9, %v1447_v57, %v1110_v4  ;;  %v1367_v4 = vsel %vm1355_vm6, %v3394_v53, %v781_v31 }
 0x21f   : > { %v912_v21 = vpop.permute.xlu1 %911 }
 0x220   : > { %v880_v38 = vpop.permute.xlu0 %879  ;;  %v1415_v35 = vsel %vm1388_vm7, %v1382_v1, %v912_v21 }
 0x221   : > { %v1399_v14 = vsel %vm1388_vm7, %v1366_v41, %v880_v38 }
 0x223   : > { %v1211_v27 = vpop.permute.xlu1 %1210 }
 0x224   : > { %v1513_v43 = vsel %vm1487_vm10, %v1480_v7, %v1211_v27  ;;  %v1179_v9 = vpop.permute.xlu0 %1178 }
 0x225   : > { %v1497_v26 = vsel %vm1487_vm10, %v1464_v63, %v1179_v9  ;;  %2151 = vmatmul.mubr.msk.f32.gmra.mrb[8].mxu1 %vm1532_vm11, %v1513_v43 }
 0x226   : > { %2127 = vmatmul.mubr.msk.f32.gmra.mrb[8].mxu0 %vm1532_vm11, %v1497_v26 }
 0x227   : > { %v914_v59 = vpop.permute.xlu1 %913 }
 0x228   : > { %v882_v20 = vpop.permute.xlu0 %881  ;;  %v1416_v34 = vsel %vm1388_vm7, %v1383_v52, %v914_v59  ;;  %v4478_v59 = vld [vmem:[#allocation26_spill] sm:$0xff] }
 0x229   : > { %v1400_v17 = vsel %vm1388_vm7, %v1367_v4, %v882_v20 }
 0x22b   : > { %v1010_v28 = vpop.permute.xlu1 %1009 }
 0x22c   : > { %v978_v13 = vpop.permute.xlu0 %977  ;;  %v1448_v3 = vsel %vm1421_vm8, %v1415_v35, %v1010_v28 }
 0x22d   : > { %v1432_v16 = vsel %vm1421_vm8, %v1399_v14, %v978_v13  ;;  %v4479_v13 = vld [vmem:[#allocation17_spill] sm:$0xff] }
 0x22f   : > { %v1012_v37 = vpop.permute.xlu1 %1011 }
 0x230   : > { %v980_v60 = vpop.permute.xlu0 %979  ;;  %v1449_v42 = vsel %vm1421_vm8, %v1416_v34, %v1012_v37 }
 0x231   : > { %v1433_v45 = vsel %vm1421_vm8, %v1400_v17, %v980_v60 }
 0x233   : > { %v1112_v39 = vpop.permute.xlu1 %1111 }
 0x234   : > { %v1080_v44 = vpop.permute.xlu0 %1079  ;;  %v1481_v49 = vsel %vm1454_vm9, %v1448_v3, %v1112_v39 }
 0x235   : > { %v1465_v8 = vsel %vm1454_vm9, %v1432_v16, %v1080_v44 }
 0x237   : > { %v3999_v6 = vpop.permute.xlu1 %814 }
 0x238   : > { %v4001_v56 = vpop.permute.xlu0 %782  ;;  %v1384_v20 = vsel %vm1355_vm6, %v4478_v59, %v3999_v6 }
 0x239   : > { %v1368_v37 = vsel %vm1355_vm6, %v4479_v13, %v4001_v56 }
 0x23b   : > { %v1114_v2 = vpop.permute.xlu1 %1113 }
 0x23c   : > { %v1082_v58 = vpop.permute.xlu0 %1081  ;;  %v1482_v54 = vsel %vm1454_vm9, %v1449_v42, %v1114_v2 }
 0x23d   : > { %v1466_v33 = vsel %vm1454_vm9, %v1433_v45, %v1082_v58 }
 0x23f   : > { %v1213_v0 = vpop.permute.xlu1 %1212 }
 0x240   : > { %v1514_v61 = vsel %vm1487_vm10, %v1481_v49, %v1213_v0  ;;  %v1181_v10 = vpop.permute.xlu0 %1180  ;;  %v4480_v49 = vld [vmem:[#allocation64_spill] sm:$0xff] }
 0x241   : > { %v1498_v62 = vsel %vm1487_vm10, %v1465_v8, %v1181_v10  ;;  %2153 = vmatprep.mubr.msk.f32.mxu1 %vm1532_vm11, %v1514_v61  ;;  %v4481_v61 = vld [vmem:[#allocation6_spill] sm:$0xff] }
 0x242   : > { %2129 = vmatprep.mubr.msk.f32.mxu0 %vm1532_vm11, %v1498_v62 }
 0x243   : > { %v4018_v55 = vpop.permute.xlu1 %816 }
 0x244   : > { %v4020_v11 = vpop.permute.xlu0 %784  ;;  %v1385_v0 = vsel %vm1355_vm6, %v4480_v49, %v4018_v55 }
 0x245   : > { %v1369_v10 = vsel %vm1355_vm6, %v4481_v61, %v4020_v11 }
 0x247   : > { %v916_v29 = vpop.permute.xlu1 %915 }
 0x248   : > { %v884_v40 = vpop.permute.xlu0 %883  ;;  %v1417_v60 = vsel %vm1388_vm7, %v1384_v20, %v916_v29 }
 0x249   : > { %v1401_v39 = vsel %vm1388_vm7, %v1368_v37, %v884_v40  ;;  %v4484_v37 = vld [vmem:[#allocation65_spill] sm:$0xff] }
 0x24b   : > { %v1215_v50 = vpop.permute.xlu1 %1214 }
 0x24c   : > { %v1515_v32 = vsel %vm1487_vm10, %v1482_v54, %v1215_v50  ;;  %v1183_v5 = vpop.permute.xlu0 %1182 }
 0x24d   : > { %v1499_v53 = vsel %vm1487_vm10, %v1466_v33, %v1183_v5  ;;  %2154 = vmatmul.mubr.msk.f32.gmra.mrb[10].mxu1 %vm1532_vm11, %v1515_v32 }
 0x24e   : > { %2130 = vmatmul.mubr.msk.f32.gmra.mrb[10].mxu0 %vm1532_vm11, %v1499_v53 }
 0x24f   : > { %v918_v48 = vpop.permute.xlu1 %917 }
 0x250   : > { %v886_v36 = vpop.permute.xlu0 %885  ;;  %v1418_v62 = vsel %vm1388_vm7, %v1385_v0, %v918_v48 }
 0x251   : > { %v1402_v29 = vsel %vm1388_vm7, %v1369_v10, %v886_v36 }
 0x253   : > { %v1014_v46 = vpop.permute.xlu1 %1013 }
 0x254   : > { %v982_v23 = vpop.permute.xlu0 %981  ;;  %v1450_v44 = vsel %vm1421_vm8, %v1417_v60, %v1014_v46 }
 0x255   : > { %v1434_v2 = vsel %vm1421_vm8, %v1401_v39, %v982_v23 }
 0x257   : > { %v1016_v30 = vpop.permute.xlu1 %1015 }
 0x258   : > { %v984_v51 = vpop.permute.xlu0 %983  ;;  %v2116_v12 = vpop.f32.mrb[0].mxu0  ;;  %v1451_v52 = vsel %vm1421_vm8, %v1418_v62, %v1016_v30 }
 0x259   : > { %v1705_v22 = vadd.f32 %v2116_v12, %v4040_v24  ;;  %v1699_v31 = vpop.f32.mrb[1].mxu0  ;;  %v1435_v40 = vsel %vm1421_vm8, %v1402_v29, %v984_v51 }
 0x25a   : > { %v1700_v21 = vadd.f32 %v4040_v24, %v1699_v31 }
 0x25b   : > { %v1859_v25 = vmax.f32 %v1705_v22, 0.0  ;;  %v1116_v38 = vpop.permute.xlu1 %1115 }
 0x25c   : > { %v1858_v18 = vmax.f32 %v1700_v21, 0.0  ;;  %v1084_v15 = vpop.permute.xlu0 %1083  ;;  %v1483_v1 = vsel %vm1454_vm9, %v1450_v44, %v1116_v38 }
 0x25d   : > { %1891 = vst [vmem:[%s4046_s10 + $0x8] sm:$0xff] %v1859_v25  ;;  %v2140_v47 = vpop.f32.mrb[0].mxu1  ;;  %v1467_v41 = vsel %vm1454_vm9, %v1434_v2, %v1084_v15 }
 0x25e   : > { %1890 = vst [vmem:[%s4046_s10] sm:$0xff] %v1858_v18  ;;  %v1785_v57 = vadd.f32 %v2140_v47, %v4040_v24  ;;  %v1779_v19 = vpop.f32.mrb[1].mxu1  ;;  %v4482_v47 = vld [vmem:[#allocation27_spill] sm:$0xff] }
 0x25f   : > { %v1780_v7 = vadd.f32 %v4040_v24, %v1779_v19  ;;  %v4052_v27 = vpop.permute.xlu1 %818 }
 0x260   : > { %v1875_v63 = vmax.f32 %v1785_v57, 0.0  ;;  %v4054_v43 = vpop.permute.xlu0 %786  ;;  %v1386_v57 = vsel %vm1355_vm6, %v4482_v47, %v4052_v27 }
 0x261   : > { %v1874_v9 = vmax.f32 %v1780_v7, 0.0  ;;  %v4483_v7 = vld [vmem:[#allocation18_spill] sm:$0xff] }
 0x262   : > { %1907 = vst [vmem:[%s4046_s10 + $0x88] sm:$0xff] %v1875_v63  ;;  %v1370_v63 = vsel %vm1355_vm6, %v4483_v7, %v4054_v43  ;;  %v4485_v43 = vld [vmem:[#allocation19_spill] sm:$0xff] }
 0x263   : > { %1906 = vst [vmem:[%s4046_s10 + $0x80] sm:$0xff] %v1874_v9  ;;  %v1118_v26 = vpop.permute.xlu1 %1117 }
 0x264   : > { %v1086_v28 = vpop.permute.xlu0 %1085  ;;  %v1484_v4 = vsel %vm1454_vm9, %v1451_v52, %v1118_v26 }
 0x265   : > { %v1468_v17 = vsel %vm1454_vm9, %v1435_v40, %v1086_v28 }
 0x267   : > { %v1217_v58 = vpop.permute.xlu1 %1216 }
 0x268   : > { %v1516_v6 = vsel %vm1487_vm10, %v1483_v1, %v1217_v58  ;;  %v1185_v35 = vpop.permute.xlu0 %1184 }
 0x269   : > { %v1500_v14 = vsel %vm1487_vm10, %v1467_v41, %v1185_v35  ;;  %2156 = vmatprep.mubr.msk.f32.mxu1 %vm1532_vm11, %v1516_v6 }
 0x26a   : > { %2132 = vmatprep.mubr.msk.f32.mxu0 %vm1532_vm11, %v1500_v14 }
 0x26b   : > { %v821_v56 = vpop.permute.xlu1 %820 }
 0x26c   : > { %v789_v3 = vpop.permute.xlu0 %788  ;;  %v1387_v60 = vsel %vm1355_vm6, %v4484_v37, %v821_v56 }
 0x26d   : > { %v1371_v2 = vsel %vm1355_vm6, %v4485_v43, %v789_v3 }
 0x26f   : > { %v920_v16 = vpop.permute.xlu1 %919 }
 0x270   : > { %v888_v8 = vpop.permute.xlu0 %887  ;;  %v1419_v9 = vsel %vm1388_vm7, %v1386_v57, %v920_v16 }
 0x271   : > { %v1403_v26 = vsel %vm1388_vm7, %v1370_v63, %v888_v8 }
 0x273   : > { %v1219_v34 = vpop.permute.xlu1 %1218 }
 0x274   : > { %v1517_v55 = vsel %vm1487_vm10, %v1484_v4, %v1219_v34  ;;  %v1187_v42 = vpop.permute.xlu0 %1186 }
 0x275   : > { %v1501_v45 = vsel %vm1487_vm10, %v1468_v17, %v1187_v42  ;;  %2157 = vmatmul.mubr.msk.f32.gmra.mrb[12].mxu1 %vm1532_vm11, %v1517_v55 }
 0x276   : > { %2133 = vmatmul.mubr.msk.f32.gmra.mrb[12].mxu0 %vm1532_vm11, %v1501_v45 }
 0x277   : > { %v922_v11 = vpop.permute.xlu1 %921 }
 0x278   : > { %v890_v54 = vpop.permute.xlu0 %889  ;;  %v1420_v1 = vsel %vm1388_vm7, %v1387_v60, %v922_v11 }
 0x279   : > { %v1404_v41 = vsel %vm1388_vm7, %v1371_v2, %v890_v54 }
 0x27b   : > { %v1018_v50 = vpop.permute.xlu1 %1017 }
 0x27c   : > { %v986_v33 = vpop.permute.xlu0 %985  ;;  %v1452_v59 = vsel %vm1421_vm8, %v1419_v9, %v1018_v50 }
 0x27d   : > { %v1436_v20 = vsel %vm1421_vm8, %v1403_v26, %v986_v33 }
 0x27f   : > { %v1020_v32 = vpop.permute.xlu1 %1019 }
 0x280   : > { %v988_v5 = vpop.permute.xlu0 %987  ;;  %v2143_v53 = vpop.f32.mrb[2].mxu1  ;;  %v1453_v6 = vsel %vm1421_vm8, %v1420_v1, %v1020_v32 }
 0x281   : > { %v2119_v48 = vpop.f32.mrb[2].mxu0  ;;  %v1795_v36 = vadd.f32 %v2143_v53, %v4040_v24  ;;  %v1789_v46 = vpop.f32.mrb[3].mxu1  ;;  %v1437_v35 = vsel %vm1421_vm8, %v1404_v41, %v988_v5 }
 0x282   : > { %v1715_v23 = vadd.f32 %v2119_v48, %v4040_v24  ;;  %v1709_v30 = vpop.f32.mrb[3].mxu0  ;;  %v1790_v51 = vadd.f32 %v4040_v24, %v1789_v46 }
 0x283   : > { %v1877_v12 = vmax.f32 %v1795_v36, 0.0  ;;  %v1710_v22 = vadd.f32 %v4040_v24, %v1709_v30  ;;  %v1120_v31 = vpop.permute.xlu1 %1119 }
 0x284   : > { %v1861_v21 = vmax.f32 %v1715_v23, 0.0  ;;  %v1876_v25 = vmax.f32 %v1790_v51, 0.0  ;;  %v1088_v38 = vpop.permute.xlu0 %1087  ;;  %v1485_v28 = vsel %vm1454_vm9, %v1452_v59, %v1120_v31 }
 0x285   : > { %1909 = vst [vmem:[%s4046_s10 + $0x98] sm:$0xff] %v1877_v12  ;;  %v1860_v18 = vmax.f32 %v1710_v22, 0.0  ;;  %v1469_v27 = vsel %vm1454_vm9, %v1436_v20, %v1088_v38 }
 0x286   : > { %1893 = vst [vmem:[%s4046_s10 + $0x18] sm:$0xff] %v1861_v21  ;;  %1908 = vst [vmem:[%s4046_s10 + $0x90] sm:$0xff] %v1876_v25 }
 0x287   : > { %1892 = vst [vmem:[%s4046_s10 + $0x10] sm:$0xff] %v1860_v18  ;;  %v1122_v15 = vpop.permute.xlu1 %1121 }
 0x288   : > { %v1090_v19 = vpop.permute.xlu0 %1089  ;;  %v1486_v14 = vsel %vm1454_vm9, %v1453_v6, %v1122_v15 }
 0x289   : > { %v1470_v16 = vsel %vm1454_vm9, %v1437_v35, %v1090_v19 }
 0x28b   : > { %v1221_v13 = vpop.permute.xlu1 %1220 }
 0x28c   : > { %v1518_v39 = vsel %vm1487_vm10, %v1485_v28, %v1221_v13  ;;  %v1189_v44 = vpop.permute.xlu0 %1188 }
 0x28d   : > { %v1502_v58 = vsel %vm1487_vm10, %v1469_v27, %v1189_v44  ;;  %2159 = vmatprep.mubr.msk.f32.mxu1 %vm1532_vm11, %v1518_v39 }
 0x28e   : > { %2135 = vmatprep.mubr.msk.f32.mxu0 %vm1532_vm11, %v1502_v58 }
 0x28f   : > { %v1223_v56 = vpop.permute.xlu1 %1222 }
 0x290   : > { %v1519_v3 = vsel %vm1487_vm10, %v1486_v14, %v1223_v56  ;;  %v1191_v49 = vpop.permute.xlu0 %1190 }
 0x291   : > { %v1503_v0 = vsel %vm1487_vm10, %v1470_v16, %v1191_v49  ;;  %2160 = vmatmul.mubr.msk.f32.gmra.mrb[14].mxu1 %vm1532_vm11, %v1519_v3 }
 0x292   : > { %2136 = vmatmul.mubr.msk.f32.gmra.mrb[14].mxu0 %vm1532_vm11, %v1503_v0 }
 0x2a8   : > { %v2146_v8 = vpop.f32.mrb[4].mxu1 }
 0x2a9   : > { %v2122_v61 = vpop.f32.mrb[4].mxu0  ;;  %v1805_v10 = vadd.f32 %v2146_v8, %v4040_v24  ;;  %v1799_v62 = vpop.f32.mrb[5].mxu1 }
 0x2aa   : > { %v1725_v29 = vadd.f32 %v2122_v61, %v4040_v24  ;;  %v1719_v52 = vpop.f32.mrb[5].mxu0  ;;  %v1800_v40 = vadd.f32 %v4040_v24, %v1799_v62 }
 0x2ab   : > { %v1879_v4 = vmax.f32 %v1805_v10, 0.0  ;;  %v1720_v34 = vadd.f32 %v4040_v24, %v1719_v52 }
 0x2ac   : > { %v1863_v17 = vmax.f32 %v1725_v29, 0.0  ;;  %v1878_v55 = vmax.f32 %v1800_v40, 0.0 }
 0x2ad   : > { %1911 = vst [vmem:[%s4046_s10 + $0xa8] sm:$0xff] %v1879_v4  ;;  %v1862_v42 = vmax.f32 %v1720_v34, 0.0 }
 0x2ae   : > { %1895 = vst [vmem:[%s4046_s10 + $0x28] sm:$0xff] %v1863_v17  ;;  %1910 = vst [vmem:[%s4046_s10 + $0xa0] sm:$0xff] %v1878_v55 }
 0x2af   : > { %1894 = vst [vmem:[%s4046_s10 + $0x20] sm:$0xff] %v1862_v42 }
 0x2d0   : > { %v2149_v45 = vpop.f32.mrb[6].mxu1 }
 0x2d1   : > { %v2125_v11 = vpop.f32.mrb[6].mxu0  ;;  %v1815_v54 = vadd.f32 %v2149_v45, %v4040_v24  ;;  %v1809_v50 = vpop.f32.mrb[7].mxu1 }
 0x2d2   : > { %v1735_v33 = vadd.f32 %v2125_v11, %v4040_v24  ;;  %v1729_v32 = vpop.f32.mrb[7].mxu0  ;;  %v1810_v5 = vadd.f32 %v4040_v24, %v1809_v50 }
 0x2d3   : > { %v1881_v53 = vmax.f32 %v1815_v54, 0.0  ;;  %v1730_v48 = vadd.f32 %v4040_v24, %v1729_v32 }
 0x2d4   : > { %v1865_v36 = vmax.f32 %v1735_v33, 0.0  ;;  %v1880_v46 = vmax.f32 %v1810_v5, 0.0 }
 0x2d5   : > { %1913 = vst [vmem:[%s4046_s10 + $0xb8] sm:$0xff] %v1881_v53  ;;  %v1864_v23 = vmax.f32 %v1730_v48, 0.0 }
 0x2d6   : > { %1897 = vst [vmem:[%s4046_s10 + $0x38] sm:$0xff] %v1865_v36  ;;  %1912 = vst [vmem:[%s4046_s10 + $0xb0] sm:$0xff] %v1880_v46 }
 0x2d7   : > { %1896 = vst [vmem:[%s4046_s10 + $0x30] sm:$0xff] %v1864_v23 }
 0x2f8   : > { %v2152_v30 = vpop.f32.mrb[8].mxu1 }
 0x2f9   : > { %v2128_v51 = vpop.f32.mrb[8].mxu0  ;;  %v1825_v12 = vadd.f32 %v2152_v30, %v4040_v24  ;;  %v1819_v22 = vpop.f32.mrb[9].mxu1 }
 0x2fa   : > { %v1745_v31 = vadd.f32 %v2128_v51, %v4040_v24  ;;  %v1739_v21 = vpop.f32.mrb[9].mxu0  ;;  %v1820_v25 = vadd.f32 %v4040_v24, %v1819_v22 }
 0x2fb   : > { %v1883_v38 = vmax.f32 %v1825_v12, 0.0  ;;  %v1740_v18 = vadd.f32 %v4040_v24, %v1739_v21 }
 0x2fc   : > { %v1867_v15 = vmax.f32 %v1745_v31, 0.0  ;;  %v1882_v47 = vmax.f32 %v1820_v25, 0.0 }
 0x2fd   : > { %1915 = vst [vmem:[%s4046_s10 + $0xc8] sm:$0xff] %v1883_v38  ;;  %v1866_v57 = vmax.f32 %v1740_v18, 0.0 }
 0x2fe   : > { %1899 = vst [vmem:[%s4046_s10 + $0x48] sm:$0xff] %v1867_v15  ;;  %1914 = vst [vmem:[%s4046_s10 + $0xc0] sm:$0xff] %v1882_v47 }
 0x2ff   : > { %1898 = vst [vmem:[%s4046_s10 + $0x40] sm:$0xff] %v1866_v57 }
 0x320   : > { %v2155_v19 = vpop.f32.mrb[10].mxu1 }
 0x321   : > { %v2131_v7 = vpop.f32.mrb[10].mxu0  ;;  %v1835_v63 = vadd.f32 %v2155_v19, %v4040_v24  ;;  %v1829_v9 = vpop.f32.mrb[11].mxu1 }
 0x322   : > { %v1755_v26 = vadd.f32 %v2131_v7, %v4040_v24  ;;  %v1749_v59 = vpop.f32.mrb[11].mxu0  ;;  %v1830_v20 = vadd.f32 %v4040_v24, %v1829_v9 }
 0x323   : > { %v1885_v28 = vmax.f32 %v1835_v63, 0.0  ;;  %v1750_v13 = vadd.f32 %v4040_v24, %v1749_v59 }
 0x324   : > { %v1869_v37 = vmax.f32 %v1755_v26, 0.0  ;;  %v1884_v60 = vmax.f32 %v1830_v20, 0.0 }
 0x325   : > { %1917 = vst [vmem:[%s4046_s10 + $0xd8] sm:$0xff] %v1885_v28  ;;  %v1868_v27 = vmax.f32 %v1750_v13, 0.0 }
 0x326   : > { %1901 = vst [vmem:[%s4046_s10 + $0x58] sm:$0xff] %v1869_v37  ;;  %1916 = vst [vmem:[%s4046_s10 + $0xd0] sm:$0xff] %v1884_v60 }
 0x327   : > { %1900 = vst [vmem:[%s4046_s10 + $0x50] sm:$0xff] %v1868_v27 }
 0x348   : > { %v2158_v39 = vpop.f32.mrb[12].mxu1 }
 0x349   : > { %v2134_v44 = vpop.f32.mrb[12].mxu0  ;;  %v1845_v43 = vadd.f32 %v2158_v39, %v4040_v24  ;;  %v1839_v2 = vpop.f32.mrb[13].mxu1 }
 0x34a   : > { %v1765_v1 = vadd.f32 %v2134_v44, %v4040_v24  ;;  %v1759_v58 = vpop.f32.mrb[13].mxu0  ;;  %v1840_v41 = vadd.f32 %v4040_v24, %v1839_v2 }
 0x34b   : > { %v1887_v6 = vmax.f32 %v1845_v43, 0.0  ;;  %v1760_v35 = vadd.f32 %v4040_v24, %v1759_v58 }
 0x34c   : > { %v1871_v14 = vmax.f32 %v1765_v1, 0.0  ;;  %v1886_v56 = vmax.f32 %v1840_v41, 0.0 }
 0x34d   : > { %1919 = vst [vmem:[%s4046_s10 + $0xe8] sm:$0xff] %v1887_v6  ;;  %v1870_v16 = vmax.f32 %v1760_v35, 0.0 }
 0x34e   : > { %1903 = vst [vmem:[%s4046_s10 + $0x68] sm:$0xff] %v1871_v14  ;;  %1918 = vst [vmem:[%s4046_s10 + $0xe0] sm:$0xff] %v1886_v56 }
 0x34f   : > { %1902 = vst [vmem:[%s4046_s10 + $0x60] sm:$0xff] %v1870_v16 }
 0x364   : > { %v2161_v3 = vpop.f32.mrb[14].mxu1 }
 0x365   : > { %v2137_v49 = vpop.f32.mrb[14].mxu0  ;;  %v1855_v0 = vadd.f32 %v2161_v3, %v4040_v24  ;;  %v1849_v8 = vpop.f32.mrb[15].mxu1 }
 0x366   : > { %v1775_v61 = vadd.f32 %v2137_v49, %v4040_v24  ;;  %v1769_v10 = vpop.f32.mrb[15].mxu0  ;;  %v1850_v62 = vadd.f32 %v4040_v24, %v1849_v8 }
 0x367   : > { %v1889_v29 = vmax.f32 %v1855_v0, 0.0  ;;  %v1770_v52 = vadd.f32 %v4040_v24, %v1769_v10 }
 0x368   : > { %v1873_v40 = vmax.f32 %v1775_v61, 0.0  ;;  %v1888_v4 = vmax.f32 %v1850_v62, 0.0 }
 0x369   : > { %1921 = vst [vmem:[%s4046_s10 + $0xf8] sm:$0xff] %v1889_v29  ;;  %v1872_v34 = vmax.f32 %v1770_v52, 0.0 }
 0x36a   : > { %1905 = vst [vmem:[%s4046_s10 + $0x78] sm:$0xff] %v1873_v40  ;;  %1920 = vst [vmem:[%s4046_s10 + $0xf0] sm:$0xff] %v1888_v4 }
 0x36b   : > { %1904 = vst [vmem:[%s4046_s10 + $0x70] sm:$0xff] %v1872_v34 }
 0x36c   : > { %2272 = shalt.err (!%p2269_p5)
}
 0x36d   : > { %s2273_s4 = scalar_lea.hbm %s4177_s23, 4096  ;;  %s2277_s7 = scalar_lea.hbm %s4237_s3, 8192 }
 0x36e   : > { %p2274_p6 = scmp.ne.s32.totalorder %s4177_s23, %s2273_s4  ;;  %p2278_p10 = scmp.lt.u32.totalorder %s4177_s23, %s4237_s3 }
 0x36f   : > { %p2279_p11 = scmp.lt.u32.totalorder %s2277_s7, %s2273_s4  ;;  %p2281_p13 = scmp.lt.u32.totalorder %s2273_s4, %s4177_s23 }
 0x370   : > { %p2275_p7 = pnand %p2274_p6, %p2409_p4 }
 0x371   : > { %p2280_p12 = por %p2279_p11, %p2278_p10 }
 0x372   : > { %p2276_p9 = pneg %p2275_p7 }
 0x373   : > { %p2282_p0 = por %p2281_p13, %p2280_p12 }
 0x375   : > { %p2283_p1 = pnand %p2282_p0, %p2276_p9 }
 0x377   : > { %2286 = shalt.err (!%p2283_p1)
}
 0x378   : > { %s2348_s10 = smov 128  }
 0x379   : > { %2177 = dma.vmem_to_hbm [thread:$0]  (%p2409_p4), %s4180_s18, 4096, %s4177_s23, %s4187_s15, %s2348_s10, %s2348_s10, %s2340_s5  }
 0x37a PF: > { %p2183_p2 = scmp.ge.s32.totalorder %s2337_s17, 2  ;;  %s1953_s11 = sand.u32 1, %s2317_s12  }
 0x37b   : > { %s1954_s19 = scalar_lea.sflag [#allocation3], %s1953_s11 }
 0x37c   : > { %p2180_p3 = pnand %p2183_p2, %p2416_p8 }
 0x37e   : > { %2312 = dma.done.wait (!%p2180_p3), %s1954_s19, 4096  }
 0x37f   : > { %2314 = vsyncadd (!%p2180_p3), %s1954_s19, 4294963200  ;;  %s16_s17 = sadd.s32 1, %s2337_s17   ;;  %s4486_s12 = smov %s2321_s13 }
 0x380   : > { %p13_p5 = scmp.ge.s32.totalorder %s16_s17, 4   ;;  %s4487_s13 = smov %s2325_s14 }
 0x381   : > { %s4488_s14 = smov %s2422_s25  ;;  %s4489_s15 = smov %s2333_s16 }
 0x382   : > { %s4490_s16 = smov %s4492_s20  ;;  %15 = sbr.rel (!%p13_p5) target bundleno = 4 (0x4), region = 67 }
 0x389   :  { %1959 = vsyncpa [#allocation3], 1 }
 0x38a   :  { %1961 = vsyncpa [#allocation3 + $0x1], 1 }

// kernel: tpu_custom_call.1
= control target key start
LH: loop header
LB: loop body
LE: loop exit
PB: predicated region body
PF: predicated region fallthrough
CT: control target
= control target key end

     0   :  { %8 = vsyncpa [#allocation3], 0  ;;  %s4234_s0 = inlined_call_operand.vmem [shape: f32[2,1,18,18,4], index: 0, kind: input, shape index: {}]   ;;  %s4235_s1 = inlined_call_operand.vmem [shape: f32[36,128], index: 1, kind: input, shape index: {}]   ;;  %s4236_s2 = inlined_call_operand.vmem [shape: f32[1,128], index: 2, kind: input, shape index: {}]   ;;  %s4237_s3 = inlined_call_operand.hbm [shape: f32[2,256,128], index: 3, kind: output, shape index: {}]  }
   0x1   :  { %10 = vsyncpa [#allocation3 + $0x1], 0  ;;  %s2369_s12 = smov 0   ;;  %s2371_s13 = smov 0  }
   0x2   :  { %s2373_s14 = smov 0   ;;  %s2375_s15 = smov 0  }
   0x3   :  { %s2377_s16 = smov 0   ;;  %s2379_s17 = smov 0  }
   0x4 LB: > { %s2020_s18 = sadd.s32 4294967295, %s2337_s17   ;;  %s2021_s19 = sadd.s32 4294967294, %s2337_s17   ;;  %s2337_s17 = sphi %s2379_s17, %s16_s17   ;;  %s2333_s16 = sphi %s2377_s16, %s4490_s16   ;;  %s2329_s15 = sphi %s2375_s15, %s4489_s15   ;;  %s2325_s14 = sphi %s2373_s14, %s4488_s14   ;;  %s2321_s13 = sphi %s2371_s13, %s4487_s13   ;;  %s2317_s12 = sphi %s2369_s12, %s4486_s12  }
   0x5   : > { %s28_s20 = sadd.s32 1, %s2333_s16  ;;  %s107_s21 = sadd.s32 1, %s2325_s14 }
   0x6   : > { %p30_p0 = scmp.ge.s32.totalorder %s28_s20, 2  ;;  %p117_p1 = scmp.ne.s32.totalorder %s2325_s14, %s2321_s13 }
   0x7   : > { %p118_p2 = scmp.eq.s32.totalorder %s2020_s18, 1  ;;  %p123_p3 = scmp.ne.s32.totalorder %s2321_s13, %s2317_s12 }
   0x8   : > { %s4492_s20 = smov (%p30_p0, %s28_s20), 0  ;;  %p124_p5 = scmp.eq.s32.totalorder %s2021_s19, 1 }
   0x9   : > { %p2409_p4 = por %p118_p2, %p117_p1  ;;  %s102_s23 = ssub.s32 %s2333_s16, %s4492_s20 }
   0xa   : > { %p2024_p6 = scmp.ge.s32.totalorder %s2337_s17, 1  ;;  %p105_p7 = scmp.eq.s32.totalorder %s102_s23, 0 }
   0xb   : > { %p2416_p8 = por %p124_p5, %p123_p3  ;;  %p160_p9 = scmp.lt.s32.totalorder %s2337_s17, 3 }
   0xc   : > { %s2422_s25 = scalar_select %p105_p7, %s2325_s14, %s107_s21  }
   0xd   : > { %p161_p10 = pnand %p2024_p6, %p160_p9 }
   0xf   : > { %164 = sbr.rel (%p161_p10) target bundleno = 890 (0x37a), region = 32 }
  0x16   : > { %p188_p11 = scmp.lt.s32.totalorder %s2329_s15, 1  ;;  %vm300_vm0 = vcmask 1046528   ;;  %s2339_s4 = smov 4   ;;  %vm477_vm1 = vcmask 1045504   ;;  %vm1256_vm2 = vcmask 31744   ;;  %vm1289_vm3 = vcmask 64512  }
  0x17   : > { %s2340_s5 = smov 8   ;;  %s2341_s6 = smov 12   ;;  %vm1629_vm4 = vcmask 1043456   ;;  %vm1322_vm5 = vcmask 97280   ;;  %vm1355_vm6 = vcmask 130048   ;;  %vm1388_vm7 = vcmask 162816  }
  0x18   : > { %s189_s26 = scalar_select %p188_p11, %s2329_s15, 1  ;;  %vm1421_vm8 = vcmask 195584   ;;  %vm1454_vm9 = vcmask 228352   ;;  %vm1487_vm10 = vcmask 261120   ;;  %vm1532_vm11 = vcmask 293888  }
  0x19   : > { %s2342_s7 = smov 16   ;;  %s2343_s8 = smov 20  }
  0x1a   : > { %s2176_s27 = smul.u32 432, %s189_s26  ;;  %s2344_s9 = smov 24  }
  0x1b   : > { %s2345_s21 = smov 28   ;;  %s2066_s11 = sshll.u32 %s2329_s15, 12 }
  0x1c   : > { %s2429_s30 = scalar_lea.vmem %s4234_s0, %s2176_s27  ;;  %s4177_s23 = scalar_lea.hbm %s4237_s3, %s2066_s11 }
  0x1d   : > { %v2432_v0 = vld [vmem:[%s2429_s30 + $0x18] sm:$0xff]  ;;  %v2435_v1 = vld [vmem:[%s2429_s30 + $0x20] sm:$0xff]  ;;  %v2443_v5 = vld [vmem:[%s2429_s30 + $0x8] sm:$0xff]  ;;  %s2347_s27 = smov [#allocation2]  }
  0x1e   : > { %v2438_v2 = vld [vmem:[%s2429_s30] sm:$0xff]  ;;  %v306_v3 = vrot.slane %v2432_v0, 1  ;;  %v307_v4 = vrot.slane %v2435_v1, 1  ;;  %v2447_v7 = vld [vmem:[%s2429_s30 + $0x28] sm:$0x3]  ;;  %v302_v8 = vrot.slane %v2443_v5, 1 }
  0x1f   : > { %v301_v6 = vrot.slane %v2438_v2, 1  ;;  %v309_v9 = vrot.slane %v2447_v7, 1  ;;  %v2452_v10 = vld [vmem:[%s2429_s30 + $0x10] sm:$0x3]  ;;  %v2455_v11 = vld [vmem:[%s2429_s30 + $0x38] sm:$0xff]  ;;  %v2485_v24 = vld [vmem:[%s2429_s30 + $0x48] sm:$0xff] }
  0x20   : > { %v2458_v12 = vsel %vm300_vm0, %v306_v3, %v307_v4  ;;  %v304_v13 = vrot.slane %v2452_v10, 1  ;;  %v2462_v14 = vld [vmem:[%s2429_s30 + $0x40] sm:$0x3]  ;;  %v2465_v15 = vld [vmem:[%s2429_s30 + $0x30] sm:$0xff]  ;;  %v312_v18 = vrot.slane %v2455_v11, 1  ;;  %v316_v29 = vrot.slane %v2485_v24, 1 }
  0x21   : > { %385 = vrot.lane.b32.xlu1 %v2458_v12, %s2339_s4  ;;  %v303_v16 = vsel %vm300_vm0, %v301_v6, %v302_v8  ;;  %v2472_v17 = vsel %vm300_vm0, %v307_v4, %v309_v9  ;;  %v314_v19 = vrot.slane %v2462_v14, 1  ;;  %v311_v21 = vrot.slane %v2465_v15, 1  ;;  %v2479_v22 = vld [vmem:[%s2429_s30 + $0x50] sm:$0xff]  ;;  %v2482_v23 = vld [vmem:[%s2429_s30 + $0x58] sm:$0x3]  ;;  %v2500_v30 = vld [vmem:[%s2429_s30 + $0x68] sm:$0xff] }
  0x22   : > { %381 = vrot.lane.b32.xlu0 %v303_v16, %s2339_s4  ;;  %v305_v20 = vsel %vm300_vm0, %v302_v8, %v304_v13  ;;  %v317_v26 = vrot.slane %v2479_v22, 1  ;;  %v319_v27 = vrot.slane %v2482_v23, 1  ;;  %v2503_v31 = vld [vmem:[%s2429_s30 + $0x70] sm:$0x3]  ;;  %v2506_v32 = vld [vmem:[%s2429_s30 + $0x60] sm:$0xff]  ;;  %v322_v34 = vrot.slane %v2500_v30, 1 }
  0x23   : > { %v2491_v25 = vsel %vm300_vm0, %v312_v18, %v314_v19  ;;  %v2496_v28 = vsel %vm300_vm0, %v311_v21, %v312_v18  ;;  %v324_v35 = vrot.slane %v2503_v31, 1  ;;  %v321_v37 = vrot.slane %v2506_v32, 1  ;;  %v2522_v38 = vld [vmem:[%s2429_s30 + $0x80] sm:$0xff]  ;;  %v2525_v39 = vld [vmem:[%s2429_s30 + $0x88] sm:$0x3]  ;;  %v2528_v40 = vld [vmem:[%s2429_s30 + $0x78] sm:$0xff] }
  0x24   : > { %v2513_v33 = vsel %vm300_vm0, %v317_v26, %v319_v27  ;;  %v2518_v36 = vsel %vm300_vm0, %v316_v29, %v317_v26  ;;  %v327_v42 = vrot.slane %v2522_v38, 1  ;;  %v329_v43 = vrot.slane %v2525_v39, 1  ;;  %v2544_v46 = vld [vmem:[%s2429_s30 + $0x98] sm:$0xff]  ;;  %v2547_v47 = vld [vmem:[%s2429_s30 + $0xa0] sm:$0x3]  ;;  %v2550_v48 = vld [vmem:[%s2429_s30 + $0x90] sm:$0xff] }
  0x25   : > { %387 = vrot.lane.b32.xlu1 %v2472_v17, %s2339_s4  ;;  %4340 = vst [vmem:[#allocation5_spill] sm:$0xff] %v2513_v33  ;;  %4341 = vst [vmem:[#allocation6_spill] sm:$0xff] %v2518_v36  ;;  %v2535_v41 = vsel %vm300_vm0, %v322_v34, %v324_v35  ;;  %v2540_v44 = vsel %vm300_vm0, %v321_v37, %v322_v34  ;;  %v326_v45 = vrot.slane %v2528_v40, 1  ;;  %v332_v50 = vrot.slane %v2544_v46, 1  ;;  %v2566_v54 = vld [vmem:[%s2429_s30 + $0xb0] sm:$0xff]  ;;  %v2572_v56 = vld [vmem:[%s2429_s30 + $0xa8] sm:$0xff] }
  0x26   : > { %383 = vrot.lane.b32.xlu0 %v305_v20, %s2339_s4  ;;  %4342 = vst [vmem:[#allocation7_spill] sm:$0xff] %v2535_v41  ;;  %4343 = vst [vmem:[#allocation8_spill] sm:$0xff] %v2540_v44  ;;  %v2557_v49 = vsel %vm300_vm0, %v327_v42, %v329_v43  ;;  %v334_v51 = vrot.slane %v2547_v47, 1  ;;  %v331_v53 = vrot.slane %v2550_v48, 1  ;;  %v2569_v55 = vld [vmem:[%s2429_s30 + $0xb8] sm:$0x3] }
  0x27   : > { %4344 = vst [vmem:[#allocation9_spill] sm:$0xff] %v2557_v49  ;;  %v2562_v52 = vsel %vm300_vm0, %v326_v45, %v327_v42  ;;  %v337_v58 = vrot.slane %v2566_v54, 1  ;;  %v339_v59 = vrot.slane %v2569_v55, 1  ;;  %v336_v61 = vrot.slane %v2572_v56, 1  ;;  %v2588_v62 = vld [vmem:[%s2429_s30 + $0xc8] sm:$0xff]  ;;  %v2594_v3 = vld [vmem:[%s2429_s30 + $0xc0] sm:$0xff] }
  0x28   : > { %4345 = vst [vmem:[#allocation10_spill] sm:$0xff] %v2562_v52  ;;  %v2579_v57 = vsel %vm300_vm0, %v332_v50, %v334_v51  ;;  %v2584_v60 = vsel %vm300_vm0, %v331_v53, %v332_v50  ;;  %v2591_v63 = vld [vmem:[%s2429_s30 + $0xd0] sm:$0x3]  ;;  %v342_v6 = vrot.slane %v2588_v62, 1  ;;  %v341_v13 = vrot.slane %v2594_v3, 1  ;;  %v2610_v16 = vld [vmem:[%s2429_s30 + $0xe0] sm:$0xff] }
  0x29   : > { %391 = vrot.lane.b32.xlu1 %v2491_v25, %s2339_s4  ;;  %4346 = vst [vmem:[#allocation11_spill] sm:$0xff] %v2579_v57  ;;  %4347 = vst [vmem:[#allocation12_spill] sm:$0xff] %v2584_v60  ;;  %v2601_v4 = vsel %vm300_vm0, %v337_v58, %v339_v59  ;;  %v344_v8 = vrot.slane %v2591_v63, 1  ;;  %v2606_v9 = vsel %vm300_vm0, %v336_v61, %v337_v58  ;;  %v2613_v18 = vld [vmem:[%s2429_s30 + $0xe8] sm:$0x3]  ;;  %v2616_v19 = vld [vmem:[%s2429_s30 + $0xd8] sm:$0xff] }
  0x2a   : > { %389 = vrot.lane.b32.xlu0 %v2496_v28, %s2339_s4  ;;  %4348 = vst [vmem:[#allocation13_spill] sm:$0xff] %v2601_v4  ;;  %4349 = vst [vmem:[#allocation14_spill] sm:$0xff] %v2606_v9  ;;  %v347_v21 = vrot.slane %v2610_v16, 1  ;;  %v349_v26 = vrot.slane %v2613_v18, 1  ;;  %v2628_v27 = vsel %vm300_vm0, %v341_v13, %v342_v6  ;;  %v346_v29 = vrot.slane %v2616_v19, 1  ;;  %v2632_v34 = vld [vmem:[%s2429_s30 + $0xf8] sm:$0xff] }
  0x2b   : > { %v2623_v20 = vsel %vm300_vm0, %v342_v6, %v344_v8  ;;  %4351 = vst [vmem:[#allocation16_spill] sm:$0xff] %v2628_v27  ;;  %v2635_v35 = vld [vmem:[%s2429_s30 + $0x100] sm:$0x3]  ;;  %v2638_v37 = vld [vmem:[%s2429_s30 + $0xf0] sm:$0xff]  ;;  %v352_v43 = vrot.slane %v2632_v34, 1  ;;  %v2660_v59 = vld [vmem:[%s2429_s30 + $0x108] sm:$0xff] }
  0x2c   : > { %4350 = vst [vmem:[#allocation15_spill] sm:$0xff] %v2623_v20  ;;  %v2645_v42 = vsel %vm300_vm0, %v347_v21, %v349_v26  ;;  %v354_v45 = vrot.slane %v2635_v35, 1  ;;  %v2650_v50 = vsel %vm300_vm0, %v346_v29, %v347_v21  ;;  %v351_v51 = vrot.slane %v2638_v37, 1  ;;  %v2654_v53 = vld [vmem:[%s2429_s30 + $0x110] sm:$0xff]  ;;  %v2657_v58 = vld [vmem:[%s2429_s30 + $0x118] sm:$0x3] }
  0x2d   : > { %395 = vrot.lane.b32.xlu1 %v2513_v33, %s2339_s4  ;;  %4352 = vst [vmem:[#allocation17_spill] sm:$0xff] %v2645_v42  ;;  %v357_v6 = vrot.slane %v2654_v53, 1  ;;  %v359_v8 = vrot.slane %v2657_v58, 1  ;;  %v356_v21 = vrot.slane %v2660_v59, 1  ;;  %v2676_v26 = vld [vmem:[%s2429_s30 + $0x128] sm:$0xff]  ;;  %v2726_v33 = vld [vmem:[%s2429_s30 + $0x150] sm:$0xff] }
  0x2e   : > { %393 = vrot.lane.b32.xlu0 %v2518_v36, %s2339_s4  ;;  %v2667_v61 = vsel %vm300_vm0, %v352_v43, %v354_v45  ;;  %v2672_v13 = vsel %vm300_vm0, %v351_v51, %v352_v43  ;;  %v2679_v29 = vld [vmem:[%s2429_s30 + $0x130] sm:$0x3]  ;;  %v362_v43 = vrot.slane %v2676_v26, 1  ;;  %s2263_s28 = sshll.u32 %s2347_s27, 4  ;;  %s2264_s28 = int_to_ptr.vmem [resolvable:$false] %s2263_s28 }
  0x2f   : > { %4353 = vst [vmem:[#allocation18_spill] sm:$0xff] %v2667_v61  ;;  %4354 = vst [vmem:[#allocation19_spill] sm:$0xff] %v2672_v13  ;;  %v2689_v45 = vsel %vm300_vm0, %v357_v6, %v359_v8  ;;  %v364_v51 = vrot.slane %v2679_v29, 1  ;;  %s2265_s29 = scalar_lea.vmem %s2264_s28, 8192 }
  0x30   : > { %4355 = vst [vmem:[#allocation20_spill] sm:$0xff] %v2689_v45 }
  0x31   : > { %399 = vrot.lane.b32.xlu1 %v2535_v41, %s2339_s4  ;;  %v2711_v8 = vsel %vm300_vm0, %v362_v43, %v364_v51  ;;  %v2720_v41 = vld [vmem:[%s2429_s30 + $0x158] sm:$0xff] }
  0x32   : > { %397 = vrot.lane.b32.xlu0 %v2540_v44, %s2339_s4  ;;  %4357 = vst [vmem:[#allocation22_spill] sm:$0xff] %v2711_v8  ;;  %v2723_v44 = vld [vmem:[%s2429_s30 + $0x160] sm:$0x3] }
  0x35   : > { %403 = vrot.lane.b32.xlu1 %v2557_v49, %s2339_s4 }
  0x36   : > { %401 = vrot.lane.b32.xlu0 %v2562_v52, %s2339_s4 }
  0x39   : > { %407 = vrot.lane.b32.xlu1 %v2579_v57, %s2339_s4  ;;  %v2701_v57 = vld [vmem:[%s2429_s30 + $0x148] sm:$0x3] }
  0x3a   : > { %405 = vrot.lane.b32.xlu0 %v2584_v60, %s2339_s4  ;;  %v2704_v60 = vld [vmem:[%s2429_s30 + $0x138] sm:$0xff] }
  0x3b   : > { %v366_v52 = vrot.slane %v2704_v60, 1 }
  0x3d   : > { %411 = vrot.lane.b32.xlu1 %v2601_v4, %s2339_s4 }
  0x3e   : > { %409 = vrot.lane.b32.xlu0 %v2606_v9, %s2339_s4  ;;  %v2698_v9 = vld [vmem:[%s2429_s30 + $0x140] sm:$0xff] }
  0x41   : > { %415 = vrot.lane.b32.xlu1 %v2623_v20, %s2339_s4  ;;  %v2682_v20 = vld [vmem:[%s2429_s30 + $0x120] sm:$0xff] }
  0x42   : > { %413 = vrot.lane.b32.xlu0 %v2628_v27, %s2339_s4  ;;  %v2694_v27 = vsel %vm300_vm0, %v356_v21, %v357_v6  ;;  %v361_v4 = vrot.slane %v2682_v20, 1  ;;  %v367_v6 = vrot.slane %v2698_v9, 1  ;;  %v369_v21 = vrot.slane %v2701_v57, 1 }
  0x43   : > { %4356 = vst [vmem:[#allocation21_spill] sm:$0xff] %v2694_v27 }
  0x44   : > { %v2716_v49 = vsel %vm300_vm0, %v361_v4, %v362_v43  ;;  %v2733_v51 = vsel %vm300_vm0, %v367_v6, %v369_v21  ;;  %v372_v4 = vrot.slane %v2720_v41, 1  ;;  %v374_v43 = vrot.slane %v2723_v44, 1 }
  0x45   : > { %419 = vrot.lane.b32.xlu1 %v2645_v42, %s2339_s4  ;;  %4358 = vst [vmem:[#allocation23_spill] sm:$0xff] %v2716_v49  ;;  %4359 = vst [vmem:[#allocation24_spill] sm:$0xff] %v2733_v51 }
  0x46   : > { %417 = vrot.lane.b32.xlu0 %v2650_v50, %s2339_s4  ;;  %v2755_v21 = vsel %vm300_vm0, %v372_v4, %v374_v43  ;;  %v479_v43 = vrot.slane %v2443_v5, 2  ;;  %v486_v5 = vrot.slane %v2447_v7, 2  ;;  %v488_v7 = vrot.slane %v2465_v15, 2 }
  0x47   : > { %4363 = vst [vmem:[#allocation28_spill] sm:$0xff] %v2755_v21 }
  0x49   : > { %423 = vrot.lane.b32.xlu1 %v2667_v61, %s2339_s4  ;;  %v2742_v61 = vld [vmem:[%s2429_s30 + $0x170] sm:$0xff] }
  0x4a   : > { %421 = vrot.lane.b32.xlu0 %v2672_v13, %s2339_s4  ;;  %4361 = vst [vmem:[#allocation26_spill] sm:$0xff] %v2742_v61  ;;  %v2745_v13 = vld [vmem:[%s2429_s30 + $0x178] sm:$0x3] }
  0x4d   : > { %427 = vrot.lane.b32.xlu1 %v2689_v45, %s2339_s4  ;;  %v2738_v45 = vsel %vm300_vm0, %v366_v52, %v367_v6  ;;  %v377_v52 = vrot.slane %v2742_v61, 1  ;;  %v379_v6 = vrot.slane %v2745_v13, 1 }
  0x4e   : > { %425 = vrot.lane.b32.xlu0 %v2694_v27, %s2339_s4  ;;  %4360 = vst [vmem:[#allocation25_spill] sm:$0xff] %v2738_v45  ;;  %v371_v27 = vrot.slane %v2726_v33, 1 }
  0x51   : > { %431 = vrot.lane.b32.xlu1 %v2711_v8, %s2339_s4  ;;  %v2748_v8 = vld [vmem:[%s2429_s30 + $0x168] sm:$0xff] }
  0x52   : > { %429 = vrot.lane.b32.xlu0 %v2716_v49, %s2339_s4  ;;  %4362 = vst [vmem:[#allocation27_spill] sm:$0xff] %v2748_v8  ;;  %v2760_v49 = vsel %vm300_vm0, %v371_v27, %v372_v4  ;;  %v376_v42 = vrot.slane %v2748_v8, 1  ;;  %v478_v27 = vrot.slane %v2438_v2, 2 }
  0x53   : > { %4364 = vst [vmem:[#allocation29_spill] sm:$0xff] %v2760_v49 }
  0x54   : > { %v2773_v36 = vsel %vm300_vm0, %v376_v42, %v377_v52  ;;  %v483_v42 = vrot.slane %v2432_v0, 2 }
  0x55   : > { %435 = vrot.lane.b32.xlu1 %v2733_v51, %s2339_s4  ;;  %v2768_v51 = vsel %vm300_vm0, %v377_v52, %v379_v6  ;;  %4366 = vst [vmem:[#allocation31_spill] sm:$0xff] %v2773_v36  ;;  %v484_v6 = vrot.slane %v2435_v1, 2  ;;  %v489_v52 = vrot.slane %v2455_v11, 2 }
  0x56   : > { %433 = vrot.lane.b32.xlu0 %v2738_v45, %s2339_s4  ;;  %4365 = vst [vmem:[#allocation30_spill] sm:$0xff] %v2768_v51  ;;  %v481_v45 = vrot.slane %v2452_v10, 2  ;;  %v480_v10 = vsel %vm477_vm1, %v478_v27, %v479_v43  ;;  %v494_v27 = vrot.slane %v2479_v22, 2 }
  0x57   : > { %v2788_v2 = vsel %vm477_vm1, %v484_v6, %v486_v5 }
  0x58   : > { %v482_v4 = vsel %vm477_vm1, %v479_v43, %v481_v45  ;;  %v491_v45 = vrot.slane %v2462_v14, 2  ;;  %v2806_v14 = vsel %vm477_vm1, %v488_v7, %v489_v52  ;;  %v504_v7 = vrot.slane %v2522_v38, 2 }
  0x59   : > { %439 = vrot.lane.b32.xlu1 %v2755_v21, %s2339_s4  ;;  %v516_v21 = vrot.slane %v2569_v55, 2 }
  0x5a   : > { %437 = vrot.lane.b32.xlu0 %v2760_v49, %s2339_s4  ;;  %v2801_v43 = vsel %vm477_vm1, %v489_v52, %v491_v45  ;;  %v498_v52 = vrot.slane %v2506_v32, 2  ;;  %v521_v49 = vrot.slane %v2591_v63, 2 }
  0x5b   : > { %4367 = vst [vmem:[#allocation32_spill] sm:$0xff] %v2801_v43 }
  0x5d   : > { %443 = vrot.lane.b32.xlu1 %v2768_v51, %s2339_s4  ;;  %v2793_v51 = vsel %vm477_vm1, %v483_v42, %v484_v6  ;;  %v493_v6 = vrot.slane %v2485_v24, 2  ;;  %v501_v42 = vrot.slane %v2503_v31, 2 }
  0x5e   : > { %441 = vrot.lane.b32.xlu0 %v2773_v36, %s2339_s4  ;;  %v511_v36 = vrot.slane %v2547_v47, 2 }
  0x61   : > { %560 = vrot.lane.b32.xlu1 %v482_v4, %s2340_s5  ;;  %v496_v4 = vrot.slane %v2482_v23, 2  ;;  %v2819_v23 = vsel %vm477_vm1, %v493_v6, %v494_v27 }
  0x62   : > { %558 = vrot.lane.b32.xlu0 %v480_v10, %s2340_s5  ;;  %v499_v10 = vrot.slane %v2500_v30, 2  ;;  %4369 = vst [vmem:[#allocation34_spill] sm:$0xff] %v2819_v23 }
  0x63   : > { %v2814_v5 = vsel %vm477_vm1, %v494_v27, %v496_v4  ;;  %v506_v4 = vrot.slane %v2525_v39, 2  ;;  %v503_v27 = vrot.slane %v2528_v40, 2 }
  0x64   : > { %4368 = vst [vmem:[#allocation33_spill] sm:$0xff] %v2814_v5  ;;  %v2827_v45 = vsel %vm477_vm1, %v499_v10, %v501_v42  ;;  %v2832_v31 = vsel %vm477_vm1, %v498_v52, %v499_v10  ;;  %v509_v42 = vrot.slane %v2544_v46, 2  ;;  %v508_v10 = vrot.slane %v2550_v48, 2 }
  0x65   : > { %564 = vrot.lane.b32.xlu1 %v2788_v2, %s2340_s5  ;;  %4370 = vst [vmem:[#allocation35_spill] sm:$0xff] %v2827_v45  ;;  %4371 = vst [vmem:[#allocation36_spill] sm:$0xff] %v2832_v31  ;;  %v2840_v6 = vsel %vm477_vm1, %v504_v7, %v506_v4  ;;  %v2845_v39 = vsel %vm477_vm1, %v503_v27, %v504_v7  ;;  %v514_v4 = vrot.slane %v2566_v54, 2  ;;  %v513_v7 = vrot.slane %v2572_v56, 2 }
  0x66   : > { %562 = vrot.lane.b32.xlu0 %v2793_v51, %s2340_s5  ;;  %4372 = vst [vmem:[#allocation37_spill] sm:$0xff] %v2840_v6  ;;  %4373 = vst [vmem:[#allocation38_spill] sm:$0xff] %v2845_v39  ;;  %v2853_v52 = vsel %vm477_vm1, %v509_v42, %v511_v36  ;;  %v2858_v47 = vsel %vm477_vm1, %v508_v10, %v509_v42  ;;  %v519_v36 = vrot.slane %v2588_v62, 2  ;;  %v518_v42 = vrot.slane %v2594_v3, 2 }
  0x67   : > { %4374 = vst [vmem:[#allocation39_spill] sm:$0xff] %v2853_v52  ;;  %4375 = vst [vmem:[#allocation40_spill] sm:$0xff] %v2858_v47  ;;  %v2866_v27 = vsel %vm477_vm1, %v514_v4, %v516_v21  ;;  %v2871_v55 = vsel %vm477_vm1, %v513_v7, %v514_v4  ;;  %v524_v21 = vrot.slane %v2610_v16, 2  ;;  %v523_v4 = vrot.slane %v2616_v19, 2 }
  0x68   : > { %4376 = vst [vmem:[#allocation41_spill] sm:$0xff] %v2866_v27  ;;  %4377 = vst [vmem:[#allocation42_spill] sm:$0xff] %v2871_v55  ;;  %v2879_v10 = vsel %vm477_vm1, %v519_v36, %v521_v49  ;;  %v2884_v63 = vsel %vm477_vm1, %v518_v42, %v519_v36  ;;  %v529_v49 = vrot.slane %v2632_v34, 2  ;;  %v528_v36 = vrot.slane %v2638_v37, 2 }
  0x69   : > { %568 = vrot.lane.b32.xlu1 %v2801_v43, %s2340_s5  ;;  %4378 = vst [vmem:[#allocation43_spill] sm:$0xff] %v2879_v10  ;;  %4379 = vst [vmem:[#allocation44_spill] sm:$0xff] %v2884_v63 }
  0x6a   : > { %566 = vrot.lane.b32.xlu0 %v2806_v14, %s2340_s5 }
  0x6d   : > { %572 = vrot.lane.b32.xlu1 %v2814_v5, %s2340_s5 }
  0x6e   : > { %570 = vrot.lane.b32.xlu0 %v2819_v23, %s2340_s5 }
  0x71   : > { %576 = vrot.lane.b32.xlu1 %v2827_v45, %s2340_s5 }
  0x72   : > { %574 = vrot.lane.b32.xlu0 %v2832_v31, %s2340_s5 }
  0x75   : > { %580 = vrot.lane.b32.xlu1 %v2840_v6, %s2340_s5 }
  0x76   : > { %578 = vrot.lane.b32.xlu0 %v2845_v39, %s2340_s5 }
  0x79   : > { %584 = vrot.lane.b32.xlu1 %v2853_v52, %s2340_s5  ;;  %v526_v52 = vrot.slane %v2613_v18, 2  ;;  %v2897_v18 = vsel %vm477_vm1, %v523_v4, %v524_v21 }
  0x7a   : > { %582 = vrot.lane.b32.xlu0 %v2858_v47, %s2340_s5  ;;  %v551_v47 = vrot.slane %v2723_v44, 2  ;;  %v554_v44 = vrot.slane %v2742_v61, 2 }
  0x7b   : > { %v2892_v7 = vsel %vm477_vm1, %v524_v21, %v526_v52  ;;  %v534_v52 = vrot.slane %v2654_v53, 2  ;;  %v533_v21 = vrot.slane %v2660_v59, 2 }
  0x7d   : > { %588 = vrot.lane.b32.xlu1 %v2866_v27, %s2340_s5  ;;  %v531_v27 = vrot.slane %v2635_v35, 2  ;;  %v2910_v35 = vsel %vm477_vm1, %v528_v36, %v529_v49 }
  0x7e   : > { %586 = vrot.lane.b32.xlu0 %v2871_v55, %s2340_s5  ;;  %v546_v55 = vrot.slane %v2701_v57, 2 }
  0x7f   : > { %v2905_v42 = vsel %vm477_vm1, %v529_v49, %v531_v27  ;;  %v539_v27 = vrot.slane %v2676_v26, 2  ;;  %v538_v49 = vrot.slane %v2682_v20, 2 }
  0x80   : > { %4380 = vst [vmem:[#allocation45_spill] sm:$0xff] %v2905_v42 }
  0x81   : > { %592 = vrot.lane.b32.xlu1 %v2879_v10, %s2340_s5  ;;  %v536_v10 = vrot.slane %v2657_v58, 2  ;;  %v2923_v58 = vsel %vm477_vm1, %v533_v21, %v534_v52 }
  0x82   : > { %590 = vrot.lane.b32.xlu0 %v2884_v63, %s2340_s5  ;;  %v541_v63 = vrot.slane %v2679_v29, 2  ;;  %4382 = vst [vmem:[#allocation47_spill] sm:$0xff] %v2923_v58  ;;  %v2936_v29 = vsel %vm477_vm1, %v538_v49, %v539_v27 }
  0x83   : > { %v2918_v4 = vsel %vm477_vm1, %v534_v52, %v536_v10  ;;  %v544_v10 = vrot.slane %v2698_v9, 2  ;;  %4384 = vst [vmem:[#allocation49_spill] sm:$0xff] %v2936_v29  ;;  %v543_v52 = vrot.slane %v2704_v60, 2 }
  0x84   : > { %4381 = vst [vmem:[#allocation46_spill] sm:$0xff] %v2918_v4  ;;  %v2931_v36 = vsel %vm477_vm1, %v539_v27, %v541_v63  ;;  %v549_v63 = vrot.slane %v2720_v41, 2  ;;  %v548_v27 = vrot.slane %v2726_v33, 2 }
  0x85   : > { %596 = vrot.lane.b32.xlu1 %v2892_v7, %s2340_s5  ;;  %4383 = vst [vmem:[#allocation48_spill] sm:$0xff] %v2931_v36  ;;  %v2944_v21 = vsel %vm477_vm1, %v544_v10, %v546_v55  ;;  %v2951_v57 = vsel %vm477_vm1, %v543_v52, %v544_v10  ;;  %v553_v52 = vrot.slane %v2748_v8, 2 }
  0x86   : > { %594 = vrot.lane.b32.xlu0 %v2897_v18, %s2340_s5  ;;  %4385 = vst [vmem:[#allocation50_spill] sm:$0xff] %v2944_v21  ;;  %4387 = vst [vmem:[#allocation52_spill] sm:$0xff] %v2951_v57  ;;  %v2961_v55 = vsel %vm477_vm1, %v549_v63, %v551_v47  ;;  %v2968_v10 = vsel %vm477_vm1, %v548_v27, %v549_v63 }
  0x87   : > { %4389 = vst [vmem:[#allocation54_spill] sm:$0xff] %v2961_v55  ;;  %4391 = vst [vmem:[#allocation56_spill] sm:$0xff] %v2968_v10 }
  0x89   : > { %600 = vrot.lane.b32.xlu1 %v2905_v42, %s2340_s5 }
  0x8a   : > { %598 = vrot.lane.b32.xlu0 %v2910_v35, %s2340_s5 }
  0x8d   : > { %604 = vrot.lane.b32.xlu1 %v2918_v4, %s2340_s5 }
  0x8e   : > { %602 = vrot.lane.b32.xlu0 %v2923_v58, %s2340_s5 }
  0x91   : > { %608 = vrot.lane.b32.xlu1 %v2931_v36, %s2340_s5 }
  0x92   : > { %606 = vrot.lane.b32.xlu0 %v2936_v29, %s2340_s5 }
  0x93   : > { %v2948_v6 = vpop.permute.xlu1 %385 }
  0x94   : > { %4386 = vst [vmem:[#allocation51_spill] sm:$0xff] %v2948_v6  ;;  %v2954_v49 = vpop.permute.xlu0 %381  ;;  %v556_v6 = vrot.slane %v2745_v13, 2  ;;  %v2983_v13 = vsel %vm477_vm1, %v553_v52, %v554_v44 }
  0x95   : > { %4388 = vst [vmem:[#allocation53_spill] sm:$0xff] %v2954_v49  ;;  %612 = vrot.lane.b32.xlu1 %v2944_v21, %s2340_s5  ;;  %4394 = vst [vmem:[#allocation59_spill] sm:$0xff] %v2983_v13 }
  0x96   : > { %610 = vrot.lane.b32.xlu0 %v2951_v57, %s2340_s5  ;;  %v2978_v47 = vsel %vm477_vm1, %v554_v44, %v556_v6 }
  0x97   : > { %v2965_v39 = vpop.permute.xlu1 %387  ;;  %4393 = vst [vmem:[#allocation58_spill] sm:$0xff] %v2978_v47 }
  0x98   : > { %4390 = vst [vmem:[#allocation55_spill] sm:$0xff] %v2965_v39  ;;  %v2971_v49 = vpop.permute.xlu0 %383 }
  0x99   : > { %4392 = vst [vmem:[#allocation57_spill] sm:$0xff] %v2971_v49  ;;  %616 = vrot.lane.b32.xlu1 %v2961_v55, %s2340_s5 }
  0x9a   : > { %614 = vrot.lane.b32.xlu0 %v2968_v10, %s2340_s5 }
  0x9b   : > { %v2980_v21 = vpop.permute.xlu1 %391 }
  0x9c   : > { %v2985_v63 = vpop.permute.xlu0 %389 }
  0x9d   : > { %620 = vrot.lane.b32.xlu1 %v2978_v47, %s2340_s5 }
  0x9e   : > { %618 = vrot.lane.b32.xlu0 %v2983_v13, %s2340_s5 }
  0x9f   : > { %v2991_v27 = vpop.permute.xlu1 %395 }
  0xa0   : > { %v2993_v55 = vpop.permute.xlu0 %393 }
  0xa1   : > { %658 = vrot.lane.b32.xlu1 %v2435_v1, %s2341_s6 }
  0xa2   : > { %656 = vrot.lane.b32.xlu0 %v2432_v0, %s2341_s6 }
  0xa3   : > { %v2999_v6 = vpop.permute.xlu1 %399 }
  0xa4   : > { %v3001_v44 = vpop.permute.xlu0 %397 }
  0xa5   : > { %662 = vrot.lane.b32.xlu1 %v2455_v11, %s2341_s6 }
  0xa6   : > { %660 = vrot.lane.b32.xlu0 %v2465_v15, %s2341_s6 }
  0xa7   : > { %v3007_v52 = vpop.permute.xlu1 %403 }
  0xa8   : > { %v3009_v47 = vpop.permute.xlu0 %401 }
  0xa9   : > { %666 = vrot.lane.b32.xlu1 %v2479_v22, %s2341_s6 }
  0xaa   : > { %664 = vrot.lane.b32.xlu0 %v2485_v24, %s2341_s6 }
  0xab   : > { %v3015_v0 = vpop.permute.xlu1 %407 }
  0xac   : > { %v3017_v1 = vpop.permute.xlu0 %405 }
  0xad   : > { %670 = vrot.lane.b32.xlu1 %v2500_v30, %s2341_s6 }
  0xae   : > { %668 = vrot.lane.b32.xlu0 %v2506_v32, %s2341_s6 }
  0xaf   : > { %v3023_v13 = vpop.permute.xlu1 %411 }
  0xb0   : > { %v3025_v39 = vpop.permute.xlu0 %409 }
  0xb1   : > { %674 = vrot.lane.b32.xlu1 %v2522_v38, %s2341_s6 }
  0xb2   : > { %672 = vrot.lane.b32.xlu0 %v2528_v40, %s2341_s6 }
  0xb3   : > { %v3031_v10 = vpop.permute.xlu1 %415 }
  0xb4   : > { %4395 = vst [vmem:[#allocation60_spill] sm:$0xff] %v3031_v10  ;;  %v3033_v57 = vpop.permute.xlu0 %413 }
  0xb5   : > { %4396 = vst [vmem:[#allocation61_spill] sm:$0xff] %v3033_v57  ;;  %678 = vrot.lane.b32.xlu1 %v2544_v46, %s2341_s6 }
  0xb6   : > { %676 = vrot.lane.b32.xlu0 %v2550_v48, %s2341_s6 }
  0xb7   : > { %v3039_v49 = vpop.permute.xlu1 %419 }
  0xb8   : > { %4397 = vst [vmem:[#allocation62_spill] sm:$0xff] %v3039_v49  ;;  %v3041_v45 = vpop.permute.xlu0 %417 }
  0xb9   : > { %4398 = vst [vmem:[#allocation63_spill] sm:$0xff] %v3041_v45  ;;  %682 = vrot.lane.b32.xlu1 %v2566_v54, %s2341_s6 }
  0xba   : > { %680 = vrot.lane.b32.xlu0 %v2572_v56, %s2341_s6 }
  0xbb   : > { %v3047_v36 = vpop.permute.xlu1 %423 }
  0xbc   : > { %v3049_v10 = vpop.permute.xlu0 %421 }
  0xbd   : > { %686 = vrot.lane.b32.xlu1 %v2588_v62, %s2341_s6 }
  0xbe   : > { %684 = vrot.lane.b32.xlu0 %v2594_v3, %s2341_s6 }
  0xbf   : > { %v3055_v57 = vpop.permute.xlu1 %427 }
  0xc0   : > { %v3057_v49 = vpop.permute.xlu0 %425 }
  0xc1   : > { %690 = vrot.lane.b32.xlu1 %v2610_v16, %s2341_s6 }
  0xc2   : > { %688 = vrot.lane.b32.xlu0 %v2616_v19, %s2341_s6 }
  0xc3   : > { %v3063_v45 = vpop.permute.xlu1 %431 }
  0xc4   : > { %v3065_v31 = vpop.permute.xlu0 %429 }
  0xc5   : > { %694 = vrot.lane.b32.xlu1 %v2632_v34, %s2341_s6 }
  0xc6   : > { %692 = vrot.lane.b32.xlu0 %v2638_v37, %s2341_s6 }
  0xc7   : > { %v3071_v62 = vpop.permute.xlu1 %435 }
  0xc8   : > { %v3073_v3 = vpop.permute.xlu0 %433 }
  0xc9   : > { %698 = vrot.lane.b32.xlu1 %v2654_v53, %s2341_s6 }
  0xca   : > { %696 = vrot.lane.b32.xlu0 %v2660_v59, %s2341_s6 }
  0xcb   : > { %v3079_v16 = vpop.permute.xlu1 %439 }
  0xcc   : > { %v3081_v19 = vpop.permute.xlu0 %437 }
  0xcd   : > { %702 = vrot.lane.b32.xlu1 %v2676_v26, %s2341_s6 }
  0xce   : > { %700 = vrot.lane.b32.xlu0 %v2682_v20, %s2341_s6 }
  0xcf   : > { %v3087_v29 = vpop.permute.xlu1 %443 }
  0xd0   : > { %4399 = vst [vmem:[#allocation64_spill] sm:$0xff] %v3087_v29  ;;  %v3089_v5 = vpop.permute.xlu0 %441 }
  0xd1   : > { %4400 = vst [vmem:[#allocation65_spill] sm:$0xff] %v3089_v5  ;;  %706 = vrot.lane.b32.xlu1 %v2698_v9, %s2341_s6  ;;  %v3118_v5 = vld [vmem:[%s2429_s30 + $0x180] sm:$0xff] }
  0xd2   : > { %704 = vrot.lane.b32.xlu0 %v2704_v60, %s2341_s6 }
  0xd3   : > { %v3095_v4 = vpop.permute.xlu1 %560 }
  0xd4   : > { %4401 = vst [vmem:[#allocation66_spill] sm:$0xff] %v3095_v4  ;;  %v3097_v23 = vpop.permute.xlu0 %558  ;;  %v3112_v4 = vld [vmem:[%s2429_s30 + $0x188] sm:$0xff] }
  0xd5   : > { %4402 = vst [vmem:[#allocation67_spill] sm:$0xff] %v3097_v23  ;;  %710 = vrot.lane.b32.xlu1 %v2720_v41, %s2341_s6  ;;  %v1262_v23 = vsel %vm1256_vm2, %v2455_v11, %v2980_v21  ;;  %v1264_v21 = vsel %vm1256_vm2, %v2479_v22, %v2991_v27 }
  0xd6   : > { %708 = vrot.lane.b32.xlu0 %v2726_v33, %s2341_s6 }
  0xd7   : > { %v3103_v58 = vpop.permute.xlu1 %564 }
  0xd8   : > { %4403 = vst [vmem:[#allocation68_spill] sm:$0xff] %v3103_v58  ;;  %v3105_v42 = vpop.permute.xlu0 %562  ;;  %v1261_v58 = vsel %vm1256_vm2, %v2465_v15, %v2985_v63  ;;  %v1266_v63 = vsel %vm1256_vm2, %v2500_v30, %v2999_v6  ;;  %v1267_v6 = vsel %vm1256_vm2, %v2528_v40, %v3009_v47  ;;  %v1269_v40 = vsel %vm1256_vm2, %v2550_v48, %v3017_v1 }
  0xd9   : > { %4404 = vst [vmem:[#allocation69_spill] sm:$0xff] %v3105_v42  ;;  %714 = vrot.lane.b32.xlu1 %v2742_v61, %s2341_s6  ;;  %v1271_v48 = vsel %vm1256_vm2, %v2572_v56, %v3025_v39 }
  0xda   : > { %712 = vrot.lane.b32.xlu0 %v2748_v8, %s2341_s6 }
  0xdb   : > { %v569_v43 = vpop.permute.xlu1 %568 }
  0xdc   : > { %v3124_v42 = vsel %vm1289_vm3, %v1262_v23, %v569_v43  ;;  %v567_v61 = vpop.permute.xlu0 %566  ;;  %v1263_v43 = vsel %vm1256_vm2, %v2485_v24, %v2993_v55 }
  0xdd   : > { %v3127_v8 = vsel %vm1289_vm3, %v1261_v58, %v567_v61  ;;  %718 = vrot.lane.b32.xlu1 %v3112_v4, %s2341_s6 }
  0xde   : > { %716 = vrot.lane.b32.xlu0 %v3118_v5, %s2341_s6  ;;  %s2346_s6 = smov 32  }
  0xdf   : > { %v573_v29 = vpop.permute.xlu1 %572 }
  0xe0   : > { %v3140_v23 = vsel %vm1289_vm3, %v1264_v21, %v573_v29  ;;  %v571_v61 = vpop.permute.xlu0 %570  ;;  %v1265_v29 = vsel %vm1256_vm2, %v2506_v32, %v3001_v44 }
  0xe1   : > { %v3143_v58 = vsel %vm1289_vm3, %v1263_v43, %v571_v61  ;;  %760 = vrot.lane.b32.xlu1 %v2472_v17, %s2342_s7 }
  0xe2   : > { %758 = vrot.lane.b32.xlu0 %v2458_v12, %s2342_s7  ;;  %v1268_v12 = vsel %vm1256_vm2, %v2522_v38, %v3007_v52  ;;  %v1270_v38 = vsel %vm1256_vm2, %v2544_v46, %v3015_v0  ;;  %v1272_v46 = vsel %vm1256_vm2, %v2566_v54, %v3023_v13  ;;  %v1521_v13 = vld [vmem:[%s4235_s1 + $0x8] sm:$0xff] }
  0xe3   : > { %v577_v27 = vpop.permute.xlu1 %576 }
  0xe4   : > { %v3156_v55 = vsel %vm1289_vm3, %v1266_v63, %v577_v27  ;;  %v575_v21 = vpop.permute.xlu0 %574  ;;  %v4405_v27 = vld [vmem:[#allocation6_spill] sm:$0xff] }
  0xe5   : > { %v3159_v43 = vsel %vm1289_vm3, %v1265_v29, %v575_v21  ;;  %764 = vrot.lane.b32.xlu1 %v2491_v25, %s2342_s7 }
  0xe6   : > { %762 = vrot.lane.b32.xlu0 %v2496_v28, %s2342_s7 }
  0xe7   : > { %v581_v17 = vpop.permute.xlu1 %580 }
  0xe8   : > { %v3172_v44 = vsel %vm1289_vm3, %v1268_v12, %v581_v17  ;;  %v579_v61 = vpop.permute.xlu0 %578  ;;  %v4406_v12 = vld [vmem:[#allocation17_spill] sm:$0xff] }
  0xe9   : > { %v3175_v63 = vsel %vm1289_vm3, %v1267_v6, %v579_v61  ;;  %790 = vrot.lane.b32.xlu1 %v2650_v50, %s2342_s7  ;;  %v1278_v61 = vsel %vm1256_vm2, %v2632_v34, %v3047_v36  ;;  %v1522_v36 = vld [vmem:[%s4235_s1 + $0x10] sm:$0xff] }
  0xea   : > { %766 = vrot.lane.b32.xlu0 %v4405_v27, %s2342_s7 }
  0xeb   : > { %v585_v52 = vpop.permute.xlu1 %584 }
  0xec   : > { %v3188_v47 = vsel %vm1289_vm3, %v1270_v38, %v585_v52  ;;  %v583_v29 = vpop.permute.xlu0 %582 }
  0xed   : > { %v3191_v21 = vsel %vm1289_vm3, %v1269_v40, %v583_v29  ;;  %859 = vrot.lane.b32.xlu1 %v2793_v51, %s2343_s8 }
  0xee   : > { %792 = vrot.lane.b32.xlu0 %v4406_v12, %s2342_s7 }
  0xef   : > { %v589_v0 = vpop.permute.xlu1 %588 }
  0xf0   : > { %v3204_v1 = vsel %vm1289_vm3, %v1272_v46, %v589_v0  ;;  %v587_v17 = vpop.permute.xlu0 %586  ;;  %v1280_v46 = vsel %vm1256_vm2, %v2654_v53, %v3055_v57  ;;  %v1524_v57 = vld [vmem:[%s4235_s1 + $0x20] sm:$0xf] }
  0xf1   : > { %v3207_v6 = vsel %vm1289_vm3, %v1271_v48, %v587_v17  ;;  %861 = vrot.lane.b32.xlu1 %v2788_v2, %s2343_s8  ;;  %v1520_v2 = vld [vmem:[%s4235_s1] sm:$0xff] }
  0xf2   : > { %891 = vrot.lane.b32.xlu0 %v2897_v18, %s2343_s8 }
  0xf3   : > { %v3213_v51 = vpop.permute.xlu1 %592 }
  0xf4   : > { %v3215_v54 = vpop.permute.xlu0 %590 }
  0xf5   : > { %957 = vrot.lane.b32.xlu1 %v2465_v15, %s2344_s9  ;;  %v2162_v15 = vpack.c.bf16 %v1521_v13, %v1520_v2 }
  0xf6   : > { %893 = vrot.lane.b32.xlu0 %v2892_v7, %s2343_s8 }
  0xf7   : > { %v3221_v56 = vpop.permute.xlu1 %596  ;;  %2163 = vmatprep.subr.bf16.mxu0 %v2162_v15  ;;  %2170 = vmatprep.subr.bf16.mxu1 %v2162_v15 }
  0xf8   : > { %v3223_v39 = vpop.permute.xlu0 %594  ;;  %2165 = vmatpush3.bf16.msra.mxu0 %v2162_v15  ;;  %2173 = vmatpush3.bf16.msra.mxu1 %v2162_v15  ;;  %v1281_v15 = vsel %vm1256_vm2, %v2682_v20, %v3065_v31 }
  0xf9   : > { %959 = vrot.lane.b32.xlu1 %v2455_v11, %s2344_s9  ;;  %v1277_v11 = vsel %vm1256_vm2, %v2638_v37, %v3049_v10 }
  0xfa   : > { %989 = vrot.lane.b32.xlu0 %v2638_v37, %s2344_s9  ;;  %v1523_v37 = vld [vmem:[%s4235_s1 + $0x18] sm:$0xff] }
  0xfb   : > { %v601_v38 = vpop.permute.xlu1 %600  ;;  %v2166_v10 = vpack.c.bf16 %v1523_v37, %v1522_v36  ;;  %v1283_v36 = vsel %vm1256_vm2, %v2704_v60, %v3073_v3  ;;  %v1285_v3 = vsel %vm1256_vm2, %v2726_v33, %v3081_v19  ;;  %v4412_v33 = vld [vmem:[#allocation27_spill] sm:$0xff] }
  0xfc   : > { %v3242_v52 = vsel %vm1289_vm3, %v1278_v61, %v601_v38  ;;  %v599_v40 = vpop.permute.xlu0 %598 }
  0xfd   : > { %v3245_v29 = vsel %vm1289_vm3, %v1277_v11, %v599_v40  ;;  %1059 = vrot.lane.b32.xlu1 %v2496_v28, %s2345_s21  ;;  %v1279_v28 = vsel %vm1256_vm2, %v2660_v59, %v3057_v49  ;;  %2167 = vmatprep.subr.bf16.mxu0 %v2166_v10  ;;  %v1282_v49 = vsel %vm1256_vm2, %v2676_v26, %v3063_v45  ;;  %v4408_v40 = vld [vmem:[#allocation18_spill] sm:$0xff] }
  0xfe   : > { %991 = vrot.lane.b32.xlu0 %v2632_v34, %s2344_s9  ;;  %2171 = vmatprep.subr.bf16.mxu1 %v2166_v10  ;;  %v4407_v34 = vld [vmem:[#allocation19_spill] sm:$0xff]  ;;  %v1284_v45 = vsel %vm1256_vm2, %v2698_v9, %v3071_v62 }
  0xff   : > { %v605_v0 = vpop.permute.xlu1 %604  ;;  %2169 = vmatpush3.bf16.msra.mxu0 %v2166_v10  ;;  %2174 = vmatpush3.bf16.msra.mxu1 %v2166_v10 }
 0x100   : > { %v3264_v48 = vsel %vm1289_vm3, %v1280_v46, %v605_v0  ;;  %v603_v17 = vpop.permute.xlu0 %602  ;;  %2112 = vmatprep.subr.msk.mxu0 %vm1629_vm4, %v1524_v57  ;;  %2172 = vmatprep.subr.msk.mxu1 %vm1629_vm4, %v1524_v57 }
 0x101   : > { %v3267_v2 = vsel %vm1289_vm3, %v1279_v28, %v603_v17  ;;  %794 = vrot.lane.b32.xlu1 %v4407_v34, %s2342_s7 }
 0x102   : > { %1091 = vrot.lane.b32.xlu0 %v4407_v34, %s2345_s21  ;;  %v4409_v34 = vld [vmem:[#allocation64_spill] sm:$0xff] }
 0x103   : > { %v609_v13 = vpop.permute.xlu1 %608  ;;  %2113 = vmatpush3.msk.msra.mxu0 %vm1629_vm4, %v1524_v57  ;;  %2175 = vmatpush3.msk.msra.mxu1 %vm1629_vm4, %v1524_v57 }
 0x104   : > { %v3283_v61 = vsel %vm1289_vm3, %v1282_v49, %v609_v13  ;;  %v607_v38 = vpop.permute.xlu0 %606  ;;  %v4411_v49 = vld [vmem:[#allocation65_spill] sm:$0xff] }
 0x105   : > { %v3286_v11 = vsel %vm1289_vm3, %v1281_v15, %v607_v38  ;;  %1093 = vrot.lane.b32.xlu1 %v4408_v40, %s2345_s21  ;;  %v1287_v19 = vsel %vm1256_vm2, %v4412_v33, %v4411_v49 }
 0x106   : > { %1061 = vrot.lane.b32.xlu0 %v2491_v25, %s2345_s21  ;;  %v1286_v25 = vsel %vm1256_vm2, %v2720_v41, %v3079_v16  ;;  %v4410_v41 = vld [vmem:[#allocation26_spill] sm:$0xff] }
 0x107   : > { %v613_v31 = vpop.permute.xlu1 %612  ;;  %v1288_v16 = vsel %vm1256_vm2, %v4410_v41, %v4409_v34  ;;  %v4415_v41 = vld [vmem:[#allocation21_spill] sm:$0xff] }
 0x108   : > { %v3299_v37 = vsel %vm1289_vm3, %v1284_v45, %v613_v31  ;;  %v611_v10 = vpop.permute.xlu0 %610  ;;  %v4414_v31 = vld [vmem:[#allocation45_spill] sm:$0xff] }
 0x109   : > { %v3302_v46 = vsel %vm1289_vm3, %v1283_v36, %v611_v10  ;;  %1192 = vrot.lane.b32.xlu1 %v2910_v35, %s2346_s6 }
 0x10a   : > { %1160 = vrot.lane.b32.xlu0 %v2806_v14, %s2346_s6 }
 0x10b   : > { %v617_v62 = vpop.permute.xlu1 %616 }
 0x10c   : > { %v3315_v0 = vsel %vm1289_vm3, %v1286_v25, %v617_v62  ;;  %v615_v28 = vpop.permute.xlu0 %614 }
 0x10d   : > { %v3318_v17 = vsel %vm1289_vm3, %v1285_v3, %v615_v28  ;;  %863 = vrot.lane.b32.xlu1 %v2806_v14, %s2343_s8  ;;  %v4413_v14 = vld [vmem:[#allocation32_spill] sm:$0xff] }
 0x10e   : > { %796 = vrot.lane.b32.xlu0 %v4408_v40, %s2342_s7 }
 0x10f   : > { %v621_v57 = vpop.permute.xlu1 %620 }
 0x110   : > { %v3331_v13 = vsel %vm1289_vm3, %v1288_v16, %v621_v57  ;;  %v619_v15 = vpop.permute.xlu0 %618  ;;  %v4416_v16 = vld [vmem:[#allocation20_spill] sm:$0xff] }
 0x111   : > { %v3334_v38 = vsel %vm1289_vm3, %v1287_v19, %v619_v15  ;;  %1162 = vrot.lane.b32.xlu1 %v4413_v14, %s2346_s6  ;;  %v4420_v19 = vld [vmem:[#allocation47_spill] sm:$0xff] }
 0x112   : > { %895 = vrot.lane.b32.xlu0 %v2910_v35, %s2343_s8 }
 0x113   : > { %v3340_v40 = vpop.permute.xlu1 %658 }
 0x114   : > { %v3342_v45 = vpop.permute.xlu0 %656 }
 0x115   : > { %865 = vrot.lane.b32.xlu1 %v4413_v14, %s2343_s8 }
 0x116   : > { %1194 = vrot.lane.b32.xlu0 %v4414_v31, %s2346_s6 }
 0x117   : > { %v3348_v36 = vpop.permute.xlu1 %662 }
 0x118   : > { %v3350_v10 = vpop.permute.xlu0 %660 }
 0x119   : > { %961 = vrot.lane.b32.xlu1 %v2485_v24, %s2344_s9 }
 0x11a   : > { %897 = vrot.lane.b32.xlu0 %v4414_v31, %s2343_s8 }
 0x11b   : > { %v667_v35 = vpop.permute.xlu1 %666 }
 0x11c   : > { %v3358_v25 = vsel %vm1322_vm5, %v3124_v42, %v667_v35  ;;  %v665_v62 = vpop.permute.xlu0 %664 }
 0x11d   : > { %v3362_v3 = vsel %vm1322_vm5, %v3127_v8, %v665_v62  ;;  %963 = vrot.lane.b32.xlu1 %v2479_v22, %s2344_s9  ;;  %v4424_v62 = vld [vmem:[#allocation46_spill] sm:$0xff] }
 0x11e   : > { %993 = vrot.lane.b32.xlu0 %v2660_v59, %s2344_s9 }
 0x11f   : > { %v671_v24 = vpop.permute.xlu1 %670 }
 0x120   : > { %v3370_v28 = vsel %vm1322_vm5, %v3140_v23, %v671_v24  ;;  %v669_v34 = vpop.permute.xlu0 %668  ;;  %v4425_v24 = vld [vmem:[#allocation33_spill] sm:$0xff] }
 0x121   : > { %v3374_v42 = vsel %vm1322_vm5, %v3143_v58, %v669_v34  ;;  %1063 = vrot.lane.b32.xlu1 %v4405_v27, %s2345_s21 }
 0x122   : > { %995 = vrot.lane.b32.xlu0 %v2654_v53, %s2344_s9 }
 0x123   : > { %v675_v22 = vpop.permute.xlu1 %674 }
 0x124   : > { %v3382_v59 = vsel %vm1322_vm5, %v3156_v55, %v675_v22  ;;  %v673_v8 = vpop.permute.xlu0 %672 }
 0x125   : > { %v3386_v23 = vsel %vm1322_vm5, %v3159_v43, %v673_v8  ;;  %798 = vrot.lane.b32.xlu1 %v4415_v41, %s2342_s7  ;;  %v4417_v43 = vld [vmem:[#allocation5_spill] sm:$0xff] }
 0x126   : > { %1095 = vrot.lane.b32.xlu0 %v4415_v41, %s2345_s21 }
 0x127   : > { %v679_v58 = vpop.permute.xlu1 %678 }
 0x128   : > { %v3394_v53 = vsel %vm1322_vm5, %v3172_v44, %v679_v58  ;;  %v677_v27 = vpop.permute.xlu0 %676 }
 0x129   : > { %v3398_v55 = vsel %vm1322_vm5, %v3175_v63, %v677_v27  ;;  %1097 = vrot.lane.b32.xlu1 %v4416_v16, %s2345_s21  ;;  %v4421_v63 = vld [vmem:[#allocation34_spill] sm:$0xff] }
 0x12a   : > { %1065 = vrot.lane.b32.xlu0 %v4417_v43, %s2345_s21 }
 0x12b   : > { %v683_v57 = vpop.permute.xlu1 %682 }
 0x12c   : > { %v3406_v49 = vsel %vm1322_vm5, %v3188_v47, %v683_v57  ;;  %v681_v33 = vpop.permute.xlu0 %680 }
 0x12d   : > { %4418 = vst [vmem:[#allocation6_spill] sm:$0xff] %v3406_v49  ;;  %v3410_v44 = vsel %vm1322_vm5, %v3191_v21, %v681_v33  ;;  %1196 = vrot.lane.b32.xlu1 %v4420_v19, %s2346_s6  ;;  %v4426_v33 = vld [vmem:[#allocation23_spill] sm:$0xff] }
 0x12e   : > { %4419 = vst [vmem:[#allocation17_spill] sm:$0xff] %v3410_v44  ;;  %1164 = vrot.lane.b32.xlu0 %v4421_v63, %s2346_s6 }
 0x12f   : > { %v687_v15 = vpop.permute.xlu1 %686 }
 0x130   : > { %v3418_v14 = vsel %vm1322_vm5, %v3204_v1, %v687_v15  ;;  %v685_v31 = vpop.permute.xlu0 %684 }
 0x131   : > { %4422 = vst [vmem:[#allocation19_spill] sm:$0xff] %v3418_v14  ;;  %v3422_v47 = vsel %vm1322_vm5, %v3207_v6, %v685_v31  ;;  %800 = vrot.lane.b32.xlu1 %v4416_v16, %s2342_s7  ;;  %v4432_v31 = vld [vmem:[#allocation22_spill] sm:$0xff]  ;;  %v3567_v14 = vld [vmem:[%s2429_s30 + $0xc0] sm:$0xff] }
 0x132   : > { %4423 = vst [vmem:[#allocation18_spill] sm:$0xff] %v3422_v47  ;;  %768 = vrot.lane.b32.xlu0 %v4417_v43, %s2342_s7  ;;  %v4441_v47 = vld [vmem:[#allocation53_spill] sm:$0xff] }
 0x133   : > { %v3428_v21 = vpop.permute.xlu1 %690 }
 0x134   : > { %v3430_v35 = vpop.permute.xlu0 %688 }
 0x135   : > { %899 = vrot.lane.b32.xlu1 %v4420_v19, %s2343_s8 }
 0x136   : > { %867 = vrot.lane.b32.xlu0 %v4421_v63, %s2343_s8 }
 0x137   : > { %v3436_v1 = vpop.permute.xlu1 %694 }
 0x138   : > { %v3438_v6 = vpop.permute.xlu0 %692 }
 0x139   : > { %1198 = vrot.lane.b32.xlu1 %v4424_v62, %s2346_s6 }
 0x13a   : > { %1166 = vrot.lane.b32.xlu0 %v4425_v24, %s2346_s6 }
 0x13b   : > { %v699_v34 = vpop.permute.xlu1 %698 }
 0x13c   : > { %v3446_v22 = vsel %vm1322_vm5, %v3242_v52, %v699_v34  ;;  %v697_v8 = vpop.permute.xlu0 %696  ;;  %v4434_v34 = vld [vmem:[#allocation49_spill] sm:$0xff] }
 0x13d   : > { %v3450_v41 = vsel %vm1322_vm5, %v3245_v29, %v697_v8  ;;  %901 = vrot.lane.b32.xlu1 %v4424_v62, %s2343_s8 }
 0x13e   : > { %869 = vrot.lane.b32.xlu0 %v4425_v24, %s2343_s8 }
 0x13f   : > { %v703_v58 = vpop.permute.xlu1 %702 }
 0x140   : > { %v3458_v27 = vsel %vm1322_vm5, %v3264_v48, %v703_v58  ;;  %v701_v16 = vpop.permute.xlu0 %700 }
 0x141   : > { %v3462_v52 = vsel %vm1322_vm5, %v3267_v2, %v701_v16  ;;  %997 = vrot.lane.b32.xlu1 %v2682_v20, %s2344_s9 }
 0x142   : > { %965 = vrot.lane.b32.xlu0 %v2506_v32, %s2344_s9 }
 0x143   : > { %v707_v29 = vpop.permute.xlu1 %706 }
 0x144   : > { %v3470_v43 = vsel %vm1322_vm5, %v3283_v61, %v707_v29  ;;  %v705_v57 = vpop.permute.xlu0 %704 }
 0x145   : > { %v3474_v48 = vsel %vm1322_vm5, %v3286_v11, %v705_v57  ;;  %999 = vrot.lane.b32.xlu1 %v2676_v26, %s2344_s9  ;;  %v4427_v11 = vld [vmem:[#allocation8_spill] sm:$0xff] }
 0x146   : > { %967 = vrot.lane.b32.xlu0 %v2500_v30, %s2344_s9 }
 0x147   : > { %v711_v20 = vpop.permute.xlu1 %710 }
 0x148   : > { %v3482_v32 = vsel %vm1322_vm5, %v3299_v37, %v711_v20  ;;  %v709_v2 = vpop.permute.xlu0 %708  ;;  %v4436_v20 = vld [vmem:[#allocation48_spill] sm:$0xff] }
 0x149   : > { %v3486_v61 = vsel %vm1322_vm5, %v3302_v46, %v709_v2  ;;  %1099 = vrot.lane.b32.xlu1 %v4426_v33, %s2345_s21  ;;  %v4437_v2 = vld [vmem:[#allocation35_spill] sm:$0xff] }
 0x14a   : > { %1067 = vrot.lane.b32.xlu0 %v4427_v11, %s2345_s21 }
 0x14b   : > { %v715_v26 = vpop.permute.xlu1 %714 }
 0x14c   : > { %v3494_v30 = vsel %vm1322_vm5, %v3315_v0, %v715_v26  ;;  %v713_v19 = vpop.permute.xlu0 %712 }
 0x14d   : > { %4428 = vst [vmem:[#allocation64_spill] sm:$0xff] %v3494_v30  ;;  %v3498_v37 = vsel %vm1322_vm5, %v3318_v17, %v713_v19  ;;  %802 = vrot.lane.b32.xlu1 %v4426_v33, %s2342_s7  ;;  %v4433_v17 = vld [vmem:[#allocation7_spill] sm:$0xff] }
 0x14e   : > { %4429 = vst [vmem:[#allocation26_spill] sm:$0xff] %v3498_v37  ;;  %770 = vrot.lane.b32.xlu0 %v4427_v11, %s2342_s7  ;;  %v4442_v30 = vld [vmem:[#allocation67_spill] sm:$0xff] }
 0x14f   : > { %v719_v46 = vpop.permute.xlu1 %718 }
 0x150   : > { %v3506_v63 = vsel %vm1322_vm5, %v3331_v13, %v719_v46  ;;  %v717_v15 = vpop.permute.xlu0 %716  ;;  %v4435_v13 = vld [vmem:[#allocation36_spill] sm:$0xff] }
 0x151   : > { %4430 = vst [vmem:[#allocation65_spill] sm:$0xff] %v3506_v63  ;;  %v3510_v0 = vsel %vm1322_vm5, %v3334_v38, %v717_v15  ;;  %1101 = vrot.lane.b32.xlu1 %v4432_v31, %s2345_s21  ;;  %v2241_v46 = vld [vmem:[%s2429_s30 + $0x78] sm:$0xff]  ;;  %v4440_v63 = vld [vmem:[#allocation61_spill] sm:$0xff] }
 0x152   : > { %4431 = vst [vmem:[#allocation27_spill] sm:$0xff] %v3510_v0  ;;  %1069 = vrot.lane.b32.xlu0 %v4433_v17, %s2345_s21 }
 0x153   : > { %v3516_v62 = vpop.permute.xlu1 %760 }
 0x154   : > { %v759_v24 = vpop.permute.xlu0 %758 }
 0x155   : > { %1200 = vrot.lane.b32.xlu1 %v4434_v34, %s2346_s6 }
 0x156   : > { %1168 = vrot.lane.b32.xlu0 %v4435_v13, %s2346_s6 }
 0x157   : > { %v3522_v8 = vpop.permute.xlu1 %764 }
 0x158   : > { %v3524_v58 = vpop.permute.xlu0 %762 }
 0x159   : > { %804 = vrot.lane.b32.xlu1 %v4432_v31, %s2342_s7 }
 0x15a   : > { %772 = vrot.lane.b32.xlu0 %v4433_v17, %s2342_s7  ;;  %v2242_v17 = vld [vmem:[%s2429_s30 + $0x80] sm:$0xff] }
 0x15b   : > { %v791_v38 = vpop.permute.xlu1 %790 }
 0x15c   : > { %v3530_v16 = vpop.permute.xlu0 %766 }
 0x15d   : > { %903 = vrot.lane.b32.xlu1 %v4434_v34, %s2343_s8 }
 0x15e   : > { %871 = vrot.lane.b32.xlu0 %v4435_v13, %s2343_s8 }
 0x15f   : > { %v860_v29 = vpop.permute.xlu1 %859 }
 0x160   : > { %v3536_v57 = vpop.permute.xlu0 %792 }
 0x161   : > { %1202 = vrot.lane.b32.xlu1 %v4436_v20, %s2346_s6 }
 0x162   : > { %1170 = vrot.lane.b32.xlu0 %v4437_v2, %s2346_s6 }
 0x163   : > { %v3542_v33 = vpop.permute.xlu1 %861 }
 0x164   : > { %v892_v11 = vpop.permute.xlu0 %891 }
 0x165   : > { %905 = vrot.lane.b32.xlu1 %v4436_v20, %s2343_s8  ;;  %v4438_v20 = vld [vmem:[#allocation25_spill] sm:$0xff] }
 0x166   : > { %873 = vrot.lane.b32.xlu0 %v4437_v2, %s2343_s8 }
 0x167   : > { %v958_v26 = vpop.permute.xlu1 %957 }
 0x168   : > { %v3548_v19 = vpop.permute.xlu0 %893 }
 0x169   : > { %1001 = vrot.lane.b32.xlu1 %v2704_v60, %s2344_s9  ;;  %v4439_v60 = vld [vmem:[#allocation10_spill] sm:$0xff] }
 0x16a   : > { %969 = vrot.lane.b32.xlu0 %v2241_v46, %s2344_s9 }
 0x16b   : > { %v960_v15 = vpop.permute.xlu1 %959 }
 0x16c   : > { %v990_v31 = vpop.permute.xlu0 %989 }
 0x16d   : > { %1003 = vrot.lane.b32.xlu1 %v2698_v9, %s2344_s9  ;;  %v1273_v9 = vsel %vm1256_vm2, %v3567_v14, %v4440_v63 }
 0x16e   : > { %971 = vrot.lane.b32.xlu0 %v2242_v17, %s2344_s9  ;;  %v2244_v17 = vld [vmem:[%s2429_s30] sm:$0xff]  ;;  %v1306_v49 = vsel %vm1289_vm3, %v1273_v9, %v3215_v54 }
 0x16f   : > { %v1060_v34 = vpop.permute.xlu1 %1059  ;;  %v1257_v0 = vsel %vm1256_vm2, %v2244_v17, %v4441_v47  ;;  %v1339_v63 = vsel %vm1322_vm5, %v1306_v49, %v3430_v35 }
 0x170   : > { %v3558_v13 = vpop.permute.xlu0 %991  ;;  %v1290_v44 = vsel %vm1289_vm3, %v1257_v0, %v4442_v30  ;;  %v1372_v47 = vsel %vm1355_vm6, %v1339_v63, %v791_v38  ;;  %v4443_v30 = vld [vmem:[#allocation24_spill] sm:$0xff]  ;;  %v2245_v63 = vld [vmem:[%s2429_s30 + $0x8] sm:$0xff] }
 0x171   : > { %1103 = vrot.lane.b32.xlu1 %v4438_v20, %s2345_s21 }
 0x172   : > { %1071 = vrot.lane.b32.xlu0 %v4439_v60, %s2345_s21 }
 0x173   : > { %v3564_v2 = vpop.permute.xlu1 %794 }
 0x174   : > { %v1092_v46 = vpop.permute.xlu0 %1091 }
 0x175   : > { %806 = vrot.lane.b32.xlu1 %v4438_v20, %s2342_s7  ;;  %v1323_v20 = vsel %vm1322_vm5, %v1290_v44, %v3342_v45  ;;  %v4444_v45 = vld [vmem:[#allocation9_spill] sm:$0xff] }
 0x176   : > { %774 = vrot.lane.b32.xlu0 %v4439_v60, %s2342_s7  ;;  %v1356_v54 = vsel %vm1355_vm6, %v1323_v20, %v759_v24  ;;  %v1405_v60 = vsel %vm1388_vm7, %v1372_v47, %v892_v11  ;;  %v4445_v20 = vld [vmem:[#allocation57_spill] sm:$0xff] }
 0x177   : > { %v1094_v37 = vpop.permute.xlu1 %1093  ;;  %v1389_v49 = vsel %vm1388_vm7, %v1356_v54, %v860_v29  ;;  %v1438_v35 = vsel %vm1421_vm8, %v1405_v60, %v990_v31  ;;  %v1258_v29 = vsel %vm1256_vm2, %v2245_v63, %v4445_v20  ;;  %v4446_v31 = vld [vmem:[#allocation52_spill] sm:$0xff] }
 0x178   : > { %v1062_v17 = vpop.permute.xlu0 %1061  ;;  %v1422_v44 = vsel %vm1421_vm8, %v1389_v49, %v958_v26  ;;  %v1471_v0 = vsel %vm1454_vm9, %v1438_v35, %v1092_v46  ;;  %v4447_v26 = vld [vmem:[#allocation66_spill] sm:$0xff] }
 0x179   : > { %1105 = vrot.lane.b32.xlu1 %v4443_v30, %s2345_s21  ;;  %v1455_v38 = vsel %vm1454_vm9, %v1422_v44, %v1060_v34  ;;  %v1291_v46 = vsel %vm1289_vm3, %v1258_v29, %v4447_v26  ;;  %v4448_v34 = vld [vmem:[#allocation38_spill] sm:$0xff]  ;;  %v2247_v26 = vld [vmem:[%s2429_s30 + $0x150] sm:$0xff] }
 0x17a   : > { %1073 = vrot.lane.b32.xlu0 %v4444_v45, %s2345_s21  ;;  %v1324_v54 = vsel %vm1322_vm5, %v1291_v46, %v3340_v40  ;;  %v4450_v29 = vld [vmem:[#allocation50_spill] sm:$0xff]  ;;  %v2248_v46 = vld [vmem:[%s2429_s30 + $0x90] sm:$0xff] }
 0x17b   : > { %v1193_v24 = vpop.permute.xlu1 %1192  ;;  %v1357_v49 = vsel %vm1355_vm6, %v1324_v54, %v3516_v62 }
 0x17c   : > { %v1161_v11 = vpop.permute.xlu0 %1160  ;;  %v1504_v9 = vsel %vm1487_vm10, %v1471_v0, %v1193_v24  ;;  %v1390_v44 = vsel %vm1388_vm7, %v1357_v49, %v3542_v33  ;;  %v3625_v0 = vld [vmem:[%s2429_s30 + $0xc8] sm:$0xff]  ;;  %v4449_v24 = vld [vmem:[#allocation60_spill] sm:$0xff] }
 0x17d   : > { %1204 = vrot.lane.b32.xlu1 %v4446_v31, %s2346_s6  ;;  %v1488_v47 = vsel %vm1487_vm10, %v1455_v38, %v1161_v11  ;;  %2138 = vmatprep.mubr.msk.f32.mxu1 %vm1532_vm11, %v1504_v9  ;;  %v1274_v38 = vsel %vm1256_vm2, %v3625_v0, %v4449_v24  ;;  %v1423_v40 = vsel %vm1421_vm8, %v1390_v44, %v960_v15  ;;  %v2249_v49 = vld [vmem:[%s2429_s30 + $0x158] sm:$0xff] }
 0x17e   : > { %1172 = vrot.lane.b32.xlu0 %v4448_v34, %s2346_s6  ;;  %2114 = vmatprep.mubr.msk.f32.mxu0 %vm1532_vm11, %v1488_v47  ;;  %v1307_v62 = vsel %vm1289_vm3, %v1274_v38, %v3213_v51  ;;  %v1456_v11 = vsel %vm1454_vm9, %v1423_v40, %v1062_v17  ;;  %v2250_v44 = vld [vmem:[%s2429_s30 + $0x98] sm:$0xff] }
 0x17f   : > { %v3614_v60 = vpop.permute.xlu1 %863  ;;  %v3678_v40 = vld [vmem:[%s2429_s30 + $0xd8] sm:$0xff] }
 0x180   : > { %v3618_v35 = vpop.permute.xlu0 %796 }
 0x181   : > { %808 = vrot.lane.b32.xlu1 %v4443_v30, %s2342_s7  ;;  %v1340_v30 = vsel %vm1322_vm5, %v1307_v62, %v3428_v21  ;;  %v4452_v62 = vld [vmem:[#allocation63_spill] sm:$0xff] }
 0x182   : > { %776 = vrot.lane.b32.xlu0 %v4444_v45, %s2342_s7  ;;  %v1373_v20 = vsel %vm1355_vm6, %v1340_v30, %v3536_v57  ;;  %v2252_v30 = vld [vmem:[%s2429_s30 + $0x18] sm:$0xff] }
 0x183   : > { %v1163_v33 = vpop.permute.xlu1 %1162  ;;  %v1406_v51 = vsel %vm1388_vm7, %v1373_v20, %v3548_v19  ;;  %v4451_v19 = vld [vmem:[#allocation37_spill] sm:$0xff] }
 0x184   : > { %v1489_v9 = vsel %vm1487_vm10, %v1456_v11, %v1163_v33  ;;  %v896_v63 = vpop.permute.xlu0 %895  ;;  %v1439_v21 = vsel %vm1421_vm8, %v1406_v51, %v3558_v13  ;;  %v1275_v11 = vsel %vm1256_vm2, %v3678_v40, %v4452_v62  ;;  %v4453_v33 = vld [vmem:[#allocation29_spill] sm:$0xff] }
 0x185   : > { %907 = vrot.lane.b32.xlu1 %v4446_v31, %s2343_s8  ;;  %2115 = vmatmul.mubr.msk.f32.vlgmr.msra.gmra.mrb[0].mxu0 %vm1532_vm11, %v1489_v9  ;;  %v1472_v57 = vsel %vm1454_vm9, %v1439_v21, %v1094_v37  ;;  %v4454_v9 = vld [vmem:[#allocation51_spill] sm:$0xff]  ;;  %v1308_v51 = vsel %vm1289_vm3, %v1275_v11, %v3223_v39  ;;  %v4455_v21 = vld [vmem:[#allocation12_spill] sm:$0xff] }
 0x186   : > { %875 = vrot.lane.b32.xlu0 %v4448_v34, %s2343_s8  ;;  %v1259_v20 = vsel %vm1256_vm2, %v2252_v30, %v4454_v9  ;;  %v4459_v30 = vld [vmem:[#allocation62_spill] sm:$0xff] }
 0x187   : > { %v3650_v15 = vpop.permute.xlu1 %865 }
 0x188   : > { %v1195_v17 = vpop.permute.xlu0 %1194 }
 0x189   : > { %v1505_v45 = vsel %vm1487_vm10, %v1472_v57, %v1195_v17  ;;  %1206 = vrot.lane.b32.xlu1 %v4450_v29, %s2346_s6  ;;  %v4456_v57 = vld [vmem:[#allocation69_spill] sm:$0xff] }
 0x18a   : > { %1174 = vrot.lane.b32.xlu0 %v4451_v19, %s2346_s6  ;;  %2139 = vmatmul.mubr.msk.f32.vlgmr.msra.gmra.mrb[0].mxu1 %vm1532_vm11, %v1505_v45  ;;  %v1292_v17 = vsel %vm1289_vm3, %v1259_v20, %v4456_v57  ;;  %v1341_v45 = vsel %vm1322_vm5, %v1308_v51, %v3438_v6  ;;  %v4460_v20 = vld [vmem:[#allocation56_spill] sm:$0xff]  ;;  %v2254_v51 = vld [vmem:[%s2429_s30 + $0x20] sm:$0xff] }
 0x18b   : > { %v962_v31 = vpop.permute.xlu1 %961 }
 0x18c   : > { %v3659_v13 = vpop.permute.xlu0 %897 }
 0x18d   : > { %909 = vrot.lane.b32.xlu1 %v4450_v29, %s2343_s8 }
 0x18e   : > { %877 = vrot.lane.b32.xlu0 %v4451_v19, %s2343_s8  ;;  %v1325_v19 = vsel %vm1322_vm5, %v1292_v17, %v3350_v10 }
 0x18f   : > { %v3665_v37 = vpop.permute.xlu1 %963  ;;  %v1358_v39 = vsel %vm1355_vm6, %v1325_v19, %v3524_v58  ;;  %v4463_v19 = vld [vmem:[#allocation68_spill] sm:$0xff] }
 0x190   : > { %v994_v47 = vpop.permute.xlu0 %993 }
 0x191   : > { %1005 = vrot.lane.b32.xlu1 %v2247_v26, %s2344_s9  ;;  %v1374_v26 = vsel %vm1355_vm6, %v1341_v45, %v3564_v2  ;;  %v4462_v45 = vld [vmem:[#allocation40_spill] sm:$0xff] }
 0x192   : > { %973 = vrot.lane.b32.xlu0 %v2248_v46, %s2344_s9 }
 0x193   : > { %v1064_v34 = vpop.permute.xlu1 %1063 }
 0x194   : > { %v996_v54 = vpop.permute.xlu0 %995 }
 0x195   : > { %1007 = vrot.lane.b32.xlu1 %v2249_v49, %s2344_s9  ;;  %v1407_v49 = vsel %vm1388_vm7, %v1374_v26, %v896_v63 }
 0x196   : > { %975 = vrot.lane.b32.xlu0 %v2250_v44, %s2344_s9  ;;  %v1391_v44 = vsel %vm1388_vm7, %v1358_v39, %v3614_v60  ;;  %v1440_v6 = vsel %vm1421_vm8, %v1407_v49, %v994_v47  ;;  %v4457_v60 = vld [vmem:[#allocation28_spill] sm:$0xff]  ;;  %v4458_v47 = vld [vmem:[#allocation11_spill] sm:$0xff] }
 0x197   : > { %v3675_v24 = vpop.permute.xlu1 %798  ;;  %v1424_v10 = vsel %vm1421_vm8, %v1391_v44, %v962_v31 }
 0x198   : > { %v1096_v38 = vpop.permute.xlu0 %1095  ;;  %v1457_v63 = vsel %vm1454_vm9, %v1424_v10, %v1064_v34  ;;  %v3726_v34 = vld [vmem:[%s2429_s30 + $0xe0] sm:$0xff] }
 0x199   : > { %1107 = vrot.lane.b32.xlu1 %v4453_v33, %s2345_s21  ;;  %v1473_v2 = vsel %vm1454_vm9, %v1440_v6, %v1096_v38  ;;  %v1276_v9 = vsel %vm1256_vm2, %v3726_v34, %v4459_v30  ;;  %v2255_v30 = vld [vmem:[%s2429_s30 + $0x168] sm:$0xff] }
 0x19a   : > { %1075 = vrot.lane.b32.xlu0 %v4455_v21, %s2345_s21  ;;  %v1309_v17 = vsel %vm1289_vm3, %v1276_v9, %v3221_v56  ;;  %v2256_v9 = vld [vmem:[%s2429_s30 + $0xa8] sm:$0xff] }
 0x19b   : > { %v1098_v29 = vpop.permute.xlu1 %1097  ;;  %v1342_v39 = vsel %vm1322_vm5, %v1309_v17, %v3436_v1 }
 0x19c   : > { %v1066_v46 = vpop.permute.xlu0 %1065  ;;  %v1375_v6 = vsel %vm1355_vm6, %v1342_v39, %v3618_v35 }
 0x19d   : > { %810 = vrot.lane.b32.xlu1 %v4453_v33, %s2342_s7 }
 0x19e   : > { %778 = vrot.lane.b32.xlu0 %v4455_v21, %s2342_s7  ;;  %v4461_v21 = vld [vmem:[#allocation55_spill] sm:$0xff] }
 0x19f   : > { %v1197_v58 = vpop.permute.xlu1 %1196  ;;  %v1260_v57 = vsel %vm1256_vm2, %v2254_v51, %v4461_v21  ;;  %v2257_v21 = vld [vmem:[%s2429_s30 + $0x170] sm:$0xff] }
 0x1a0   : > { %v1506_v62 = vsel %vm1487_vm10, %v1473_v2, %v1197_v58  ;;  %v1165_v11 = vpop.permute.xlu0 %1164  ;;  %v1293_v26 = vsel %vm1289_vm3, %v1260_v57, %v4463_v19  ;;  %v1408_v2 = vsel %vm1388_vm7, %v1375_v6, %v3659_v13  ;;  %v2258_v57 = vld [vmem:[%s2429_s30 + $0xb0] sm:$0xff] }
 0x1a1   : > { %v1490_v33 = vsel %vm1487_vm10, %v1457_v63, %v1165_v11  ;;  %1109 = vrot.lane.b32.xlu1 %v4457_v60, %s2345_s21  ;;  %2141 = vmatprep.mubr.msk.f32.mxu1 %vm1532_vm11, %v1506_v62  ;;  %v1326_v44 = vsel %vm1322_vm5, %v1293_v26, %v3348_v36  ;;  %v1441_v58 = vsel %vm1421_vm8, %v1408_v2, %v996_v54  ;;  %v4464_v54 = vld [vmem:[#allocation54_spill] sm:$0xff]  ;;  %v4466_v19 = vld [vmem:[#allocation31_spill] sm:$0xff] }
 0x1a2   : > { %1077 = vrot.lane.b32.xlu0 %v4458_v47, %s2345_s21  ;;  %2117 = vmatprep.mubr.msk.f32.mxu0 %vm1532_vm11, %v1490_v33  ;;  %v1359_v56 = vsel %vm1355_vm6, %v1326_v44, %v3522_v8  ;;  %v1474_v35 = vsel %vm1454_vm9, %v1441_v58, %v1098_v29  ;;  %v4465_v29 = vld [vmem:[#allocation39_spill] sm:$0xff]  ;;  %v4467_v26 = vld [vmem:[#allocation14_spill] sm:$0xff]  ;;  %v1376_v44 = vsel %vm1355_vm6, %v3450_v41, %v3675_v24 }
 0x1a3   : > { %v3721_v31 = vpop.permute.xlu1 %800  ;;  %v1392_v1 = vsel %vm1388_vm7, %v1359_v56, %v3650_v15  ;;  %v1360_v56 = vsel %vm1355_vm6, %v3362_v3, %v3530_v16 }
 0x1a4   : > { %v3723_v38 = vpop.permute.xlu0 %768  ;;  %v1425_v36 = vsel %vm1421_vm8, %v1392_v1, %v3665_v37 }
 0x1a5   : > { %1208 = vrot.lane.b32.xlu1 %v4460_v20, %s2346_s6  ;;  %v1458_v63 = vsel %vm1454_vm9, %v1425_v36, %v1066_v46 }
 0x1a6   : > { %1176 = vrot.lane.b32.xlu0 %v4462_v45, %s2346_s6 }
 0x1a7   : > { %v900_v49 = vpop.permute.xlu1 %899 }
 0x1a8   : > { %v868_v10 = vpop.permute.xlu0 %867  ;;  %v1409_v2 = vsel %vm1388_vm7, %v1376_v44, %v900_v49 }
 0x1a9   : > { %812 = vrot.lane.b32.xlu1 %v4457_v60, %s2342_s7  ;;  %v1393_v1 = vsel %vm1388_vm7, %v1360_v56, %v868_v10  ;;  %v4469_v10 = vld [vmem:[#allocation13_spill] sm:$0xff]  ;;  %v753_v56 = vrot.slane %v3118_v5, 1 }
 0x1aa   : > { %780 = vrot.lane.b32.xlu0 %v4458_v47, %s2342_s7 }
 0x1ab   : > { %v1199_v8 = vpop.permute.xlu1 %1198 }
 0x1ac   : > { %v1507_v13 = vsel %vm1487_vm10, %v1474_v35, %v1199_v8  ;;  %v1167_v62 = vpop.permute.xlu0 %1166  ;;  %v4468_v8 = vld [vmem:[#allocation30_spill] sm:$0xff] }
 0x1ad   : > { %v1491_v11 = vsel %vm1487_vm10, %v1458_v63, %v1167_v62  ;;  %911 = vrot.lane.b32.xlu1 %v4460_v20, %s2343_s8  ;;  %2142 = vmatmul.mubr.msk.f32.gmra.mrb[2].mxu1 %vm1532_vm11, %v1507_v13  ;;  %v4470_v62 = vld [vmem:[#allocation59_spill] sm:$0xff] }
 0x1ae   : > { %879 = vrot.lane.b32.xlu0 %v4462_v45, %s2343_s8  ;;  %2118 = vmatmul.mubr.msk.f32.gmra.mrb[2].mxu0 %vm1532_vm11, %v1491_v11  ;;  %v4471_v11 = vld [vmem:[#allocation42_spill] sm:$0xff] }
 0x1af   : > { %v902_v15 = vpop.permute.xlu1 %901 }
 0x1b0   : > { %v870_v37 = vpop.permute.xlu0 %869 }
 0x1b1   : > { %1210 = vrot.lane.b32.xlu1 %v4464_v54, %s2346_s6 }
 0x1b2   : > { %1178 = vrot.lane.b32.xlu0 %v4465_v29, %s2346_s6 }
 0x1b3   : > { %v998_v46 = vpop.permute.xlu1 %997 }
 0x1b4   : > { %v966_v33 = vpop.permute.xlu0 %965  ;;  %v1442_v58 = vsel %vm1421_vm8, %v1409_v2, %v998_v46 }
 0x1b5   : > { %913 = vrot.lane.b32.xlu1 %v4464_v54, %s2343_s8  ;;  %v1426_v36 = vsel %vm1421_vm8, %v1393_v1, %v966_v33  ;;  %v1361_v33 = vsel %vm1355_vm6, %v3358_v25, %v3723_v38 }
 0x1b6   : > { %881 = vrot.lane.b32.xlu0 %v4465_v29, %s2343_s8  ;;  %v1377_v29 = vsel %vm1355_vm6, %v3446_v22, %v3721_v31 }
 0x1b7   : > { %v1000_v60 = vpop.permute.xlu1 %999 }
 0x1b8   : > { %v968_v47 = vpop.permute.xlu0 %967 }
 0x1b9   : > { %1009 = vrot.lane.b32.xlu1 %v2255_v30, %s2344_s9  ;;  %v1410_v30 = vsel %vm1388_vm7, %v1377_v29, %v902_v15 }
 0x1ba   : > { %977 = vrot.lane.b32.xlu0 %v2256_v9, %s2344_s9  ;;  %v1394_v9 = vsel %vm1388_vm7, %v1361_v33, %v870_v37 }
 0x1bb   : > { %v1100_v20 = vpop.permute.xlu1 %1099 }
 0x1bc   : > { %v1068_v51 = vpop.permute.xlu0 %1067  ;;  %v1475_v41 = vsel %vm1454_vm9, %v1442_v58, %v1100_v20  ;;  %v1443_v20 = vsel %vm1421_vm8, %v1410_v30, %v1000_v60 }
 0x1bd   : > { %1011 = vrot.lane.b32.xlu1 %v2257_v21, %s2344_s9  ;;  %v1459_v35 = vsel %vm1454_vm9, %v1426_v36, %v1068_v51  ;;  %v1427_v51 = vsel %vm1421_vm8, %v1394_v9, %v968_v47  ;;  %v4472_v47 = vld [vmem:[#allocation58_spill] sm:$0xff] }
 0x1be   : > { %979 = vrot.lane.b32.xlu0 %v2258_v57, %s2344_s9  ;;  %v4473_v57 = vld [vmem:[#allocation41_spill] sm:$0xff] }
 0x1bf   : > { %v3787_v17 = vpop.permute.xlu1 %802 }
 0x1c0   : > { %v3789_v45 = vpop.permute.xlu0 %770 }
 0x1c1   : > { %1111 = vrot.lane.b32.xlu1 %v4466_v19, %s2345_s21 }
 0x1c2   : > { %1079 = vrot.lane.b32.xlu0 %v4467_v26, %s2345_s21 }
 0x1c3   : > { %v1102_v39 = vpop.permute.xlu1 %1101 }
 0x1c4   : > { %v1070_v6 = vpop.permute.xlu0 %1069  ;;  %v1476_v22 = vsel %vm1454_vm9, %v1443_v20, %v1102_v39 }
 0x1c5   : > { %814 = vrot.lane.b32.xlu1 %v4466_v19, %s2342_s7  ;;  %v1460_v21 = vsel %vm1454_vm9, %v1427_v51, %v1070_v6  ;;  %v754_v6 = vrot.slane %v3112_v4, 1  ;;  %v4476_v51 = vld [vmem:[#allocation44_spill] sm:$0xff] }
 0x1c6   : > { %782 = vrot.lane.b32.xlu0 %v4467_v26, %s2342_s7 }
 0x1c7   : > { %v1201_v24 = vpop.permute.xlu1 %1200  ;;  %v755_v58 = vsel %vm300_vm0, %v753_v56, %v754_v6 }
 0x1c8   : > { %v1508_v3 = vsel %vm1487_vm10, %v1475_v41, %v1201_v24  ;;  %v1169_v16 = vpop.permute.xlu0 %1168  ;;  %v248_v41 = vld [vmem:[%s2429_s30 + $0x190] sm:$0x3] }
 0x1c9   : > { %v1492_v49 = vsel %vm1487_vm10, %v1459_v35, %v1169_v16  ;;  %1113 = vrot.lane.b32.xlu1 %v4468_v8, %s2345_s21  ;;  %2144 = vmatprep.mubr.msk.f32.mxu1 %vm1532_vm11, %v1508_v3  ;;  %v4474_v35 = vld [vmem:[#allocation16_spill] sm:$0xff]  ;;  %v1378_v16 = vsel %vm1355_vm6, %v3462_v52, %v3787_v17 }
 0x1ca   : > { %1081 = vrot.lane.b32.xlu0 %v4469_v10, %s2345_s21  ;;  %2120 = vmatprep.mubr.msk.f32.mxu0 %vm1532_vm11, %v1492_v49 }
 0x1cb   : > { %v3819_v63 = vpop.permute.xlu1 %804 }
 0x1cc   : > { %v3821_v13 = vpop.permute.xlu0 %772 }
 0x1cd   : > { %1212 = vrot.lane.b32.xlu1 %v4470_v62, %s2346_s6 }
 0x1ce   : > { %1180 = vrot.lane.b32.xlu0 %v4471_v11, %s2346_s6 }
 0x1cf   : > { %v904_v54 = vpop.permute.xlu1 %903 }
 0x1d0   : > { %v872_v46 = vpop.permute.xlu0 %871 }
 0x1d1   : > { %816 = vrot.lane.b32.xlu1 %v4468_v8, %s2342_s7  ;;  %v1362_v8 = vsel %vm1355_vm6, %v3374_v42, %v3789_v45 }
 0x1d2   : > { %784 = vrot.lane.b32.xlu0 %v4469_v10, %s2342_s7  ;;  %v1411_v10 = vsel %vm1388_vm7, %v1378_v16, %v904_v54 }
 0x1d3   : > { %v1203_v31 = vpop.permute.xlu1 %1202 }
 0x1d4   : > { %v1509_v25 = vsel %vm1487_vm10, %v1476_v22, %v1203_v31  ;;  %v1171_v38 = vpop.permute.xlu0 %1170  ;;  %v1379_v31 = vsel %vm1355_vm6, %v3458_v27, %v3819_v63 }
 0x1d5   : > { %v1493_v15 = vsel %vm1487_vm10, %v1460_v21, %v1171_v38  ;;  %915 = vrot.lane.b32.xlu1 %v4470_v62, %s2343_s8  ;;  %2145 = vmatmul.mubr.msk.f32.gmra.mrb[4].mxu1 %vm1532_vm11, %v1509_v25  ;;  %v854_v62 = vrot.slane %v3118_v5, 2  ;;  %v1363_v25 = vsel %vm1355_vm6, %v3370_v28, %v3821_v13 }
 0x1d6   : > { %883 = vrot.lane.b32.xlu0 %v4471_v11, %s2343_s8  ;;  %2121 = vmatmul.mubr.msk.f32.gmra.mrb[4].mxu0 %vm1532_vm11, %v1493_v15  ;;  %v1395_v11 = vsel %vm1388_vm7, %v1362_v8, %v872_v46  ;;  %v4475_v46 = vld [vmem:[#allocation15_spill] sm:$0xff] }
 0x1d7   : > { %v906_v37 = vpop.permute.xlu1 %905 }
 0x1d8   : > { %v874_v60 = vpop.permute.xlu0 %873  ;;  %v1412_v38 = vsel %vm1388_vm7, %v1379_v31, %v906_v37 }
 0x1d9   : > { %1214 = vrot.lane.b32.xlu1 %v4472_v47, %s2346_s6  ;;  %v1396_v15 = vsel %vm1388_vm7, %v1363_v25, %v874_v60 }
 0x1da   : > { %1182 = vrot.lane.b32.xlu0 %v4473_v57, %s2346_s6 }
 0x1db   : > { %v1002_v19 = vpop.permute.xlu1 %1001 }
 0x1dc   : > { %v970_v26 = vpop.permute.xlu0 %969  ;;  %v1444_v29 = vsel %vm1421_vm8, %v1411_v10, %v1002_v19 }
 0x1dd   : > { %917 = vrot.lane.b32.xlu1 %v4472_v47, %s2343_s8 }
 0x1de   : > { %885 = vrot.lane.b32.xlu0 %v4473_v57, %s2343_s8  ;;  %v857_v57 = vrot.slane %v248_v41, 2 }
 0x1df   : > { %v1004_v39 = vpop.permute.xlu1 %1003 }
 0x1e0   : > { %v972_v44 = vpop.permute.xlu0 %971  ;;  %v1445_v47 = vsel %vm1421_vm8, %v1412_v38, %v1004_v39 }
 0x1e1   : > { %1013 = vrot.lane.b32.xlu1 %v3118_v5, %s2344_s9  ;;  %v1429_v19 = vsel %vm1421_vm8, %v1396_v15, %v972_v44 }
 0x1e2   : > { %981 = vrot.lane.b32.xlu0 %v3567_v14, %s2344_s9  ;;  %v756_v14 = vrot.slane %v248_v41, 1  ;;  %v250_v41 = vld [vmem:[%s2429_s30 + $0x1a0] sm:$0xff] }
 0x1e3   : > { %v1104_v2 = vpop.permute.xlu1 %1103 }
 0x1e4   : > { %v1072_v1 = vpop.permute.xlu0 %1071  ;;  %v757_v52 = vsel %vm300_vm0, %v754_v6, %v756_v14  ;;  %v1477_v17 = vsel %vm1454_vm9, %v1444_v29, %v1104_v2  ;;  %v4477_v6 = vld [vmem:[#allocation43_spill] sm:$0xff] }
 0x1e5   : > { %1015 = vrot.lane.b32.xlu1 %v3112_v4, %s2344_s9 }
 0x1e6   : > { %983 = vrot.lane.b32.xlu0 %v3625_v0, %s2344_s9  ;;  %v855_v0 = vrot.slane %v3112_v4, 2  ;;  %v1428_v4 = vsel %vm1421_vm8, %v1395_v11, %v970_v26 }
 0x1e7   : > { %v3870_v36 = vpop.permute.xlu1 %806  ;;  %v1461_v45 = vsel %vm1454_vm9, %v1428_v4, %v1072_v1  ;;  %v249_v1 = vld [vmem:[%s2429_s30 + $0x198] sm:$0xff] }
 0x1e8   : > { %v3873_v24 = vpop.permute.xlu0 %774  ;;  %v856_v30 = vsel %vm477_vm1, %v854_v62, %v855_v0  ;;  %v858_v60 = vsel %vm477_vm1, %v855_v0, %v857_v57  ;;  %v1054_v14 = vrot.slane %v249_v1, 1  ;;  %v1155_v29 = vrot.slane %v249_v1, 2 }
 0x1e9   : > { %1115 = vrot.lane.b32.xlu1 %v755_v58, %s2345_s21 }
 0x1ea   : > { %1083 = vrot.lane.b32.xlu0 %v4474_v35, %s2345_s21 }
 0x1eb   : > { %v1106_v3 = vpop.permute.xlu1 %1105 }
 0x1ec   : > { %v1074_v49 = vpop.permute.xlu0 %1073  ;;  %v1478_v27 = vsel %vm1454_vm9, %v1445_v47, %v1106_v3  ;;  %v1055_v3 = vrot.slane %v250_v41, 1 }
 0x1ed   : > { %818 = vrot.lane.b32.xlu1 %v755_v58, %s2342_s7  ;;  %v1462_v26 = vsel %vm1454_vm9, %v1429_v19, %v1074_v49  ;;  %v251_v49 = vld [vmem:[%s2429_s30 + $0x1a8] sm:$0x3]  ;;  %s185_s30 = sand.u32 1, %s2321_s13  }
 0x1ee   : > { %786 = vrot.lane.b32.xlu0 %v4474_v35, %s2342_s7  ;;  %v1056_v8 = vsel %vm300_vm0, %v1054_v14, %v1055_v3  ;;  %v1057_v10 = vrot.slane %v251_v49, 1  ;;  %s4187_s15 = scalar_lea.sflag [#allocation3], %s185_s30 }
 0x1ef   : > { %v1205_v42 = vpop.permute.xlu1 %1204 }
 0x1f0   : > { %v1510_v54 = vsel %vm1487_vm10, %v1477_v17, %v1205_v42  ;;  %v1173_v33 = vpop.permute.xlu0 %1172  ;;  %v1364_v42 = vsel %vm1355_vm6, %v3386_v23, %v3873_v24 }
 0x1f1   : > { %v1494_v5 = vsel %vm1487_vm10, %v1461_v45, %v1173_v33  ;;  %1117 = vrot.lane.b32.xlu1 %v757_v52, %s2345_s21  ;;  %2147 = vmatprep.mubr.msk.f32.mxu1 %vm1532_vm11, %v1510_v54 }
 0x1f2   : > { %1085 = vrot.lane.b32.xlu0 %v4475_v46, %s2345_s21  ;;  %2123 = vmatprep.mubr.msk.f32.mxu0 %vm1532_vm11, %v1494_v5  ;;  %v1158_v5 = vrot.slane %v251_v49, 2 }
 0x1f3   : > { %v3904_v9 = vpop.permute.xlu1 %808 }
 0x1f4   : > { %v3906_v20 = vpop.permute.xlu0 %776  ;;  %v1381_v25 = vsel %vm1355_vm6, %v3470_v43, %v3904_v9 }
 0x1f5   : > { %1216 = vrot.lane.b32.xlu1 %v856_v30, %s2346_s6 }
 0x1f6   : > { %1184 = vrot.lane.b32.xlu0 %v4476_v51, %s2346_s6 }
 0x1f7   : > { %v908_v22 = vpop.permute.xlu1 %907 }
 0x1f8   : > { %v876_v21 = vpop.permute.xlu0 %875 }
 0x1f9   : > { %820 = vrot.lane.b32.xlu1 %v757_v52, %s2342_s7  ;;  %v1156_v52 = vrot.slane %v250_v41, 2  ;;  %v1397_v54 = vsel %vm1388_vm7, %v1364_v42, %v876_v21 }
 0x1fa   : > { %788 = vrot.lane.b32.xlu0 %v4475_v46, %s2342_s7 }
 0x1fb   : > { %v1207_v63 = vpop.permute.xlu1 %1206  ;;  %v1157_v33 = vsel %vm477_vm1, %v1155_v29, %v1156_v52 }
 0x1fc   : > { %v1511_v28 = vsel %vm1487_vm10, %v1478_v27, %v1207_v63  ;;  %v1175_v13 = vpop.permute.xlu0 %1174 }
 0x1fd   : > { %v1495_v37 = vsel %vm1487_vm10, %v1462_v26, %v1175_v13  ;;  %919 = vrot.lane.b32.xlu1 %v856_v30, %s2343_s8  ;;  %2148 = vmatmul.mubr.msk.f32.gmra.mrb[6].mxu1 %vm1532_vm11, %v1511_v28 }
 0x1fe   : > { %887 = vrot.lane.b32.xlu0 %v4476_v51, %s2343_s8  ;;  %2124 = vmatmul.mubr.msk.f32.gmra.mrb[6].mxu0 %vm1532_vm11, %v1495_v37 }
 0x1ff   : > { %v910_v39 = vpop.permute.xlu1 %909 }
 0x200   : > { %v878_v44 = vpop.permute.xlu0 %877  ;;  %v1414_v15 = vsel %vm1388_vm7, %v1381_v25, %v910_v39 }
 0x201   : > { %1218 = vrot.lane.b32.xlu1 %v858_v60, %s2346_s6 }
 0x202   : > { %1186 = vrot.lane.b32.xlu0 %v4477_v6, %s2346_s6 }
 0x203   : > { %v1006_v56 = vpop.permute.xlu1 %1005 }
 0x204   : > { %v974_v2 = vpop.permute.xlu0 %973 }
 0x205   : > { %921 = vrot.lane.b32.xlu1 %v858_v60, %s2343_s8 }
 0x206   : > { %889 = vrot.lane.b32.xlu0 %v4477_v6, %s2343_s8 }
 0x207   : > { %v1008_v58 = vpop.permute.xlu1 %1007 }
 0x208   : > { %v976_v35 = vpop.permute.xlu0 %975  ;;  %v1447_v57 = vsel %vm1421_vm8, %v1414_v15, %v1008_v58 }
 0x209   : > { %1017 = vrot.lane.b32.xlu1 %v249_v1, %s2344_s9 }
 0x20a   : > { %985 = vrot.lane.b32.xlu0 %v3678_v40, %s2344_s9  ;;  %v1058_v40 = vsel %vm300_vm0, %v1055_v3, %v1057_v10 }
 0x20b   : > { %v1108_v16 = vpop.permute.xlu1 %1107 }
 0x20c   : > { %v1076_v0 = vpop.permute.xlu0 %1075 }
 0x20d   : > { %1019 = vrot.lane.b32.xlu1 %v250_v41, %s2344_s9 }
 0x20e   : > { %987 = vrot.lane.b32.xlu0 %v3726_v34, %s2344_s9  ;;  %v1380_v34 = vsel %vm1355_vm6, %v3474_v48, %v3870_v36  ;;  %v1430_v48 = vsel %vm1421_vm8, %v1397_v54, %v974_v2  ;;  %s2025_s9 = sshll.u32 %s185_s30, 8 }
 0x20f   : > { %v811_v62 = vpop.permute.xlu1 %810  ;;  %v1413_v45 = vsel %vm1388_vm7, %v1380_v34, %v908_v22  ;;  %v1463_v23 = vsel %vm1454_vm9, %v1430_v48, %v1076_v0  ;;  %s4046_s10 = scalar_lea.vmem [#allocation2], %s2025_s9 }
 0x210   : > { %v3950_v11 = vpop.permute.xlu0 %778  ;;  %v1382_v1 = vsel %vm1355_vm6, %v3486_v61, %v811_v62  ;;  %s1938_s18 = sshll.u32 %s4046_s10, 4  ;;  %s4180_s18 = int_to_ptr.vmem [resolvable:$true] %s1938_s18 }
 0x211   : > { %1119 = vrot.lane.b32.xlu1 %v1056_v8, %s2345_s21  ;;  %v1366_v41 = vsel %vm1355_vm6, %v3398_v55, %v3950_v11  ;;  %s2259_s26 = scalar_lea.vmem %s4180_s18, 4096  ;;  %p2266_p1 = scmp.lt.s32.totalorder %s4180_s18, %s2264_s28 }
 0x212   : > { %1087 = vrot.lane.b32.xlu0 %v2650_v50, %s2345_s21  ;;  %v1446_v50 = vsel %vm1421_vm8, %v1413_v45, %v1006_v56  ;;  %p2260_p12 = scmp.ne.s32.totalorder %s4180_s18, %s2259_s26  ;;  %p2267_p2 = scmp.lt.s32.totalorder %s2265_s29, %s2259_s26 }
 0x213   : > { %v1110_v4 = vpop.permute.xlu1 %1109  ;;  %v1479_v36 = vsel %vm1454_vm9, %v1446_v50, %v1108_v16 }
 0x214   : > { %v1078_v17 = vpop.permute.xlu0 %1077  ;;  %p2261_p13 = pnand %p2260_p12, %p2409_p4  ;;  %p2268_p3 = por %p2267_p2, %p2266_p1 }
 0x215   : > { %1121 = vrot.lane.b32.xlu1 %v1058_v40, %s2345_s21 }
 0x216   : > { %1089 = vrot.lane.b32.xlu0 %v4406_v12, %s2345_s21  ;;  %v1159_v12 = vsel %vm477_vm1, %v1156_v52, %v1158_v5  ;;  %p2262_p0 = pneg %p2261_p13 }
 0x217   : > { %v1209_v46 = vpop.permute.xlu1 %1208 }
 0x218   : > { %v1512_v24 = vsel %vm1487_vm10, %v1479_v36, %v1209_v46  ;;  %v1177_v30 = vpop.permute.xlu0 %1176  ;;  %p2269_p5 = pnand %p2268_p3, %p2262_p0 }
 0x219   : > { %v1496_v51 = vsel %vm1487_vm10, %v1463_v23, %v1177_v30  ;;  %1220 = vrot.lane.b32.xlu1 %v1157_v33, %s2346_s6  ;;  %2150 = vmatprep.mubr.msk.f32.mxu1 %vm1532_vm11, %v1512_v24  ;;  %v4040_v24 = vld [vmem:[%s4236_s2] ss:$0 sm:$0xff] }
 0x21a   : > { %1188 = vrot.lane.b32.xlu0 %v2897_v18, %s2346_s6  ;;  %2126 = vmatprep.mubr.msk.f32.mxu0 %vm1532_vm11, %v1496_v51  ;;  %v1365_v18 = vsel %vm1355_vm6, %v3382_v59, %v3906_v20 }
 0x21b   : > { %v813_v22 = vpop.permute.xlu1 %812  ;;  %v1398_v47 = vsel %vm1388_vm7, %v1365_v18, %v878_v44 }
 0x21c   : > { %v781_v31 = vpop.permute.xlu0 %780  ;;  %v1431_v19 = vsel %vm1421_vm8, %v1398_v47, %v976_v35  ;;  %v1383_v52 = vsel %vm1355_vm6, %v3482_v32, %v813_v22 }
 0x21d   : > { %1222 = vrot.lane.b32.xlu1 %v1159_v12, %s2346_s6  ;;  %v1464_v63 = vsel %vm1454_vm9, %v1431_v19, %v1078_v17 }
 0x21e   : > { %1190 = vrot.lane.b32.xlu0 %v2892_v7, %s2346_s6  ;;  %v1480_v7 = vsel %vm1454_vm9, %v1447_v57, %v1110_v4  ;;  %v1367_v4 = vsel %vm1355_vm6, %v3394_v53, %v781_v31 }
 0x21f   : > { %v912_v21 = vpop.permute.xlu1 %911 }
 0x220   : > { %v880_v38 = vpop.permute.xlu0 %879  ;;  %v1415_v35 = vsel %vm1388_vm7, %v1382_v1, %v912_v21 }
 0x221   : > { %v1399_v14 = vsel %vm1388_vm7, %v1366_v41, %v880_v38 }
 0x223   : > { %v1211_v27 = vpop.permute.xlu1 %1210 }
 0x224   : > { %v1513_v43 = vsel %vm1487_vm10, %v1480_v7, %v1211_v27  ;;  %v1179_v9 = vpop.permute.xlu0 %1178 }
 0x225   : > { %v1497_v26 = vsel %vm1487_vm10, %v1464_v63, %v1179_v9  ;;  %2151 = vmatmul.mubr.msk.f32.gmra.mrb[8].mxu1 %vm1532_vm11, %v1513_v43 }
 0x226   : > { %2127 = vmatmul.mubr.msk.f32.gmra.mrb[8].mxu0 %vm1532_vm11, %v1497_v26 }
 0x227   : > { %v914_v59 = vpop.permute.xlu1 %913 }
 0x228   : > { %v882_v20 = vpop.permute.xlu0 %881  ;;  %v1416_v34 = vsel %vm1388_vm7, %v1383_v52, %v914_v59  ;;  %v4478_v59 = vld [vmem:[#allocation26_spill] sm:$0xff] }
 0x229   : > { %v1400_v17 = vsel %vm1388_vm7, %v1367_v4, %v882_v20 }
 0x22b   : > { %v1010_v28 = vpop.permute.xlu1 %1009 }
 0x22c   : > { %v978_v13 = vpop.permute.xlu0 %977  ;;  %v1448_v3 = vsel %vm1421_vm8, %v1415_v35, %v1010_v28 }
 0x22d   : > { %v1432_v16 = vsel %vm1421_vm8, %v1399_v14, %v978_v13  ;;  %v4479_v13 = vld [vmem:[#allocation17_spill] sm:$0xff] }
 0x22f   : > { %v1012_v37 = vpop.permute.xlu1 %1011 }
 0x230   : > { %v980_v60 = vpop.permute.xlu0 %979  ;;  %v1449_v42 = vsel %vm1421_vm8, %v1416_v34, %v1012_v37 }
 0x231   : > { %v1433_v45 = vsel %vm1421_vm8, %v1400_v17, %v980_v60 }
 0x233   : > { %v1112_v39 = vpop.permute.xlu1 %1111 }
 0x234   : > { %v1080_v44 = vpop.permute.xlu0 %1079  ;;  %v1481_v49 = vsel %vm1454_vm9, %v1448_v3, %v1112_v39 }
 0x235   : > { %v1465_v8 = vsel %vm1454_vm9, %v1432_v16, %v1080_v44 }
 0x237   : > { %v3999_v6 = vpop.permute.xlu1 %814 }
 0x238   : > { %v4001_v56 = vpop.permute.xlu0 %782  ;;  %v1384_v20 = vsel %vm1355_vm6, %v4478_v59, %v3999_v6 }
 0x239   : > { %v1368_v37 = vsel %vm1355_vm6, %v4479_v13, %v4001_v56 }
 0x23b   : > { %v1114_v2 = vpop.permute.xlu1 %1113 }
 0x23c   : > { %v1082_v58 = vpop.permute.xlu0 %1081  ;;  %v1482_v54 = vsel %vm1454_vm9, %v1449_v42, %v1114_v2 }
 0x23d   : > { %v1466_v33 = vsel %vm1454_vm9, %v1433_v45, %v1082_v58 }
 0x23f   : > { %v1213_v0 = vpop.permute.xlu1 %1212 }
 0x240   : > { %v1514_v61 = vsel %vm1487_vm10, %v1481_v49, %v1213_v0  ;;  %v1181_v10 = vpop.permute.xlu0 %1180  ;;  %v4480_v49 = vld [vmem:[#allocation64_spill] sm:$0xff] }
 0x241   : > { %v1498_v62 = vsel %vm1487_vm10, %v1465_v8, %v1181_v10  ;;  %2153 = vmatprep.mubr.msk.f32.mxu1 %vm1532_vm11, %v1514_v61  ;;  %v4481_v61 = vld [vmem:[#allocation6_spill] sm:$0xff] }
 0x242   : > { %2129 = vmatprep.mubr.msk.f32.mxu0 %vm1532_vm11, %v1498_v62 }
 0x243   : > { %v4018_v55 = vpop.permute.xlu1 %816 }
 0x244   : > { %v4020_v11 = vpop.permute.xlu0 %784  ;;  %v1385_v0 = vsel %vm1355_vm6, %v4480_v49, %v4018_v55 }
 0x245   : > { %v1369_v10 = vsel %vm1355_vm6, %v4481_v61, %v4020_v11 }
 0x247   : > { %v916_v29 = vpop.permute.xlu1 %915 }
 0x248   : > { %v884_v40 = vpop.permute.xlu0 %883  ;;  %v1417_v60 = vsel %vm1388_vm7, %v1384_v20, %v916_v29 }
 0x249   : > { %v1401_v39 = vsel %vm1388_vm7, %v1368_v37, %v884_v40  ;;  %v4484_v37 = vld [vmem:[#allocation65_spill] sm:$0xff] }
 0x24b   : > { %v1215_v50 = vpop.permute.xlu1 %1214 }
 0x24c   : > { %v1515_v32 = vsel %vm1487_vm10, %v1482_v54, %v1215_v50  ;;  %v1183_v5 = vpop.permute.xlu0 %1182 }
 0x24d   : > { %v1499_v53 = vsel %vm1487_vm10, %v1466_v33, %v1183_v5  ;;  %2154 = vmatmul.mubr.msk.f32.gmra.mrb[10].mxu1 %vm1532_vm11, %v1515_v32 }
 0x24e   : > { %2130 = vmatmul.mubr.msk.f32.gmra.mrb[10].mxu0 %vm1532_vm11, %v1499_v53 }
 0x24f   : > { %v918_v48 = vpop.permute.xlu1 %917 }
 0x250   : > { %v886_v36 = vpop.permute.xlu0 %885  ;;  %v1418_v62 = vsel %vm1388_vm7, %v1385_v0, %v918_v48 }
 0x251   : > { %v1402_v29 = vsel %vm1388_vm7, %v1369_v10, %v886_v36 }
 0x253   : > { %v1014_v46 = vpop.permute.xlu1 %1013 }
 0x254   : > { %v982_v23 = vpop.permute.xlu0 %981  ;;  %v1450_v44 = vsel %vm1421_vm8, %v1417_v60, %v1014_v46 }
 0x255   : > { %v1434_v2 = vsel %vm1421_vm8, %v1401_v39, %v982_v23 }
 0x257   : > { %v1016_v30 = vpop.permute.xlu1 %1015 }
 0x258   : > { %v984_v51 = vpop.permute.xlu0 %983  ;;  %v2116_v12 = vpop.f32.mrb[0].mxu0  ;;  %v1451_v52 = vsel %vm1421_vm8, %v1418_v62, %v1016_v30 }
 0x259   : > { %v1705_v22 = vadd.f32 %v2116_v12, %v4040_v24  ;;  %v1699_v31 = vpop.f32.mrb[1].mxu0  ;;  %v1435_v40 = vsel %vm1421_vm8, %v1402_v29, %v984_v51 }
 0x25a   : > { %v1700_v21 = vadd.f32 %v4040_v24, %v1699_v31 }
 0x25b   : > { %v1859_v25 = vmax.f32 %v1705_v22, 0.0  ;;  %v1116_v38 = vpop.permute.xlu1 %1115 }
 0x25c   : > { %v1858_v18 = vmax.f32 %v1700_v21, 0.0  ;;  %v1084_v15 = vpop.permute.xlu0 %1083  ;;  %v1483_v1 = vsel %vm1454_vm9, %v1450_v44, %v1116_v38 }
 0x25d   : > { %1891 = vst [vmem:[%s4046_s10 + $0x8] sm:$0xff] %v1859_v25  ;;  %v2140_v47 = vpop.f32.mrb[0].mxu1  ;;  %v1467_v41 = vsel %vm1454_vm9, %v1434_v2, %v1084_v15 }
 0x25e   : > { %1890 = vst [vmem:[%s4046_s10] sm:$0xff] %v1858_v18  ;;  %v1785_v57 = vadd.f32 %v2140_v47, %v4040_v24  ;;  %v1779_v19 = vpop.f32.mrb[1].mxu1  ;;  %v4482_v47 = vld [vmem:[#allocation27_spill] sm:$0xff] }
 0x25f   : > { %v1780_v7 = vadd.f32 %v4040_v24, %v1779_v19  ;;  %v4052_v27 = vpop.permute.xlu1 %818 }
 0x260   : > { %v1875_v63 = vmax.f32 %v1785_v57, 0.0  ;;  %v4054_v43 = vpop.permute.xlu0 %786  ;;  %v1386_v57 = vsel %vm1355_vm6, %v4482_v47, %v4052_v27 }
 0x261   : > { %v1874_v9 = vmax.f32 %v1780_v7, 0.0  ;;  %v4483_v7 = vld [vmem:[#allocation18_spill] sm:$0xff] }
 0x262   : > { %1907 = vst [vmem:[%s4046_s10 + $0x88] sm:$0xff] %v1875_v63  ;;  %v1370_v63 = vsel %vm1355_vm6, %v4483_v7, %v4054_v43  ;;  %v4485_v43 = vld [vmem:[#allocation19_spill] sm:$0xff] }
 0x263   : > { %1906 = vst [vmem:[%s4046_s10 + $0x80] sm:$0xff] %v1874_v9  ;;  %v1118_v26 = vpop.permute.xlu1 %1117 }
 0x264   : > { %v1086_v28 = vpop.permute.xlu0 %1085  ;;  %v1484_v4 = vsel %vm1454_vm9, %v1451_v52, %v1118_v26 }
 0x265   : > { %v1468_v17 = vsel %vm1454_vm9, %v1435_v40, %v1086_v28 }
 0x267   : > { %v1217_v58 = vpop.permute.xlu1 %1216 }
 0x268   : > { %v1516_v6 = vsel %vm1487_vm10, %v1483_v1, %v1217_v58  ;;  %v1185_v35 = vpop.permute.xlu0 %1184 }
 0x269   : > { %v1500_v14 = vsel %vm1487_vm10, %v1467_v41, %v1185_v35  ;;  %2156 = vmatprep.mubr.msk.f32.mxu1 %vm1532_vm11, %v1516_v6 }
 0x26a   : > { %2132 = vmatprep.mubr.msk.f32.mxu0 %vm1532_vm11, %v1500_v14 }
 0x26b   : > { %v821_v56 = vpop.permute.xlu1 %820 }
 0x26c   : > { %v789_v3 = vpop.permute.xlu0 %788  ;;  %v1387_v60 = vsel %vm1355_vm6, %v4484_v37, %v821_v56 }
 0x26d   : > { %v1371_v2 = vsel %vm1355_vm6, %v4485_v43, %v789_v3 }
 0x26f   : > { %v920_v16 = vpop.permute.xlu1 %919 }
 0x270   : > { %v888_v8 = vpop.permute.xlu0 %887  ;;  %v1419_v9 = vsel %vm1388_vm7, %v1386_v57, %v920_v16 }
 0x271   : > { %v1403_v26 = vsel %vm1388_vm7, %v1370_v63, %v888_v8 }
 0x273   : > { %v1219_v34 = vpop.permute.xlu1 %1218 }
 0x274   : > { %v1517_v55 = vsel %vm1487_vm10, %v1484_v4, %v1219_v34  ;;  %v1187_v42 = vpop.permute.xlu0 %1186 }
 0x275   : > { %v1501_v45 = vsel %vm1487_vm10, %v1468_v17, %v1187_v42  ;;  %2157 = vmatmul.mubr.msk.f32.gmra.mrb[12].mxu1 %vm1532_vm11, %v1517_v55 }
 0x276   : > { %2133 = vmatmul.mubr.msk.f32.gmra.mrb[12].mxu0 %vm1532_vm11, %v1501_v45 }
 0x277   : > { %v922_v11 = vpop.permute.xlu1 %921 }
 0x278   : > { %v890_v54 = vpop.permute.xlu0 %889  ;;  %v1420_v1 = vsel %vm1388_vm7, %v1387_v60, %v922_v11 }
 0x279   : > { %v1404_v41 = vsel %vm1388_vm7, %v1371_v2, %v890_v54 }
 0x27b   : > { %v1018_v50 = vpop.permute.xlu1 %1017 }
 0x27c   : > { %v986_v33 = vpop.permute.xlu0 %985  ;;  %v1452_v59 = vsel %vm1421_vm8, %v1419_v9, %v1018_v50 }
 0x27d   : > { %v1436_v20 = vsel %vm1421_vm8, %v1403_v26, %v986_v33 }
 0x27f   : > { %v1020_v32 = vpop.permute.xlu1 %1019 }
 0x280   : > { %v988_v5 = vpop.permute.xlu0 %987  ;;  %v2143_v53 = vpop.f32.mrb[2].mxu1  ;;  %v1453_v6 = vsel %vm1421_vm8, %v1420_v1, %v1020_v32 }
 0x281   : > { %v2119_v48 = vpop.f32.mrb[2].mxu0  ;;  %v1795_v36 = vadd.f32 %v2143_v53, %v4040_v24  ;;  %v1789_v46 = vpop.f32.mrb[3].mxu1  ;;  %v1437_v35 = vsel %vm1421_vm8, %v1404_v41, %v988_v5 }
 0x282   : > { %v1715_v23 = vadd.f32 %v2119_v48, %v4040_v24  ;;  %v1709_v30 = vpop.f32.mrb[3].mxu0  ;;  %v1790_v51 = vadd.f32 %v4040_v24, %v1789_v46 }
 0x283   : > { %v1877_v12 = vmax.f32 %v1795_v36, 0.0  ;;  %v1710_v22 = vadd.f32 %v4040_v24, %v1709_v30  ;;  %v1120_v31 = vpop.permute.xlu1 %1119 }
 0x284   : > { %v1861_v21 = vmax.f32 %v1715_v23, 0.0  ;;  %v1876_v25 = vmax.f32 %v1790_v51, 0.0  ;;  %v1088_v38 = vpop.permute.xlu0 %1087  ;;  %v1485_v28 = vsel %vm1454_vm9, %v1452_v59, %v1120_v31 }
 0x285   : > { %1909 = vst [vmem:[%s4046_s10 + $0x98] sm:$0xff] %v1877_v12  ;;  %v1860_v18 = vmax.f32 %v1710_v22, 0.0  ;;  %v1469_v27 = vsel %vm1454_vm9, %v1436_v20, %v1088_v38 }
 0x286   : > { %1893 = vst [vmem:[%s4046_s10 + $0x18] sm:$0xff] %v1861_v21  ;;  %1908 = vst [vmem:[%s4046_s10 + $0x90] sm:$0xff] %v1876_v25 }
 0x287   : > { %1892 = vst [vmem:[%s4046_s10 + $0x10] sm:$0xff] %v1860_v18  ;;  %v1122_v15 = vpop.permute.xlu1 %1121 }
 0x288   : > { %v1090_v19 = vpop.permute.xlu0 %1089  ;;  %v1486_v14 = vsel %vm1454_vm9, %v1453_v6, %v1122_v15 }
 0x289   : > { %v1470_v16 = vsel %vm1454_vm9, %v1437_v35, %v1090_v19 }
 0x28b   : > { %v1221_v13 = vpop.permute.xlu1 %1220 }
 0x28c   : > { %v1518_v39 = vsel %vm1487_vm10, %v1485_v28, %v1221_v13  ;;  %v1189_v44 = vpop.permute.xlu0 %1188 }
 0x28d   : > { %v1502_v58 = vsel %vm1487_vm10, %v1469_v27, %v1189_v44  ;;  %2159 = vmatprep.mubr.msk.f32.mxu1 %vm1532_vm11, %v1518_v39 }
 0x28e   : > { %2135 = vmatprep.mubr.msk.f32.mxu0 %vm1532_vm11, %v1502_v58 }
 0x28f   : > { %v1223_v56 = vpop.permute.xlu1 %1222 }
 0x290   : > { %v1519_v3 = vsel %vm1487_vm10, %v1486_v14, %v1223_v56  ;;  %v1191_v49 = vpop.permute.xlu0 %1190 }
 0x291   : > { %v1503_v0 = vsel %vm1487_vm10, %v1470_v16, %v1191_v49  ;;  %2160 = vmatmul.mubr.msk.f32.gmra.mrb[14].mxu1 %vm1532_vm11, %v1519_v3 }
 0x292   : > { %2136 = vmatmul.mubr.msk.f32.gmra.mrb[14].mxu0 %vm1532_vm11, %v1503_v0 }
 0x2a8   : > { %v2146_v8 = vpop.f32.mrb[4].mxu1 }
 0x2a9   : > { %v2122_v61 = vpop.f32.mrb[4].mxu0  ;;  %v1805_v10 = vadd.f32 %v2146_v8, %v4040_v24  ;;  %v1799_v62 = vpop.f32.mrb[5].mxu1 }
 0x2aa   : > { %v1725_v29 = vadd.f32 %v2122_v61, %v4040_v24  ;;  %v1719_v52 = vpop.f32.mrb[5].mxu0  ;;  %v1800_v40 = vadd.f32 %v4040_v24, %v1799_v62 }
 0x2ab   : > { %v1879_v4 = vmax.f32 %v1805_v10, 0.0  ;;  %v1720_v34 = vadd.f32 %v4040_v24, %v1719_v52 }
 0x2ac   : > { %v1863_v17 = vmax.f32 %v1725_v29, 0.0  ;;  %v1878_v55 = vmax.f32 %v1800_v40, 0.0 }
 0x2ad   : > { %1911 = vst [vmem:[%s4046_s10 + $0xa8] sm:$0xff] %v1879_v4  ;;  %v1862_v42 = vmax.f32 %v1720_v34, 0.0 }
 0x2ae   : > { %1895 = vst [vmem:[%s4046_s10 + $0x28] sm:$0xff] %v1863_v17  ;;  %1910 = vst [vmem:[%s4046_s10 + $0xa0] sm:$0xff] %v1878_v55 }
 0x2af   : > { %1894 = vst [vmem:[%s4046_s10 + $0x20] sm:$0xff] %v1862_v42 }
 0x2d0   : > { %v2149_v45 = vpop.f32.mrb[6].mxu1 }
 0x2d1   : > { %v2125_v11 = vpop.f32.mrb[6].mxu0  ;;  %v1815_v54 = vadd.f32 %v2149_v45, %v4040_v24  ;;  %v1809_v50 = vpop.f32.mrb[7].mxu1 }
 0x2d2   : > { %v1735_v33 = vadd.f32 %v2125_v11, %v4040_v24  ;;  %v1729_v32 = vpop.f32.mrb[7].mxu0  ;;  %v1810_v5 = vadd.f32 %v4040_v24, %v1809_v50 }
 0x2d3   : > { %v1881_v53 = vmax.f32 %v1815_v54, 0.0  ;;  %v1730_v48 = vadd.f32 %v4040_v24, %v1729_v32 }
 0x2d4   : > { %v1865_v36 = vmax.f32 %v1735_v33, 0.0  ;;  %v1880_v46 = vmax.f32 %v1810_v5, 0.0 }
 0x2d5   : > { %1913 = vst [vmem:[%s4046_s10 + $0xb8] sm:$0xff] %v1881_v53  ;;  %v1864_v23 = vmax.f32 %v1730_v48, 0.0 }
 0x2d6   : > { %1897 = vst [vmem:[%s4046_s10 + $0x38] sm:$0xff] %v1865_v36  ;;  %1912 = vst [vmem:[%s4046_s10 + $0xb0] sm:$0xff] %v1880_v46 }
 0x2d7   : > { %1896 = vst [vmem:[%s4046_s10 + $0x30] sm:$0xff] %v1864_v23 }
 0x2f8   : > { %v2152_v30 = vpop.f32.mrb[8].mxu1 }
 0x2f9   : > { %v2128_v51 = vpop.f32.mrb[8].mxu0  ;;  %v1825_v12 = vadd.f32 %v2152_v30, %v4040_v24  ;;  %v1819_v22 = vpop.f32.mrb[9].mxu1 }
 0x2fa   : > { %v1745_v31 = vadd.f32 %v2128_v51, %v4040_v24  ;;  %v1739_v21 = vpop.f32.mrb[9].mxu0  ;;  %v1820_v25 = vadd.f32 %v4040_v24, %v1819_v22 }
 0x2fb   : > { %v1883_v38 = vmax.f32 %v1825_v12, 0.0  ;;  %v1740_v18 = vadd.f32 %v4040_v24, %v1739_v21 }
 0x2fc   : > { %v1867_v15 = vmax.f32 %v1745_v31, 0.0  ;;  %v1882_v47 = vmax.f32 %v1820_v25, 0.0 }
 0x2fd   : > { %1915 = vst [vmem:[%s4046_s10 + $0xc8] sm:$0xff] %v1883_v38  ;;  %v1866_v57 = vmax.f32 %v1740_v18, 0.0 }
 0x2fe   : > { %1899 = vst [vmem:[%s4046_s10 + $0x48] sm:$0xff] %v1867_v15  ;;  %1914 = vst [vmem:[%s4046_s10 + $0xc0] sm:$0xff] %v1882_v47 }
 0x2ff   : > { %1898 = vst [vmem:[%s4046_s10 + $0x40] sm:$0xff] %v1866_v57 }
 0x320   : > { %v2155_v19 = vpop.f32.mrb[10].mxu1 }
 0x321   : > { %v2131_v7 = vpop.f32.mrb[10].mxu0  ;;  %v1835_v63 = vadd.f32 %v2155_v19, %v4040_v24  ;;  %v1829_v9 = vpop.f32.mrb[11].mxu1 }
 0x322   : > { %v1755_v26 = vadd.f32 %v2131_v7, %v4040_v24  ;;  %v1749_v59 = vpop.f32.mrb[11].mxu0  ;;  %v1830_v20 = vadd.f32 %v4040_v24, %v1829_v9 }
 0x323   : > { %v1885_v28 = vmax.f32 %v1835_v63, 0.0  ;;  %v1750_v13 = vadd.f32 %v4040_v24, %v1749_v59 }
 0x324   : > { %v1869_v37 = vmax.f32 %v1755_v26, 0.0  ;;  %v1884_v60 = vmax.f32 %v1830_v20, 0.0 }
 0x325   : > { %1917 = vst [vmem:[%s4046_s10 + $0xd8] sm:$0xff] %v1885_v28  ;;  %v1868_v27 = vmax.f32 %v1750_v13, 0.0 }
 0x326   : > { %1901 = vst [vmem:[%s4046_s10 + $0x58] sm:$0xff] %v1869_v37  ;;  %1916 = vst [vmem:[%s4046_s10 + $0xd0] sm:$0xff] %v1884_v60 }
 0x327   : > { %1900 = vst [vmem:[%s4046_s10 + $0x50] sm:$0xff] %v1868_v27 }
 0x348   : > { %v2158_v39 = vpop.f32.mrb[12].mxu1 }
 0x349   : > { %v2134_v44 = vpop.f32.mrb[12].mxu0  ;;  %v1845_v43 = vadd.f32 %v2158_v39, %v4040_v24  ;;  %v1839_v2 = vpop.f32.mrb[13].mxu1 }
 0x34a   : > { %v1765_v1 = vadd.f32 %v2134_v44, %v4040_v24  ;;  %v1759_v58 = vpop.f32.mrb[13].mxu0  ;;  %v1840_v41 = vadd.f32 %v4040_v24, %v1839_v2 }
 0x34b   : > { %v1887_v6 = vmax.f32 %v1845_v43, 0.0  ;;  %v1760_v35 = vadd.f32 %v4040_v24, %v1759_v58 }
 0x34c   : > { %v1871_v14 = vmax.f32 %v1765_v1, 0.0  ;;  %v1886_v56 = vmax.f32 %v1840_v41, 0.0 }
 0x34d   : > { %1919 = vst [vmem:[%s4046_s10 + $0xe8] sm:$0xff] %v1887_v6  ;;  %v1870_v16 = vmax.f32 %v1760_v35, 0.0 }
 0x34e   : > { %1903 = vst [vmem:[%s4046_s10 + $0x68] sm:$0xff] %v1871_v14  ;;  %1918 = vst [vmem:[%s4046_s10 + $0xe0] sm:$0xff] %v1886_v56 }
 0x34f   : > { %1902 = vst [vmem:[%s4046_s10 + $0x60] sm:$0xff] %v1870_v16 }
 0x364   : > { %v2161_v3 = vpop.f32.mrb[14].mxu1 }
 0x365   : > { %v2137_v49 = vpop.f32.mrb[14].mxu0  ;;  %v1855_v0 = vadd.f32 %v2161_v3, %v4040_v24  ;;  %v1849_v8 = vpop.f32.mrb[15].mxu1 }
 0x366   : > { %v1775_v61 = vadd.f32 %v2137_v49, %v4040_v24  ;;  %v1769_v10 = vpop.f32.mrb[15].mxu0  ;;  %v1850_v62 = vadd.f32 %v4040_v24, %v1849_v8 }
 0x367   : > { %v1889_v29 = vmax.f32 %v1855_v0, 0.0  ;;  %v1770_v52 = vadd.f32 %v4040_v24, %v1769_v10 }
 0x368   : > { %v1873_v40 = vmax.f32 %v1775_v61, 0.0  ;;  %v1888_v4 = vmax.f32 %v1850_v62, 0.0 }
 0x369   : > { %1921 = vst [vmem:[%s4046_s10 + $0xf8] sm:$0xff] %v1889_v29  ;;  %v1872_v34 = vmax.f32 %v1770_v52, 0.0 }
 0x36a   : > { %1905 = vst [vmem:[%s4046_s10 + $0x78] sm:$0xff] %v1873_v40  ;;  %1920 = vst [vmem:[%s4046_s10 + $0xf0] sm:$0xff] %v1888_v4 }
 0x36b   : > { %1904 = vst [vmem:[%s4046_s10 + $0x70] sm:$0xff] %v1872_v34 }
 0x36c   : > { %2272 = shalt.err (!%p2269_p5)
}
 0x36d   : > { %s2273_s4 = scalar_lea.hbm %s4177_s23, 4096  ;;  %s2277_s7 = scalar_lea.hbm %s4237_s3, 8192 }
 0x36e   : > { %p2274_p6 = scmp.ne.s32.totalorder %s4177_s23, %s2273_s4  ;;  %p2278_p10 = scmp.lt.u32.totalorder %s4177_s23, %s4237_s3 }
 0x36f   : > { %p2279_p11 = scmp.lt.u32.totalorder %s2277_s7, %s2273_s4  ;;  %p2281_p13 = scmp.lt.u32.totalorder %s2273_s4, %s4177_s23 }
 0x370   : > { %p2275_p7 = pnand %p2274_p6, %p2409_p4 }
 0x371   : > { %p2280_p12 = por %p2279_p11, %p2278_p10 }
 0x372   : > { %p2276_p9 = pneg %p2275_p7 }
 0x373   : > { %p2282_p0 = por %p2281_p13, %p2280_p12 }
 0x375   : > { %p2283_p1 = pnand %p2282_p0, %p2276_p9 }
 0x377   : > { %2286 = shalt.err (!%p2283_p1)
}
 0x378   : > { %s2348_s10 = smov 128  }
 0x379   : > { %2177 = dma.vmem_to_hbm [thread:$0]  (%p2409_p4), %s4180_s18, 4096, %s4177_s23, %s4187_s15, %s2348_s10, %s2348_s10, %s2340_s5  }
 0x37a PF: > { %p2183_p2 = scmp.ge.s32.totalorder %s2337_s17, 2  ;;  %s1953_s11 = sand.u32 1, %s2317_s12  }
 0x37b   : > { %s1954_s19 = scalar_lea.sflag [#allocation3], %s1953_s11 }
 0x37c   : > { %p2180_p3 = pnand %p2183_p2, %p2416_p8 }
 0x37e   : > { %2312 = dma.done.wait (!%p2180_p3), %s1954_s19, 4096  }
 0x37f   : > { %2314 = vsyncadd (!%p2180_p3), %s1954_s19, 4294963200  ;;  %s16_s17 = sadd.s32 1, %s2337_s17   ;;  %s4486_s12 = smov %s2321_s13 }
 0x380   : > { %p13_p5 = scmp.ge.s32.totalorder %s16_s17, 4   ;;  %s4487_s13 = smov %s2325_s14 }
 0x381   : > { %s4488_s14 = smov %s2422_s25  ;;  %s4489_s15 = smov %s2333_s16 }
 0x382   : > { %s4490_s16 = smov %s4492_s20  ;;  %15 = sbr.rel (!%p13_p5) target bundleno = 4 (0x4), region = 67 }
 0x389   :  { %1959 = vsyncpa [#allocation3], 1 }
 0x38a   :  { %1961 = vsyncpa [#allocation3 + $0x1], 1 }

</bundles_post_ra>
